<compile_context>
chip_gen: v7x
topology: tpu7x:2x2x1
jax: 0.10.0
libtpu: 0.0.40
codegen_flags: <defaults>
</compile_context>

<pallas_src>
import jax
import jax.numpy as jnp
from jax.experimental import pallas as pl
from jax.experimental.pallas import tpu as pltpu

IN_FEATURES = 32
DIMS = [IN_FEATURES, 1024, 512, 64, 512, 1024, 1]


def mlp_kernel(x_ref,
               w1_ref,                  # (33, 1024)  bias folded (ones col in x)
               w2_ref, b2_ref,          # (1024, 512), (1, 512)
               w3_ref, b3_ref,          # (512, 128),  (1, 128)  col 64 -> const 1
               w4_ref,                  # (128, 512)  row 64 = b4 (bias folded)
               w5_ref, b5_ref,          # (512, 1024), (1, 1024)
               w6_ref, b6_ref,          # (1024, 1),   (1, 1)
               o_ref):
    """Fused 6-layer MLP on one (batch_tile, 33) bf16 block.

    All weights are VMEM-resident (~2.4 MiB bf16); the grid only walks batch
    tiles. Matmuls run on the MXU in bf16 with f32 accumulation; bias adds are
    f32; ReLU/downcast run in bf16 (ReLU commutes with the downcast).
    """
    h = x_ref[...]                                   # bf16, ones column included

    def dense_relu(h, w_ref, b_ref=None):
        y = jnp.dot(h, w_ref[...], preferred_element_type=jnp.float32)
        if b_ref is not None:
            y = y + b_ref[...]                       # f32 bias, broadcast (1, out)
        # bf16 ReLU: identical result, half the VALU work on v6e/v7x.
        return jnp.maximum(y.astype(jnp.bfloat16), 0)

    h = dense_relu(h, w1_ref)                        # L1 (bias folded)
    h = dense_relu(h, w2_ref, b2_ref)                # L2
    h = dense_relu(h, w3_ref, b3_ref)                # L3 (width 128, col 64 == 1)
    h = dense_relu(h, w4_ref)                        # L4 (bias folded via col 64)
    h = dense_relu(h, w5_ref, b5_ref)                # L5

    # Head on the MXU (N=1 pads anyway; keeps the VALU/XLU free).
    logits = jnp.dot(h, w6_ref[...], preferred_element_type=jnp.float32)
    logits = logits + b6_ref[...]                    # (tile, 1) f32
    o_ref[...] = jax.nn.sigmoid(logits).astype(o_ref.dtype)


def _choose_batch_tile(batch):
    # Large tiles amortize the ~0.35us per-grid-step overhead (kernel is
    # compute-bound); aim for >=2 grid steps so the "parallel" axis can shard
    # across v7x's two TensorCores. Cap 1024 keeps peak VMEM well under 48 MiB.
    tile = pl.next_power_of_2(max(int(pl.cdiv(batch, 2)), 1))
    return int(max(8, min(1024, tile)))


def _prepare_params(params):
    """Cast weights to bf16 (MXU-native), keep biases f32, fold L1/L4 biases."""
    p32 = [(jnp.asarray(w, jnp.float32), jnp.asarray(b, jnp.float32).reshape(1, -1))
           for (w, b) in params]
    (w1, b1), (w2, b2), (w3, b3), (w4, b4), (w5, b5), (w6, b6) = p32
    bf16 = jnp.bfloat16

    # L1: bias becomes an extra weight row; x carries a matching ones column.
    w1a = jnp.concatenate([w1, b1], axis=0).astype(bf16)               # (33, 1024)

    # L3 widened to 128 outputs (lane-dense, free on the MXU): columns 64..127
    # of the weight are zero; bias column 64 is 1.0 so relu gives a constant 1.
    w3a = jnp.concatenate(
        [w3, jnp.zeros((w3.shape[0], 64), jnp.float32)], axis=1).astype(bf16)  # (512, 128)
    b3a = jnp.concatenate(
        [b3, jnp.ones((1, 1), jnp.float32), jnp.zeros((1, 63), jnp.float32)],
        axis=1)                                                                 # (1, 128) f32

    # L4: row 64 carries b4 (multiplied by the constant-1 column); rows 65..127 zero.
    w4a = jnp.concatenate(
        [w4, b4, jnp.zeros((63, w4.shape[1]), jnp.float32)], axis=0).astype(bf16)  # (128, 512)

    return [
        w1a,
        w2.astype(bf16), b2,
        w3a, b3a,
        w4a,
        w5.astype(bf16), b5,
        w6.astype(bf16), b6,
    ]


def _build_call(batch_pad, batch_tile, param_shapes):
    def const_spec(shape):
        # Constant block index -> Pallas only DMAs these once; weights stay resident.
        return pl.BlockSpec(shape, lambda i, _r=len(shape): (0,) * _r)

    in_specs = [pl.BlockSpec((batch_tile, IN_FEATURES + 1), lambda i: (i, 0))]
    in_specs += [const_spec(s) for s in param_shapes]

    return pl.pallas_call(
        mlp_kernel,
        out_shape=jax.ShapeDtypeStruct((batch_pad, 1), jnp.float32),
        grid_spec=pltpu.PrefetchScalarGridSpec(
            num_scalar_prefetch=0,
            grid=(batch_pad // batch_tile,),
            in_specs=in_specs,
            out_specs=pl.BlockSpec((batch_tile, 1), lambda i: (i, 0)),
        ),
        compiler_params=pltpu.CompilerParams(
            dimension_semantics=("parallel",),
            # ~2.4 MiB bf16 weights + activation scratch (<~25 MiB at tile=1024);
            # 48 MiB leaves headroom yet stays under v7x's 64 MiB physical VMEM.
            vmem_limit_bytes=48 << 20,
        ),
    )


def model4_2_forward(x, params, *, batch_tile=None):
    B, F = x.shape
    assert F == IN_FEATURES
    tile = batch_tile if batch_tile is not None else _choose_batch_tile(B)
    n_tiles = int(pl.cdiv(B, tile))
    if n_tiles > 1 and n_tiles % 2 == 1:
        n_tiles += 1          # even step count so v7x's 2 TCs split the grid evenly
    B_pad = n_tiles * tile

    # Append the ones column (for the folded L1 bias) and stream x as bf16.
    x_aug = jnp.concatenate([x, jnp.ones((B, 1), x.dtype)], axis=1).astype(jnp.bfloat16)
    if B_pad != B:
        x_aug = jnp.pad(x_aug, ((0, B_pad - B), (0, 0)))   # padded rows sliced off below

    flat_params = _prepare_params(params)
    shapes = [p.shape for p in flat_params]

    out = _build_call(B_pad, tile, shapes)(x_aug, *flat_params)
    return out[:B]


def init_params(key):
    """Deterministic init mimicking PyTorch Linear's U(-1/sqrt(fan_in), 1/sqrt(fan_in))."""
    params = []
    for li in range(6):
        fan_in, fan_out = DIMS[li], DIMS[li + 1]
        key, kw, kb = jax.random.split(key, 3)
        bound = 1.0 / jnp.sqrt(jnp.float32(fan_in))
        w = jax.random.uniform(kw, (fan_in, fan_out), jnp.float32, -bound, bound)
        b = jax.random.uniform(kb, (1, fan_out), jnp.float32, -bound, bound)
        params.append((w, b))
    return params


def reference_forward(x, params):
    """Pure f32 reference matching the PyTorch module semantics."""
    h = x
    for i, (w, b) in enumerate(params):
        h = h @ w + b
        h = jnp.maximum(h, 0.0) if i < 5 else jax.nn.sigmoid(h)
    return h


if __name__ == "__main__":
    root = jax.random.PRNGKey(0)
    kparams, kx1, kx2 = jax.random.split(root, 3)
    params = init_params(kparams)

    # Case 1: tiny batch (single grid step).
    x1 = jax.random.normal(kx1, (8, IN_FEATURES), jnp.float32)
    out1 = jax.block_until_ready(model4_2_forward(x1, params))
    ref1 = reference_forward(x1, params)
    assert out1.shape == (8, 1)
    err1 = float(jnp.max(jnp.abs(out1 - ref1)))
    # bf16 weights/activations vs f32 reference -> loosened tolerance.
    assert err1 < 5e-2, f"mismatch (small batch): max abs err {err1}"

    # Case 2: batch not divisible by the tile (exercises padding + 2-step grid).
    x2 = jax.random.normal(kx2, (200, IN_FEATURES), jnp.float32)
    out2 = jax.block_until_ready(model4_2_forward(x2, params))
    ref2 = reference_forward(x2, params)
    assert out2.shape == (200, 1)
    err2 = float(jnp.max(jnp.abs(out2 - ref2)))
    assert err2 < 5e-2, f"mismatch (padded batch): max abs err {err2}"

    print("KERNEL_OK")
</pallas_src>

<mosaic_0001>
module attributes {stable_mosaic.version = 11 : i64} {
  func.func @mlp_kernel(%arg0: i32, %arg1: memref<8x33xbf16, #tpu.memory_space<vmem>>, %arg2: memref<33x1024xbf16, #tpu.memory_space<vmem>>, %arg3: memref<1024x512xbf16, #tpu.memory_space<vmem>>, %arg4: memref<1x512xf32, #tpu.memory_space<vmem>>, %arg5: memref<512x128xbf16, #tpu.memory_space<vmem>>, %arg6: memref<1x128xf32, #tpu.memory_space<vmem>>, %arg7: memref<128x512xbf16, #tpu.memory_space<vmem>>, %arg8: memref<512x1024xbf16, #tpu.memory_space<vmem>>, %arg9: memref<1x1024xf32, #tpu.memory_space<vmem>>, %arg10: memref<1024x1xbf16, #tpu.memory_space<vmem>>, %arg11: memref<1x1xf32, #tpu.memory_space<vmem>>, %arg12: memref<8x1xf32, #tpu.memory_space<vmem>>) attributes {dimension_semantics = [#tpu.dimension_semantics<parallel>], iteration_bounds = array<i64: 1>, scalar_prefetch = 0 : i64, scratch_operands = 0 : i64, tpu.core_type = #tpu.core_type<tc>, window_params = [{transform_indices = @transform_0, window_bounds = array<i64: 8, 33>}, {pipeline_mode = #tpu.pipeline_mode<synchronous>, transform_indices = @transform_1, window_bounds = array<i64: 33, 1024>}, {pipeline_mode = #tpu.pipeline_mode<synchronous>, transform_indices = @transform_2, window_bounds = array<i64: 1024, 512>}, {pipeline_mode = #tpu.pipeline_mode<synchronous>, transform_indices = @transform_3, window_bounds = array<i64: 1, 512>}, {pipeline_mode = #tpu.pipeline_mode<synchronous>, transform_indices = @transform_4, window_bounds = array<i64: 512, 128>}, {pipeline_mode = #tpu.pipeline_mode<synchronous>, transform_indices = @transform_5, window_bounds = array<i64: 1, 128>}, {pipeline_mode = #tpu.pipeline_mode<synchronous>, transform_indices = @transform_6, window_bounds = array<i64: 128, 512>}, {pipeline_mode = #tpu.pipeline_mode<synchronous>, transform_indices = @transform_7, window_bounds = array<i64: 512, 1024>}, {pipeline_mode = #tpu.pipeline_mode<synchronous>, transform_indices = @transform_8, window_bounds = array<i64: 1, 1024>}, {pipeline_mode = #tpu.pipeline_mode<synchronous>, transform_indices = @transform_9, window_bounds = array<i64: 1024, 1>}, {pipeline_mode = #tpu.pipeline_mode<synchronous>, transform_indices = @transform_10, window_bounds = array<i64: 1, 1>}, {transform_indices = @transform_11, window_bounds = array<i64: 8, 1>}]} {
    %c0 = arith.constant 0 : index
    %c0_0 = arith.constant 0 : index
    %0 = vector.load %arg1[%c0, %c0_0] : memref<8x33xbf16, #tpu.memory_space<vmem>>, vector<8x33xbf16>
    %c0_1 = arith.constant 0 : index
    %c0_2 = arith.constant 0 : index
    %1 = vector.load %arg2[%c0_1, %c0_2] : memref<33x1024xbf16, #tpu.memory_space<vmem>>, vector<33x1024xbf16>
    %cst = arith.constant dense<0.000000e+00> : vector<8x1024xf32>
    %2 = tpu.matmul %0, %1, %cst {dimension_numbers = #tpu.dot_dimension_numbers<[1], [0], [0], [1], [0, 0, 1, 1], [], []>} : vector<8x33xbf16>, vector<33x1024xbf16>, vector<8x1024xf32> -> vector<8x1024xf32>
    %3 = arith.truncf %2 : vector<8x1024xf32> to vector<8x1024xbf16>
    %cst_3 = arith.constant 0.000000e+00 : bf16
    %4 = vector.broadcast %cst_3 : bf16 to vector<8x1024xbf16>
    %5 = arith.maximumf %3, %4 : vector<8x1024xbf16>
    %c0_4 = arith.constant 0 : index
    %c0_5 = arith.constant 0 : index
    %6 = vector.load %arg3[%c0_4, %c0_5] : memref<1024x512xbf16, #tpu.memory_space<vmem>>, vector<1024x512xbf16>
    %cst_6 = arith.constant dense<0.000000e+00> : vector<8x512xf32>
    %7 = tpu.matmul %5, %6, %cst_6 {dimension_numbers = #tpu.dot_dimension_numbers<[1], [0], [0], [1], [0, 0, 1, 1], [], []>} : vector<8x1024xbf16>, vector<1024x512xbf16>, vector<8x512xf32> -> vector<8x512xf32>
    %c0_7 = arith.constant 0 : index
    %c0_8 = arith.constant 0 : index
    %8 = vector.load %arg4[%c0_7, %c0_8] : memref<1x512xf32, #tpu.memory_space<vmem>>, vector<1x512xf32>
    %9 = vector.broadcast %8 : vector<1x512xf32> to vector<8x512xf32>
    %10 = arith.addf %7, %9 : vector<8x512xf32>
    %11 = arith.truncf %10 : vector<8x512xf32> to vector<8x512xbf16>
    %cst_9 = arith.constant 0.000000e+00 : bf16
    %12 = vector.broadcast %cst_9 : bf16 to vector<8x512xbf16>
    %13 = arith.maximumf %11, %12 : vector<8x512xbf16>
    %c0_10 = arith.constant 0 : index
    %c0_11 = arith.constant 0 : index
    %14 = vector.load %arg5[%c0_10, %c0_11] : memref<512x128xbf16, #tpu.memory_space<vmem>>, vector<512x128xbf16>
    %cst_12 = arith.constant dense<0.000000e+00> : vector<8x128xf32>
    %15 = tpu.matmul %13, %14, %cst_12 {dimension_numbers = #tpu.dot_dimension_numbers<[1], [0], [0], [1], [0, 0, 1, 1], [], []>} : vector<8x512xbf16>, vector<512x128xbf16>, vector<8x128xf32> -> vector<8x128xf32>
    %c0_13 = arith.constant 0 : index
    %c0_14 = arith.constant 0 : index
    %16 = vector.load %arg6[%c0_13, %c0_14] : memref<1x128xf32, #tpu.memory_space<vmem>>, vector<1x128xf32>
    %17 = vector.broadcast %16 : vector<1x128xf32> to vector<8x128xf32>
    %18 = arith.addf %15, %17 : vector<8x128xf32>
    %19 = arith.truncf %18 : vector<8x128xf32> to vector<8x128xbf16>
    %cst_15 = arith.constant 0.000000e+00 : bf16
    %20 = vector.broadcast %cst_15 : bf16 to vector<8x128xbf16>
    %21 = arith.maximumf %19, %20 : vector<8x128xbf16>
    %c0_16 = arith.constant 0 : index
    %c0_17 = arith.constant 0 : index
    %22 = vector.load %arg7[%c0_16, %c0_17] : memref<128x512xbf16, #tpu.memory_space<vmem>>, vector<128x512xbf16>
    %cst_18 = arith.constant dense<0.000000e+00> : vector<8x512xf32>
    %23 = tpu.matmul %21, %22, %cst_18 {dimension_numbers = #tpu.dot_dimension_numbers<[1], [0], [0], [1], [0, 0, 1, 1], [], []>} : vector<8x128xbf16>, vector<128x512xbf16>, vector<8x512xf32> -> vector<8x512xf32>
    %24 = arith.truncf %23 : vector<8x512xf32> to vector<8x512xbf16>
    %cst_19 = arith.constant 0.000000e+00 : bf16
    %25 = vector.broadcast %cst_19 : bf16 to vector<8x512xbf16>
    %26 = arith.maximumf %24, %25 : vector<8x512xbf16>
    %c0_20 = arith.constant 0 : index
    %c0_21 = arith.constant 0 : index
    %27 = vector.load %arg8[%c0_20, %c0_21] : memref<512x1024xbf16, #tpu.memory_space<vmem>>, vector<512x1024xbf16>
    %cst_22 = arith.constant dense<0.000000e+00> : vector<8x1024xf32>
    %28 = tpu.matmul %26, %27, %cst_22 {dimension_numbers = #tpu.dot_dimension_numbers<[1], [0], [0], [1], [0, 0, 1, 1], [], []>} : vector<8x512xbf16>, vector<512x1024xbf16>, vector<8x1024xf32> -> vector<8x1024xf32>
    %c0_23 = arith.constant 0 : index
    %c0_24 = arith.constant 0 : index
    %29 = vector.load %arg9[%c0_23, %c0_24] : memref<1x1024xf32, #tpu.memory_space<vmem>>, vector<1x1024xf32>
    %30 = vector.broadcast %29 : vector<1x1024xf32> to vector<8x1024xf32>
    %31 = arith.addf %28, %30 : vector<8x1024xf32>
    %32 = arith.truncf %31 : vector<8x1024xf32> to vector<8x1024xbf16>
    %cst_25 = arith.constant 0.000000e+00 : bf16
    %33 = vector.broadcast %cst_25 : bf16 to vector<8x1024xbf16>
    %34 = arith.maximumf %32, %33 : vector<8x1024xbf16>
    %c0_26 = arith.constant 0 : index
    %c0_27 = arith.constant 0 : index
    %35 = vector.load %arg10[%c0_26, %c0_27] : memref<1024x1xbf16, #tpu.memory_space<vmem>>, vector<1024x1xbf16>
    %cst_28 = arith.constant dense<0.000000e+00> : vector<8x1xf32>
    %36 = tpu.matmul %34, %35, %cst_28 {dimension_numbers = #tpu.dot_dimension_numbers<[1], [0], [0], [1], [0, 0, 1, 1], [], []>} : vector<8x1024xbf16>, vector<1024x1xbf16>, vector<8x1xf32> -> vector<8x1xf32>
    %c0_29 = arith.constant 0 : index
    %c0_30 = arith.constant 0 : index
    %37 = vector.load %arg11[%c0_29, %c0_30] : memref<1x1xf32, #tpu.memory_space<vmem>>, vector<1x1xf32>
    %38 = vector.broadcast %37 : vector<1x1xf32> to vector<8x1xf32>
    %39 = arith.addf %36, %38 : vector<8x1xf32>
    %40 = arith.negf %39 : vector<8x1xf32>
    %41 = math.exp %40 : vector<8x1xf32>
    %cst_31 = arith.constant 1.000000e+00 : f32
    %42 = vector.broadcast %cst_31 : f32 to vector<8x1xf32>
    %43 = arith.addf %42, %41 : vector<8x1xf32>
    %44 = arith.divf %42, %43 : vector<8x1xf32>
    %c0_32 = arith.constant 0 : index
    %c0_33 = arith.constant 0 : index
    %45 = vector.load %arg12[%c0_32, %c0_33] : memref<8x1xf32, #tpu.memory_space<vmem>>, vector<8x1xf32>
    tpu.vector_store %arg12[%c0_32, %c0_33], %44 {strides = array<i32>} : memref<8x1xf32, #tpu.memory_space<vmem>>, vector<8x1xf32>,
    return
  }
  func.func @transform_0(%arg0: i32) -> (i32, i32) {
    %c0_i32 = arith.constant 0 : i32
    %c0_i32_0 = arith.constant 0 : i32
    return %arg0, %c0_i32 : i32, i32
  }
  func.func @transform_1(%arg0: i32) -> (i32, i32) {
    %c0_i32 = arith.constant 0 : i32
    %c0_i32_0 = arith.constant 0 : i32
    %c0_i32_1 = arith.constant 0 : i32
    return %c0_i32, %c0_i32_0 : i32, i32
  }
  func.func @transform_2(%arg0: i32) -> (i32, i32) {
    %c0_i32 = arith.constant 0 : i32
    %c0_i32_0 = arith.constant 0 : i32
    %c0_i32_1 = arith.constant 0 : i32
    return %c0_i32, %c0_i32_0 : i32, i32
  }
  func.func @transform_3(%arg0: i32) -> (i32, i32) {
    %c0_i32 = arith.constant 0 : i32
    %c0_i32_0 = arith.constant 0 : i32
    %c0_i32_1 = arith.constant 0 : i32
    return %c0_i32, %c0_i32_0 : i32, i32
  }
  func.func @transform_4(%arg0: i32) -> (i32, i32) {
    %c0_i32 = arith.constant 0 : i32
    %c0_i32_0 = arith.constant 0 : i32
    %c0_i32_1 = arith.constant 0 : i32
    return %c0_i32, %c0_i32_0 : i32, i32
  }
  func.func @transform_5(%arg0: i32) -> (i32, i32) {
    %c0_i32 = arith.constant 0 : i32
    %c0_i32_0 = arith.constant 0 : i32
    %c0_i32_1 = arith.constant 0 : i32
    return %c0_i32, %c0_i32_0 : i32, i32
  }
  func.func @transform_6(%arg0: i32) -> (i32, i32) {
    %c0_i32 = arith.constant 0 : i32
    %c0_i32_0 = arith.constant 0 : i32
    %c0_i32_1 = arith.constant 0 : i32
    return %c0_i32, %c0_i32_0 : i32, i32
  }
  func.func @transform_7(%arg0: i32) -> (i32, i32) {
    %c0_i32 = arith.constant 0 : i32
    %c0_i32_0 = arith.constant 0 : i32
    %c0_i32_1 = arith.constant 0 : i32
    return %c0_i32, %c0_i32_0 : i32, i32
  }
  func.func @transform_8(%arg0: i32) -> (i32, i32) {
    %c0_i32 = arith.constant 0 : i32
    %c0_i32_0 = arith.constant 0 : i32
    %c0_i32_1 = arith.constant 0 : i32
    return %c0_i32, %c0_i32_0 : i32, i32
  }
  func.func @transform_9(%arg0: i32) -> (i32, i32) {
    %c0_i32 = arith.constant 0 : i32
    %c0_i32_0 = arith.constant 0 : i32
    %c0_i32_1 = arith.constant 0 : i32
    return %c0_i32, %c0_i32_0 : i32, i32
  }
  func.func @transform_10(%arg0: i32) -> (i32, i32) {
    %c0_i32 = arith.constant 0 : i32
    %c0_i32_0 = arith.constant 0 : i32
    %c0_i32_1 = arith.constant 0 : i32
    return %c0_i32, %c0_i32_0 : i32, i32
  }
  func.func @transform_11(%arg0: i32) -> (i32, i32) {
    %c0_i32 = arith.constant 0 : i32
    %c0_i32_0 = arith.constant 0 : i32
    return %arg0, %c0_i32 : i32, i32
  }
}

</mosaic_0001>

<bundles_post_ra>
// kernel: tpu_custom_call.1
= control target key start
LH: loop header
LB: loop body
LE: loop exit
PB: predicated region body
PF: predicated region fallthrough
CT: control target
= control target key end

     0   :  { %s7713_s0 = inlined_call_operand.hbm [shape: bf16[8,33], index: 0, kind: input, shape index: {}]   ;;  %s7714_s1 = inlined_call_operand.hbm [shape: bf16[33,1024], index: 1, kind: input, shape index: {}]   ;;  %s7715_s2 = inlined_call_operand.hbm [shape: bf16[1024,512], index: 2, kind: input, shape index: {}]   ;;  %s7716_s3 = inlined_call_operand.vmem [shape: f32[1,512], index: 3, kind: input, shape index: {}]   ;;  %s7717_s4 = inlined_call_operand.vmem [shape: bf16[512,128], index: 4, kind: input, shape index: {}]   ;;  %s7718_s5 = inlined_call_operand.vmem [shape: f32[1,128], index: 5, kind: input, shape index: {}]   ;;  %s7719_s6 = inlined_call_operand.vmem [shape: bf16[128,512], index: 6, kind: input, shape index: {}]   ;;  %s7720_s7 = inlined_call_operand.hbm [shape: bf16[512,1024], index: 7, kind: input, shape index: {}]   ;;  %s7721_s8 = inlined_call_operand.vmem [shape: f32[1,1024], index: 8, kind: input, shape index: {}]   ;;  %s7722_s9 = inlined_call_operand.vmem [shape: bf16[1024,1], index: 9, kind: input, shape index: {}]   ;;  %s7723_s10 = inlined_call_operand.<no memory space> [shape: f32[1,1], index: 10, kind: input, shape index: {}]   ;;  %s7724_s11 = inlined_call_operand.vmem [shape: f32[8,1], index: 11, kind: output, shape index: {}]  }
   0x1   :  { %v16_v0 = vstv %s7723_s10 }
   0x2   :  { %17 = vst [vmem:[#allocation2] sm:$0x1] %v16_v0 }
   0x3   :  { %18 = vsyncpa [#allocation4], 0 }
   0x4   :  { %19 = vsyncpa [#allocation6], 0 }
   0x5   :  { %20 = vsyncpa [#allocation9], 0  ;;  %s7061_s19 = smov [#allocation5]   ;;  %s6967_s23 = scalar_lea.hbm %s7714_s1, 2560 }
   0x6   :  { %s36_s20 = sshll.u32 %s7061_s19, 4  ;;  %p6968_p0 = scmp.ne.s32.totalorder %s7714_s1, %s6967_s23  ;;  %s37_s20 = int_to_ptr.vmem [resolvable:$true] %s36_s20 }
   0x7   :  { %p6971_p1 = scmp.lt.u32.totalorder %s6967_s23, %s7714_s1 }
   0x9   :  { %p6973_p2 = pnand %p6971_p1, %p6968_p0 }
   0xb   :  { %6976 = shalt.err (!%p6973_p2)
}
   0xc   :  { %s6977_s10 = scalar_lea.vmem %s37_s20, 2560  ;;  %p6982_p4 = scmp.lt.s32.totalorder %s37_s20, %s37_s20 }
   0xd   :  { %p6978_p3 = scmp.ne.s32.totalorder %s37_s20, %s6977_s10  ;;  %p6983_p5 = scmp.lt.s32.totalorder %s6977_s10, %s6977_s10 }
   0xf   :  { %p6984_p6 = por %p6983_p5, %p6982_p4 }
  0x11   :  { %p6985_p7 = pnand %p6984_p6, %p6978_p3 }
  0x13   :  { %6988 = shalt.err (!%p6985_p7)
}
  0x14   :  { %s7062_s28 = smov 512   ;;  %s7063_s29 = smov 32  }
  0x15   :  { %42 = dma.hbm_to_vmem [thread:$0]  %s7714_s1, 2560, %s37_s20, [#allocation6], %s7062_s28, %s7062_s28, %s7063_s29  }
  0x16   :  { %s7064_s13 = smov [#allocation3]   ;;  %s7065_s15 = smov [#allocation7]  }
  0x17   :  { %s27_s14 = sshll.u32 %s7064_s13, 4  ;;  %s48_s16 = sshll.u32 %s7065_s15, 4  ;;  %s28_s14 = int_to_ptr.vmem [resolvable:$true] %s27_s14  ;;  %s49_s16 = int_to_ptr.vmem [resolvable:$true] %s48_s16 }
  0x18   :  { %s6989_s19 = scalar_lea.hbm %s7713_s0, 64 }
  0x19   :  { %p6990_p8 = scmp.ne.s32.totalorder %s7713_s0, %s6989_s19  ;;  %p6993_p9 = scmp.lt.u32.totalorder %s6989_s19, %s7713_s0 }
  0x1b   :  { %p6995_p10 = pnand %p6993_p9, %p6990_p8 }
  0x1d   :  { %6998 = shalt.err (!%p6995_p10)
}
  0x1e   :  { %s6999_s1 = scalar_lea.vmem %s28_s14, 64  ;;  %p7004_p12 = scmp.lt.s32.totalorder %s28_s14, %s28_s14 }
  0x1f   :  { %p7000_p11 = scmp.ne.s32.totalorder %s28_s14, %s6999_s1  ;;  %p7005_p13 = scmp.lt.s32.totalorder %s6999_s1, %s6999_s1 }
  0x21   :  { %p7006_p0 = por %p7005_p13, %p7004_p12 }
  0x23   :  { %p7007_p1 = pnand %p7006_p0, %p7000_p11 }
  0x25   :  { %7010 = shalt.err (!%p7007_p1)
}
  0x26   :  { %30 = dma.hbm_to_vmem [thread:$0]  %s7713_s0, 64, %s28_s14, [#allocation4]  }
  0x27   :  { %s7011_s10 = scalar_lea.hbm %s7715_s2, 32768 }
  0x28   :  { %p7012_p2 = scmp.ne.s32.totalorder %s7715_s2, %s7011_s10  ;;  %p7015_p3 = scmp.lt.u32.totalorder %s7011_s10, %s7715_s2 }
  0x2a   :  { %p7017_p4 = pnand %p7015_p3, %p7012_p2 }
  0x2c   :  { %7020 = shalt.err (!%p7017_p4)
}
  0x2d   :  { %s7021_s17 = scalar_lea.vmem %s49_s16, 32768  ;;  %p7026_p6 = scmp.lt.s32.totalorder %s49_s16, %s49_s16 }
  0x2e   :  { %p7022_p5 = scmp.ne.s32.totalorder %s49_s16, %s7021_s17  ;;  %p7027_p7 = scmp.lt.s32.totalorder %s7021_s17, %s7021_s17 }
  0x30   :  { %p7028_p8 = por %p7027_p7, %p7026_p6 }
  0x32   :  { %p7029_p9 = pnand %p7028_p8, %p7022_p5 }
  0x34   :  { %7032 = shalt.err (!%p7029_p9)
}
  0x35   :  { %s7066_s0 = smov 256   ;;  %s7067_s14 = smov 16  }
  0x36   :  { %54 = dma.hbm_to_vmem [thread:$0]  %s7715_s2, 32768, %s49_s16, [#allocation6], %s7066_s0, %s7066_s0, %s7067_s14  }
  0x37   :  { %s7068_s21 = smov [#allocation8]   ;;  %s7033_s1 = scalar_lea.hbm %s7720_s7, 32768 }
  0x38   :  { %s68_s22 = sshll.u32 %s7068_s21, 4  ;;  %p7034_p10 = scmp.ne.s32.totalorder %s7720_s7, %s7033_s1  ;;  %s69_s22 = int_to_ptr.vmem [resolvable:$true] %s68_s22 }
  0x39   :  { %p7037_p11 = scmp.lt.u32.totalorder %s7033_s1, %s7720_s7 }
  0x3b   :  { %p7039_p12 = pnand %p7037_p11, %p7034_p10 }
  0x3d   :  { %7042 = shalt.err (!%p7039_p12)
}
  0x3e   :  { %s7043_s10 = scalar_lea.vmem %s69_s22, 32768  ;;  %p7048_p0 = scmp.lt.s32.totalorder %s69_s22, %s69_s22 }
  0x3f   :  { %p7044_p13 = scmp.ne.s32.totalorder %s69_s22, %s7043_s10  ;;  %p7049_p1 = scmp.lt.s32.totalorder %s7043_s10, %s7043_s10 }
  0x41   :  { %p7050_p2 = por %p7049_p1, %p7048_p0 }
  0x43   :  { %p7051_p3 = pnand %p7050_p2, %p7044_p13 }
  0x45   :  { %7054 = shalt.err (!%p7051_p3)
}
  0x46   :  { %74 = dma.hbm_to_vmem [thread:$0]  %s7720_s7, 32768, %s69_s22, [#allocation9], %s7062_s28, %s7062_s28, %s7063_s29  }
  0x47   :  { %7055 = dma.done.wait [#allocation4], 64  }
  0x48   :  { %7056 = vsyncadd [#allocation4], 4294967232 }
  0x49   :  { %7057 = dma.done.wait [#allocation6], 35328  }
  0x4a   :  { %7058 = vsyncadd [#allocation6], 4294931968 }
  0x4b   :  { %7059 = dma.done.wait [#allocation9], 32768  }
  0x4c   :  { %7060 = vsyncadd [#allocation9], 4294934528  ;;  %v7069_v1 = vmov 0   ;;  %vm219_vm0 = vcmask 1040384   ;;  %v95_v2 = vld [vmem:[#allocation5] sm:$0xff]  ;;  %v96_v12 = vld [vmem:[#allocation5 + $0x8] sm:$0xff] }
  0x4d   :  { %278 = vmatprep.mubr.bf16.mxu0 %v7069_v1  ;;  %319 = vmatprep.mubr.bf16.mxu1 %v7069_v1  ;;  %v99_v3 = vld [vmem:[#allocation5 + $0x20] sm:$0xff]  ;;  %v7190_v11 = vsel %vm219_vm0, 65535, %v7069_v1  ;;  %v100_v13 = vld [vmem:[#allocation5 + $0x28] sm:$0xff]  ;;  %v97_v26 = vld [vmem:[#allocation5 + $0x10] sm:$0xff]  ;;  %vm215_vm1 = vcmask 269312   ;;  %vm5554_vm2 = vcmask 7168  }
  0x4e   :  { %v103_v4 = vld [vmem:[#allocation5 + $0x40] sm:$0xff]  ;;  %v5564_v5 = vcombine.high %v95_v2, %v99_v3  ;;  %v5563_v6 = vcombine.low %v95_v2, %v99_v3  ;;  %v104_v14 = vld [vmem:[#allocation5 + $0x48] sm:$0xff]  ;;  %v5566_v15 = vcombine.high %v96_v12, %v100_v13  ;;  %v5565_v16 = vcombine.low %v96_v12, %v100_v13  ;;  %v101_v27 = vld [vmem:[#allocation5 + $0x30] sm:$0xff] }
  0x4f   :  { %v107_v7 = vld [vmem:[#allocation5 + $0x60] sm:$0xff]  ;;  %v108_v17 = vld [vmem:[#allocation5 + $0x68] sm:$0xff]  ;;  %v98_v29 = vld [vmem:[#allocation5 + $0x18] sm:$0xff]  ;;  %v5568_v32 = vcombine.high %v97_v26, %v101_v27  ;;  %v5567_v41 = vcombine.low %v97_v26, %v101_v27 }
  0x50   :  { %v111_v8 = vld [vmem:[#allocation5 + $0x80] sm:$0x11]  ;;  %v5572_v9 = vcombine.high %v103_v4, %v107_v7  ;;  %246 = vmatprep.subr.bf16.mxu0 %v5564_v5  ;;  %v112_v18 = vld [vmem:[#allocation5 + $0x88] sm:$0x11]  ;;  %v5571_v19 = vcombine.low %v103_v4, %v107_v7  ;;  %v5574_v21 = vcombine.high %v104_v14, %v108_v17  ;;  %287 = vmatprep.subr.bf16.mxu1 %v5566_v15  ;;  %v102_v31 = vld [vmem:[#allocation5 + $0x38] sm:$0xff] }
  0x51   :  { %v5580_v10 = vcombine.high %v111_v8, %v111_v8  ;;  %247 = vmatpush1.bf16.msra.mxu0 %v5563_v6  ;;  %v5579_v20 = vcombine.low %v111_v8, %v111_v8  ;;  %v5582_v23 = vcombine.high %v112_v18, %v112_v18  ;;  %288 = vmatpush1.bf16.msra.mxu1 %v5565_v16  ;;  %v105_v33 = vld [vmem:[#allocation5 + $0x50] sm:$0xff]  ;;  %v94_v35 = vld [vmem:[#allocation3] sm:$0xf]  ;;  %v6438_v60 = vld [vmem:[#allocation7 + $0x8] ss:$16 sps:$4 sm:$0xff]  }
  0x52   :  { %248 = vmatprep.subr.bf16.mxu0 %v5572_v9  ;;  %v5573_v24 = vcombine.low %v104_v14, %v108_v17  ;;  %v5581_v25 = vcombine.low %v112_v18, %v112_v18  ;;  %289 = vmatprep.subr.bf16.mxu1 %v5574_v21  ;;  %v109_v34 = vld [vmem:[#allocation5 + $0x70] sm:$0xff]  ;;  %v106_v38 = vld [vmem:[#allocation5 + $0x58] sm:$0xff]  ;;  %v5570_v39 = vcombine.high %v98_v29, %v102_v31 }
  0x53   :  { %v226_v22 = vand.u32 %v5580_v10, %v7190_v11  ;;  %v232_v28 = vand.u32 %v5582_v23, %v7190_v11  ;;  %v223_v30 = vand.u32 %v5579_v20, %v7190_v11  ;;  %v113_v37 = vld [vmem:[#allocation5 + $0x90] sm:$0x11]  ;;  %v110_v40 = vld [vmem:[#allocation5 + $0x78] sm:$0xff]  ;;  %v5576_v43 = vcombine.high %v105_v33, %v109_v34 }
  0x54   :  { %v229_v36 = vand.u32 %v5581_v25, %v7190_v11  ;;  %v114_v42 = vld [vmem:[#allocation5 + $0x98] sm:$0x11]  ;;  %v5584_v44 = vcombine.high %v113_v37, %v113_v37  ;;  %v5569_v45 = vcombine.low %v98_v29, %v102_v31  ;;  %v5578_v46 = vcombine.high %v106_v38, %v110_v40  ;;  %v6437_v55 = vld [vmem:[#allocation7 + $0x4] ss:$16 sps:$4 sm:$0xff]   ;;  %v6435_v58 = vld [vmem:[#allocation7] ss:$16 sps:$4 sm:$0xff]  }
  0x55   :  { %249 = vmatpush1.bf16.msra.mxu0 %v5571_v19  ;;  %290 = vmatpush1.bf16.msra.mxu1 %v5573_v24  ;;  %v5586_v47 = vcombine.high %v114_v42, %v114_v42  ;;  %v5575_v48 = vcombine.low %v105_v33, %v109_v34  ;;  %v5583_v49 = vcombine.low %v113_v37, %v113_v37  ;;  %v6440_v57 = vld [vmem:[#allocation7 + $0xc] ss:$16 sps:$4 sm:$0xff]   ;;  %v6443_v59 = vld [vmem:[#allocation7 + $0x24] ss:$16 sps:$4 sm:$0xff]   ;;  %v6441_v62 = vld [vmem:[#allocation7 + $0x20] ss:$16 sps:$4 sm:$0xff]  }
  0x56   :  { %250 = vmatprep.subr.bf16.mxu0 %v226_v22  ;;  %291 = vmatprep.subr.bf16.mxu1 %v232_v28  ;;  %v238_v50 = vand.u32 %v5584_v44, %v7190_v11  ;;  %v5577_v51 = vcombine.low %v106_v38, %v110_v40  ;;  %v5585_v52 = vcombine.low %v114_v42, %v114_v42  ;;  %v6446_v61 = vld [vmem:[#allocation7 + $0x2c] ss:$16 sps:$4 sm:$0xff]   ;;  %v6449_v63 = vld [vmem:[#allocation7 + $0x44] ss:$16 sps:$4 sm:$0xff]   ;;  %v6444_v0 = vld [vmem:[#allocation7 + $0x28] ss:$16 sps:$4 sm:$0xff]  }
  0x57   :  { %v244_v53 = vand.u32 %v5586_v47, %v7190_v11  ;;  %v235_v54 = vand.u32 %v5583_v49, %v7190_v11  ;;  %v6452_v2 = vld [vmem:[#allocation7 + $0x4c] ss:$16 sps:$4 sm:$0xff]   ;;  %v6447_v3 = vld [vmem:[#allocation7 + $0x40] ss:$16 sps:$4 sm:$0xff]   ;;  %v6455_v4 = vld [vmem:[#allocation7 + $0x64] ss:$16 sps:$4 sm:$0xff]  }
  0x58   :  { %v241_v56 = vand.u32 %v5585_v52, %v7190_v11  ;;  %v6450_v5 = vld [vmem:[#allocation7 + $0x48] ss:$16 sps:$4 sm:$0xff]   ;;  %v6458_v6 = vld [vmem:[#allocation7 + $0x6c] ss:$16 sps:$4 sm:$0xff]   ;;  %v6453_v7 = vld [vmem:[#allocation7 + $0x60] ss:$16 sps:$4 sm:$0xff]  }
  0x59   :  { %251 = vmatpush1.bf16.msra.mxu0 %v223_v30  ;;  %292 = vmatpush1.bf16.msra.mxu1 %v229_v36  ;;  %v6461_v8 = vld [vmem:[#allocation7 + $0x84] ss:$16 sps:$4 sm:$0xff]   ;;  %v6456_v9 = vld [vmem:[#allocation7 + $0x68] ss:$16 sps:$4 sm:$0xff]   ;;  %v6464_v10 = vld [vmem:[#allocation7 + $0x8c] ss:$16 sps:$4 sm:$0xff]  }
  0x5a   :  { %328 = vmatprep.subr.bf16.mxu0 %v5568_v32  ;;  %369 = vmatprep.subr.bf16.mxu1 %v5570_v39  ;;  %v6459_v11 = vld [vmem:[#allocation7 + $0x80] ss:$16 sps:$4 sm:$0xff]   ;;  %v6467_v12 = vld [vmem:[#allocation7 + $0xa4] ss:$16 sps:$4 sm:$0xff]   ;;  %v6462_v13 = vld [vmem:[#allocation7 + $0x88] ss:$16 sps:$4 sm:$0xff]  }
  0x5b   :  { %v6470_v14 = vld [vmem:[#allocation7 + $0xac] ss:$16 sps:$4 sm:$0xff]   ;;  %v6465_v15 = vld [vmem:[#allocation7 + $0xa0] ss:$16 sps:$4 sm:$0xff]   ;;  %v6468_v16 = vld [vmem:[#allocation7 + $0xa8] ss:$16 sps:$4 sm:$0xff]  }
  0x5c   :  { %5587 = vmatmul.mubr.msk.bf16.vlgmr.msra.gmra.mrb[0].mxu0 %vm215_vm1, %v94_v35  ;;  %5588 = vmatmul.mubr.msk.bf16.vlgmr.msra.gmra.mrb[0].mxu1 %vm215_vm1, %v94_v35  ;;  %v6473_v17 = vld [vmem:[#allocation7 + $0xc4] ss:$16 sps:$4 sm:$0xff]   ;;  %v6471_v18 = vld [vmem:[#allocation7 + $0xc0] ss:$16 sps:$4 sm:$0xff]   ;;  %v6476_v19 = vld [vmem:[#allocation7 + $0xcc] ss:$16 sps:$4 sm:$0xff]  }
  0x5d   :  { %329 = vmatpush1.bf16.msra.mxu0 %v5567_v41  ;;  %360 = vmatprep.mubr.bf16.mxu0 %v7069_v1  ;;  %v6479_v20 = vld [vmem:[#allocation7 + $0xe4] ss:$16 sps:$4 sm:$0xff]   ;;  %v6474_v21 = vld [vmem:[#allocation7 + $0xc8] ss:$16 sps:$4 sm:$0xff]   ;;  %v6482_v22 = vld [vmem:[#allocation7 + $0xec] ss:$16 sps:$4 sm:$0xff]  }
  0x5e   :  { %330 = vmatprep.subr.bf16.mxu0 %v5576_v43  ;;  %370 = vmatpush1.bf16.msra.mxu1 %v5569_v45  ;;  %v6477_v23 = vld [vmem:[#allocation7 + $0xe0] ss:$16 sps:$4 sm:$0xff]   ;;  %v6485_v24 = vld [vmem:[#allocation7 + $0x104] ss:$16 sps:$4 sm:$0xff]   ;;  %v6480_v25 = vld [vmem:[#allocation7 + $0xe8] ss:$16 sps:$4 sm:$0xff]  }
  0x5f   :  { %401 = vmatprep.mubr.bf16.mxu1 %v7069_v1  ;;  %371 = vmatprep.subr.bf16.mxu1 %v5578_v46  ;;  %v6488_v26 = vld [vmem:[#allocation7 + $0x10c] ss:$16 sps:$4 sm:$0xff]   ;;  %v6483_v27 = vld [vmem:[#allocation7 + $0x100] ss:$16 sps:$4 sm:$0xff]   ;;  %v6491_v28 = vld [vmem:[#allocation7 + $0x124] ss:$16 sps:$4 sm:$0xff]  }
  0x60   :  { %v6486_v29 = vld [vmem:[#allocation7 + $0x108] ss:$16 sps:$4 sm:$0xff]   ;;  %v6494_v30 = vld [vmem:[#allocation7 + $0x12c] ss:$16 sps:$4 sm:$0xff]   ;;  %v6489_v31 = vld [vmem:[#allocation7 + $0x120] ss:$16 sps:$4 sm:$0xff]  }
  0x61   :  { %331 = vmatpush1.bf16.msra.mxu0 %v5575_v48  ;;  %v6497_v32 = vld [vmem:[#allocation7 + $0x144] ss:$16 sps:$4 sm:$0xff]   ;;  %v6492_v33 = vld [vmem:[#allocation7 + $0x128] ss:$16 sps:$4 sm:$0xff]   ;;  %v6500_v34 = vld [vmem:[#allocation7 + $0x14c] ss:$16 sps:$4 sm:$0xff]  }
  0x62   :  { %332 = vmatprep.subr.bf16.mxu0 %v238_v50  ;;  %372 = vmatpush1.bf16.msra.mxu1 %v5577_v51  ;;  %v6503_v36 = vld [vmem:[#allocation7 + $0x164] ss:$16 sps:$4 sm:$0xff]   ;;  %v6498_v37 = vld [vmem:[#allocation7 + $0x148] ss:$16 sps:$4 sm:$0xff]   ;;  %v6506_v38 = vld [vmem:[#allocation7 + $0x16c] ss:$16 sps:$4 sm:$0xff]  }
  0x63   :  { %373 = vmatprep.subr.bf16.mxu1 %v244_v53  ;;  %v6501_v39 = vld [vmem:[#allocation7 + $0x160] ss:$16 sps:$4 sm:$0xff]   ;;  %v6509_v40 = vld [vmem:[#allocation7 + $0x184] ss:$16 sps:$4 sm:$0xff]   ;;  %v6504_v41 = vld [vmem:[#allocation7 + $0x168] ss:$16 sps:$4 sm:$0xff]  }
  0x64   :  { %v6512_v42 = vld [vmem:[#allocation7 + $0x18c] ss:$16 sps:$4 sm:$0xff]   ;;  %v6507_v43 = vld [vmem:[#allocation7 + $0x180] ss:$16 sps:$4 sm:$0xff]   ;;  %v6515_v44 = vld [vmem:[#allocation7 + $0x1a4] ss:$16 sps:$4 sm:$0xff]  }
  0x65   :  { %333 = vmatpush1.bf16.msra.mxu0 %v235_v54  ;;  %v6510_v45 = vld [vmem:[#allocation7 + $0x188] ss:$16 sps:$4 sm:$0xff]   ;;  %v6518_v46 = vld [vmem:[#allocation7 + $0x1ac] ss:$16 sps:$4 sm:$0xff]   ;;  %v6513_v47 = vld [vmem:[#allocation7 + $0x1a0] ss:$16 sps:$4 sm:$0xff]  }
  0x66   :  { %1984 = vmatprep.subr.bf16.mxu0 %v6437_v55  ;;  %374 = vmatpush1.bf16.msra.mxu1 %v241_v56  ;;  %v6521_v48 = vld [vmem:[#allocation7 + $0x1c4] ss:$16 sps:$4 sm:$0xff]   ;;  %v6516_v49 = vld [vmem:[#allocation7 + $0x1a8] ss:$16 sps:$4 sm:$0xff]   ;;  %v6524_v50 = vld [vmem:[#allocation7 + $0x1cc] ss:$16 sps:$4 sm:$0xff]  }
  0x67   :  { %2148 = vmatprep.subr.bf16.mxu1 %v6440_v57  ;;  %v6519_v51 = vld [vmem:[#allocation7 + $0x1c0] ss:$16 sps:$4 sm:$0xff]   ;;  %v6522_v52 = vld [vmem:[#allocation7 + $0x1c8] ss:$16 sps:$4 sm:$0xff]   ;;  %v6527_v53 = vld [vmem:[#allocation7 + $0x1e4] ss:$16 sps:$4 sm:$0xff]  }
  0x68   :  { %5589 = vmatmul.mubr.msk.bf16.vlgmr.msra.gmra.mrb[4].mxu0 %vm215_vm1, %v94_v35  ;;  %v6530_v54 = vld [vmem:[#allocation7 + $0x1ec] ss:$16 sps:$4 sm:$0xff]   ;;  %v6525_v55 = vld [vmem:[#allocation7 + $0x1e0] ss:$16 sps:$4 sm:$0xff]   ;;  %v6528_v56 = vld [vmem:[#allocation7 + $0x1e8] ss:$16 sps:$4 sm:$0xff]  }
  0x69   :  { %1985 = vmatpush1.bf16.msra.mxu0 %v6435_v58  ;;  %5590 = vmatmul.mubr.msk.bf16.vlgmr.msra.gmra.mrb[4].mxu1 %vm215_vm1, %v94_v35  ;;  %v6495_v35 = vld [vmem:[#allocation7 + $0x140] ss:$16 sps:$4 sm:$0xff]   ;;  %v6533_v57 = vld [vmem:[#allocation7 + $0x204] ss:$16 sps:$4 sm:$0xff]   ;;  %v6536_v58 = vld [vmem:[#allocation7 + $0x20c] ss:$16 sps:$4 sm:$0xff]  }
  0x6a   :  { %1986 = vmatprep.subr.bf16.mxu0 %v6443_v59  ;;  %2149 = vmatpush1.bf16.msra.mxu1 %v6438_v60 }
  0x6b   :  { %2150 = vmatprep.subr.bf16.mxu1 %v6446_v61 }
  0x6d   :  { %1987 = vmatpush1.bf16.msra.mxu0 %v6441_v62 }
  0x6e   :  { %1988 = vmatprep.subr.bf16.mxu0 %v6449_v63  ;;  %2151 = vmatpush1.bf16.msra.mxu1 %v6444_v0  ;;  %v6531_v0 = vld [vmem:[#allocation7 + $0x200] ss:$16 sps:$4 sm:$0xff]  }
  0x6f   :  { %2152 = vmatprep.subr.bf16.mxu1 %v6452_v2  ;;  %v6534_v2 = vld [vmem:[#allocation7 + $0x208] ss:$16 sps:$4 sm:$0xff]  }
  0x71   :  { %1989 = vmatpush1.bf16.msra.mxu0 %v6447_v3 }
  0x72   :  { %1990 = vmatprep.subr.bf16.mxu0 %v6455_v4  ;;  %2153 = vmatpush1.bf16.msra.mxu1 %v6450_v5 }
  0x73   :  { %2154 = vmatprep.subr.bf16.mxu1 %v6458_v6 }
  0x75   :  { %1991 = vmatpush1.bf16.msra.mxu0 %v6453_v7 }
  0x76   :  { %1992 = vmatprep.subr.bf16.mxu0 %v6461_v8  ;;  %2155 = vmatpush1.bf16.msra.mxu1 %v6456_v9 }
  0x77   :  { %2156 = vmatprep.subr.bf16.mxu1 %v6464_v10  ;;  %v6539_v10 = vld [vmem:[#allocation7 + $0x224] ss:$16 sps:$4 sm:$0xff]  }
  0x79   :  { %1993 = vmatpush1.bf16.msra.mxu0 %v6459_v11  ;;  %v6542_v11 = vld [vmem:[#allocation7 + $0x22c] ss:$16 sps:$4 sm:$0xff]  }
  0x7a   :  { %1994 = vmatprep.subr.bf16.mxu0 %v6467_v12  ;;  %2157 = vmatpush1.bf16.msra.mxu1 %v6462_v13 }
  0x7b   :  { %2158 = vmatprep.subr.bf16.mxu1 %v6470_v14  ;;  %v6537_v14 = vld [vmem:[#allocation7 + $0x220] ss:$16 sps:$4 sm:$0xff]  }
  0x7d   :  { %1995 = vmatpush1.bf16.msra.mxu0 %v6465_v15  ;;  %v6540_v15 = vld [vmem:[#allocation7 + $0x228] ss:$16 sps:$4 sm:$0xff]  }
  0x7e   :  { %1996 = vmatprep.subr.bf16.mxu0 %v6473_v17  ;;  %2159 = vmatpush1.bf16.msra.mxu1 %v6468_v16  ;;  %v6545_v16 = vld [vmem:[#allocation7 + $0x244] ss:$16 sps:$4 sm:$0xff]   ;;  %v6548_v17 = vld [vmem:[#allocation7 + $0x24c] ss:$16 sps:$4 sm:$0xff]  }
  0x7f   :  { %2160 = vmatprep.subr.bf16.mxu1 %v6476_v19  ;;  %v6546_v19 = vld [vmem:[#allocation7 + $0x248] ss:$16 sps:$4 sm:$0xff]  }
  0x81   :  { %1997 = vmatpush1.bf16.msra.mxu0 %v6471_v18  ;;  %v6543_v18 = vld [vmem:[#allocation7 + $0x240] ss:$16 sps:$4 sm:$0xff]  }
  0x82   :  { %1998 = vmatprep.subr.bf16.mxu0 %v6479_v20  ;;  %2161 = vmatpush1.bf16.msra.mxu1 %v6474_v21  ;;  %v6551_v21 = vld [vmem:[#allocation7 + $0x264] ss:$16 sps:$4 sm:$0xff]  }
  0x83   :  { %2162 = vmatprep.subr.bf16.mxu1 %v6482_v22  ;;  %v6554_v22 = vld [vmem:[#allocation7 + $0x26c] ss:$16 sps:$4 sm:$0xff]  }
  0x85   :  { %1999 = vmatpush1.bf16.msra.mxu0 %v6477_v23 }
  0x86   :  { %2000 = vmatprep.subr.bf16.mxu0 %v6485_v24  ;;  %2163 = vmatpush1.bf16.msra.mxu1 %v6480_v25 }
  0x87   :  { %2164 = vmatprep.subr.bf16.mxu1 %v6488_v26  ;;  %v6549_v26 = vld [vmem:[#allocation7 + $0x260] ss:$16 sps:$4 sm:$0xff]  }
  0x89   :  { %2001 = vmatpush1.bf16.msra.mxu0 %v6483_v27  ;;  %v6552_v27 = vld [vmem:[#allocation7 + $0x268] ss:$16 sps:$4 sm:$0xff]  }
  0x8a   :  { %2002 = vmatprep.subr.bf16.mxu0 %v6491_v28  ;;  %2165 = vmatpush1.bf16.msra.mxu1 %v6486_v29  ;;  %v6557_v28 = vld [vmem:[#allocation7 + $0x284] ss:$16 sps:$4 sm:$0xff]   ;;  %v6560_v29 = vld [vmem:[#allocation7 + $0x28c] ss:$16 sps:$4 sm:$0xff]  }
  0x8b   :  { %2166 = vmatprep.subr.bf16.mxu1 %v6494_v30  ;;  %v6555_v30 = vld [vmem:[#allocation7 + $0x280] ss:$16 sps:$4 sm:$0xff]  }
  0x8d   :  { %2003 = vmatpush1.bf16.msra.mxu0 %v6489_v31  ;;  %v6558_v31 = vld [vmem:[#allocation7 + $0x288] ss:$16 sps:$4 sm:$0xff]  }
  0x8e   :  { %2004 = vmatprep.subr.bf16.mxu0 %v6497_v32  ;;  %2167 = vmatpush1.bf16.msra.mxu1 %v6492_v33  ;;  %v6563_v32 = vld [vmem:[#allocation7 + $0x2a4] ss:$16 sps:$4 sm:$0xff]   ;;  %v6566_v33 = vld [vmem:[#allocation7 + $0x2ac] ss:$16 sps:$4 sm:$0xff]  }
  0x8f   :  { %2168 = vmatprep.subr.bf16.mxu1 %v6500_v34  ;;  %v6561_v34 = vld [vmem:[#allocation7 + $0x2a0] ss:$16 sps:$4 sm:$0xff]  }
  0x91   :  { %2005 = vmatpush1.bf16.msra.mxu0 %v6495_v35  ;;  %v6564_v35 = vld [vmem:[#allocation7 + $0x2a8] ss:$16 sps:$4 sm:$0xff]  }
  0x92   :  { %2006 = vmatprep.subr.bf16.mxu0 %v6503_v36  ;;  %2169 = vmatpush1.bf16.msra.mxu1 %v6498_v37  ;;  %v6569_v37 = vld [vmem:[#allocation7 + $0x2c4] ss:$16 sps:$4 sm:$0xff]  }
  0x93   :  { %2170 = vmatprep.subr.bf16.mxu1 %v6506_v38  ;;  %v6572_v38 = vld [vmem:[#allocation7 + $0x2cc] ss:$16 sps:$4 sm:$0xff]  }
  0x95   :  { %2007 = vmatpush1.bf16.msra.mxu0 %v6501_v39 }
  0x96   :  { %2008 = vmatprep.subr.bf16.mxu0 %v6509_v40  ;;  %2171 = vmatpush1.bf16.msra.mxu1 %v6504_v41 }
  0x97   :  { %2172 = vmatprep.subr.bf16.mxu1 %v6512_v42  ;;  %v6567_v42 = vld [vmem:[#allocation7 + $0x2c0] ss:$16 sps:$4 sm:$0xff]  }
  0x99   :  { %2009 = vmatpush1.bf16.msra.mxu0 %v6507_v43  ;;  %v6570_v43 = vld [vmem:[#allocation7 + $0x2c8] ss:$16 sps:$4 sm:$0xff]  }
  0x9a   :  { %2010 = vmatprep.subr.bf16.mxu0 %v6515_v44  ;;  %2173 = vmatpush1.bf16.msra.mxu1 %v6510_v45  ;;  %v6575_v44 = vld [vmem:[#allocation7 + $0x2e4] ss:$16 sps:$4 sm:$0xff]   ;;  %v6578_v45 = vld [vmem:[#allocation7 + $0x2ec] ss:$16 sps:$4 sm:$0xff]  }
  0x9b   :  { %2174 = vmatprep.subr.bf16.mxu1 %v6518_v46  ;;  %v6573_v46 = vld [vmem:[#allocation7 + $0x2e0] ss:$16 sps:$4 sm:$0xff]  }
  0x9d   :  { %2011 = vmatpush1.bf16.msra.mxu0 %v6513_v47  ;;  %v6576_v47 = vld [vmem:[#allocation7 + $0x2e8] ss:$16 sps:$4 sm:$0xff]  }
  0x9e   :  { %2012 = vmatprep.subr.bf16.mxu0 %v6521_v48  ;;  %2175 = vmatpush1.bf16.msra.mxu1 %v6516_v49  ;;  %v6581_v48 = vld [vmem:[#allocation7 + $0x304] ss:$16 sps:$4 sm:$0xff]   ;;  %v6584_v49 = vld [vmem:[#allocation7 + $0x30c] ss:$16 sps:$4 sm:$0xff]  }
  0x9f   :  { %2176 = vmatprep.subr.bf16.mxu1 %v6524_v50  ;;  %v6579_v50 = vld [vmem:[#allocation7 + $0x300] ss:$16 sps:$4 sm:$0xff]  }
  0xa1   :  { %2013 = vmatpush1.bf16.msra.mxu0 %v6519_v51  ;;  %v6582_v51 = vld [vmem:[#allocation7 + $0x308] ss:$16 sps:$4 sm:$0xff]  }
  0xa2   :  { %2177 = vmatpush1.bf16.msra.mxu1 %v6522_v52  ;;  %2014 = vmatprep.subr.bf16.mxu0 %v6527_v53  ;;  %v6587_v52 = vld [vmem:[#allocation7 + $0x324] ss:$16 sps:$4 sm:$0xff]   ;;  %v6590_v53 = vld [vmem:[#allocation7 + $0x32c] ss:$16 sps:$4 sm:$0xff]  }
  0xa3   :  { %2178 = vmatprep.subr.bf16.mxu1 %v6530_v54  ;;  %v6585_v54 = vld [vmem:[#allocation7 + $0x320] ss:$16 sps:$4 sm:$0xff]  }
  0xa5   :  { %2015 = vmatpush1.bf16.msra.mxu0 %v6525_v55  ;;  %v6588_v55 = vld [vmem:[#allocation7 + $0x328] ss:$16 sps:$4 sm:$0xff]  }
  0xa6   :  { %2179 = vmatpush1.bf16.msra.mxu1 %v6528_v56  ;;  %2025 = vmatprep.subr.bf16.mxu0 %v6533_v57  ;;  %v6593_v56 = vld [vmem:[#allocation7 + $0x344] ss:$16 sps:$4 sm:$0xff]   ;;  %v6596_v57 = vld [vmem:[#allocation7 + $0x34c] ss:$16 sps:$4 sm:$0xff]  }
  0xa7   :  { %2189 = vmatprep.subr.bf16.mxu1 %v6536_v58  ;;  %v6591_v58 = vld [vmem:[#allocation7 + $0x340] ss:$16 sps:$4 sm:$0xff]  }
 0x12f   :  { %v280_v59 = vpop.f32.mrb[0].mxu0  ;;  %v7206_v3 = vpop.f32.mrb[0].mxu1 }
 0x130   :  { %v410_v60 = vpack.c.bf16 %v280_v59, %v280_v59  ;;  %v282_v61 = vpop.f32.mrb[1].mxu0  ;;  %v323_v5 = vpop.f32.mrb[1].mxu1  ;;  %v6594_v59 = vld [vmem:[#allocation7 + $0x348] ss:$16 sps:$4 sm:$0xff]  }
 0x131   :  { %v411_v62 = vpack.c.bf16 %v282_v61, %v282_v61  ;;  %v284_v63 = vpop.f32.mrb[2].mxu0  ;;  %v413_v7 = vpack.c.bf16 %v323_v5, %v323_v5  ;;  %v325_v8 = vpop.f32.mrb[2].mxu1  ;;  %v6602_v61 = vld [vmem:[#allocation7 + $0x36c] ss:$16 sps:$4 sm:$0xff]   ;;  %v6606_v5 = vld [vmem:[#allocation7 + $0x388] ss:$16 sps:$4 sm:$0xff]  }
 0x132   :  { %v285_v4 = vpop.f32.mrb[3].mxu0  ;;  %v418_v9 = vmax.bf16 %v7069_v1, %v410_v60  ;;  %v326_v12 = vpop.f32.mrb[3].mxu1  ;;  %v6599_v60 = vld [vmem:[#allocation7 + $0x364] ss:$16 sps:$4 sm:$0xff]   ;;  %v6600_v63 = vld [vmem:[#allocation7 + $0x368] ss:$16 sps:$4 sm:$0xff]  }
 0x133   :  { %v419_v6 = vmax.bf16 %v7069_v1, %v411_v62  ;;  %v421_v13 = vmax.bf16 %v7069_v1, %v413_v7  ;;  %v6597_v62 = vld [vmem:[#allocation7 + $0x360] ss:$16 sps:$4 sm:$0xff]   ;;  %v6614_v7 = vld [vmem:[#allocation7 + $0x3ac] ss:$16 sps:$4 sm:$0xff]  }
 0x134   :  { %v6603_v4 = vld [vmem:[#allocation7 + $0x380] ss:$16 sps:$4 sm:$0xff]  }
 0x135   :  { %2016 = vmatprep.mubr.bf16.mxu0 %v419_v6  ;;  %2180 = vmatprep.mubr.bf16.mxu1 %v419_v6  ;;  %v6611_v6 = vld [vmem:[#allocation7 + $0x3a4] ss:$16 sps:$4 sm:$0xff]   ;;  %v6609_v8 = vld [vmem:[#allocation7 + $0x3a0] ss:$16 sps:$4 sm:$0xff]  }
 0x136   :  { %2017 = vmatmul.mubr.bf16.vlgmr.msra.gmra.mrb[8].mxu0 %v418_v9  ;;  %2181 = vmatmul.mubr.bf16.vlgmr.msra.gmra.mrb[8].mxu1 %v418_v9  ;;  %v6612_v9 = vld [vmem:[#allocation7 + $0x3a8] ss:$16 sps:$4 sm:$0xff]   ;;  %v6615_v12 = vld [vmem:[#allocation7 + $0x3c0] ss:$16 sps:$4 sm:$0xff]  }
 0x137   :  { %2026 = vmatpush1.bf16.msra.mxu0 %v6531_v0  ;;  %2190 = vmatpush1.bf16.msra.mxu1 %v6534_v2  ;;  %v6605_v0 = vld [vmem:[#allocation7 + $0x384] ss:$16 sps:$4 sm:$0xff]   ;;  %v6608_v2 = vld [vmem:[#allocation7 + $0x38c] ss:$16 sps:$4 sm:$0xff]  }
 0x138   :  { %2027 = vmatprep.subr.bf16.mxu0 %v6539_v10  ;;  %2191 = vmatprep.subr.bf16.mxu1 %v6542_v11  ;;  %v6617_v10 = vld [vmem:[#allocation7 + $0x3c4] ss:$16 sps:$4 sm:$0xff]   ;;  %v6620_v11 = vld [vmem:[#allocation7 + $0x3cc] ss:$16 sps:$4 sm:$0xff]  }
 0x139   :  { %2057 = vmatprep.mubr.bf16.mxu0 %v421_v13  ;;  %2221 = vmatprep.mubr.bf16.mxu1 %v421_v13  ;;  %v6618_v13 = vld [vmem:[#allocation7 + $0x3c8] ss:$16 sps:$4 sm:$0xff]  }
 0x13b   :  { %2028 = vmatpush1.bf16.msra.mxu0 %v6537_v14  ;;  %2192 = vmatpush1.bf16.msra.mxu1 %v6540_v15  ;;  %v7211_v20 = vpop.f32.mrb[4].mxu0  ;;  %v6623_v14 = vld [vmem:[#allocation7 + $0x3e4] ss:$16 sps:$4 sm:$0xff]   ;;  %v6626_v15 = vld [vmem:[#allocation7 + $0x3ec] ss:$16 sps:$4 sm:$0xff]  }
 0x13c   :  { %2029 = vmatprep.subr.bf16.mxu0 %v6545_v16  ;;  %2193 = vmatprep.subr.bf16.mxu1 %v6548_v17  ;;  %v7213_v23 = vpop.f32.mrb[5].mxu0  ;;  %v7215_v36 = vpop.f32.mrb[4].mxu1  ;;  %v412_v16 = vpack.c.bf16 %v7206_v3, %v7206_v3  ;;  %v6621_v17 = vld [vmem:[#allocation7 + $0x3e0] ss:$16 sps:$4 sm:$0xff]   ;;  %v6635_v3 = vld [vmem:[#allocation7 + $0x424] ss:$16 sps:$4 sm:$0xff]  }
 0x13d   :  { %v366_v24 = vpop.f32.mrb[6].mxu0  ;;  %v7217_v39 = vpop.f32.mrb[5].mxu1 }
 0x13e   :  { %v367_v25 = vpop.f32.mrb[7].mxu0  ;;  %v407_v40 = vpop.f32.mrb[6].mxu1  ;;  %v420_v24 = vmax.bf16 %v7069_v1, %v412_v16  ;;  %v6705_v16 = vld [vmem:[#allocation7 + $0x5a0] ss:$16 sps:$4 sm:$0xff]  }
 0x13f   :  { %2030 = vmatpush1.bf16.msra.mxu0 %v6543_v18  ;;  %2194 = vmatpush1.bf16.msra.mxu1 %v6546_v19  ;;  %v408_v41 = vpop.f32.mrb[7].mxu1  ;;  %v6624_v18 = vld [vmem:[#allocation7 + $0x3e8] ss:$16 sps:$4 sm:$0xff]   ;;  %v6629_v19 = vld [vmem:[#allocation7 + $0x404] ss:$16 sps:$4 sm:$0xff]  }
 0x140   :  { %2031 = vmatprep.subr.bf16.mxu0 %v6551_v21  ;;  %2195 = vmatprep.subr.bf16.mxu1 %v6554_v22  ;;  %v6632_v21 = vld [vmem:[#allocation7 + $0x40c] ss:$16 sps:$4 sm:$0xff]   ;;  %v415_v22 = vpack.c.bf16 %v7213_v23, %v7213_v23  ;;  %v6627_v25 = vld [vmem:[#allocation7 + $0x400] ss:$16 sps:$4 sm:$0xff]   ;;  %v6641_v23 = vld [vmem:[#allocation7 + $0x444] ss:$16 sps:$4 sm:$0xff]  }
 0x141   :  { %v6653_v40 = vld [vmem:[#allocation7 + $0x484] ss:$16 sps:$4 sm:$0xff]   ;;  %v6656_v41 = vld [vmem:[#allocation7 + $0x48c] ss:$16 sps:$4 sm:$0xff]  }
 0x143   :  { %2032 = vmatpush1.bf16.msra.mxu0 %v6549_v26  ;;  %2196 = vmatpush1.bf16.msra.mxu1 %v6552_v27  ;;  %v6630_v26 = vld [vmem:[#allocation7 + $0x408] ss:$16 sps:$4 sm:$0xff]   ;;  %v6638_v27 = vld [vmem:[#allocation7 + $0x42c] ss:$16 sps:$4 sm:$0xff]  }
 0x144   :  { %2033 = vmatprep.subr.bf16.mxu0 %v6557_v28  ;;  %2197 = vmatprep.subr.bf16.mxu1 %v6560_v29  ;;  %v423_v28 = vmax.bf16 %v7069_v1, %v415_v22  ;;  %v6633_v29 = vld [vmem:[#allocation7 + $0x420] ss:$16 sps:$4 sm:$0xff]   ;;  %v6714_v22 = vld [vmem:[#allocation7 + $0x5c8] ss:$16 sps:$4 sm:$0xff]  }
 0x147   :  { %2034 = vmatpush1.bf16.msra.mxu0 %v6555_v30  ;;  %2198 = vmatpush1.bf16.msra.mxu1 %v6558_v31  ;;  %v6636_v30 = vld [vmem:[#allocation7 + $0x428] ss:$16 sps:$4 sm:$0xff]   ;;  %v6644_v31 = vld [vmem:[#allocation7 + $0x44c] ss:$16 sps:$4 sm:$0xff]  }
 0x148   :  { %2035 = vmatprep.subr.bf16.mxu0 %v6563_v32  ;;  %2199 = vmatprep.subr.bf16.mxu1 %v6566_v33  ;;  %v6639_v32 = vld [vmem:[#allocation7 + $0x440] ss:$16 sps:$4 sm:$0xff]   ;;  %v6642_v33 = vld [vmem:[#allocation7 + $0x448] ss:$16 sps:$4 sm:$0xff]  }
 0x14b   :  { %2036 = vmatpush1.bf16.msra.mxu0 %v6561_v34  ;;  %2200 = vmatpush1.bf16.msra.mxu1 %v6564_v35  ;;  %v6647_v34 = vld [vmem:[#allocation7 + $0x464] ss:$16 sps:$4 sm:$0xff]   ;;  %v6650_v35 = vld [vmem:[#allocation7 + $0x46c] ss:$16 sps:$4 sm:$0xff]  }
 0x14c   :  { %2037 = vmatprep.subr.bf16.mxu0 %v6569_v37  ;;  %2201 = vmatprep.subr.bf16.mxu1 %v6572_v38  ;;  %v6645_v37 = vld [vmem:[#allocation7 + $0x460] ss:$16 sps:$4 sm:$0xff]   ;;  %v6648_v38 = vld [vmem:[#allocation7 + $0x468] ss:$16 sps:$4 sm:$0xff]  }
 0x14f   :  { %2038 = vmatpush1.bf16.msra.mxu0 %v6567_v42  ;;  %2202 = vmatpush1.bf16.msra.mxu1 %v6570_v43  ;;  %v6651_v42 = vld [vmem:[#allocation7 + $0x480] ss:$16 sps:$4 sm:$0xff]   ;;  %v6654_v43 = vld [vmem:[#allocation7 + $0x488] ss:$16 sps:$4 sm:$0xff]  }
 0x150   :  { %2039 = vmatprep.subr.bf16.mxu0 %v6575_v44  ;;  %2203 = vmatprep.subr.bf16.mxu1 %v6578_v45  ;;  %v6659_v44 = vld [vmem:[#allocation7 + $0x4a4] ss:$16 sps:$4 sm:$0xff]   ;;  %v6662_v45 = vld [vmem:[#allocation7 + $0x4ac] ss:$16 sps:$4 sm:$0xff]  }
 0x153   :  { %2040 = vmatpush1.bf16.msra.mxu0 %v6573_v46  ;;  %2204 = vmatpush1.bf16.msra.mxu1 %v6576_v47  ;;  %v6657_v46 = vld [vmem:[#allocation7 + $0x4a0] ss:$16 sps:$4 sm:$0xff]   ;;  %v6660_v47 = vld [vmem:[#allocation7 + $0x4a8] ss:$16 sps:$4 sm:$0xff]  }
 0x154   :  { %2041 = vmatprep.subr.bf16.mxu0 %v6581_v48  ;;  %2205 = vmatprep.subr.bf16.mxu1 %v6584_v49  ;;  %v6665_v48 = vld [vmem:[#allocation7 + $0x4c4] ss:$16 sps:$4 sm:$0xff]   ;;  %v6668_v49 = vld [vmem:[#allocation7 + $0x4cc] ss:$16 sps:$4 sm:$0xff]  }
 0x157   :  { %2042 = vmatpush1.bf16.msra.mxu0 %v6579_v50  ;;  %2206 = vmatpush1.bf16.msra.mxu1 %v6582_v51  ;;  %v6663_v50 = vld [vmem:[#allocation7 + $0x4c0] ss:$16 sps:$4 sm:$0xff]   ;;  %v6666_v51 = vld [vmem:[#allocation7 + $0x4c8] ss:$16 sps:$4 sm:$0xff]  }
 0x158   :  { %2043 = vmatprep.subr.bf16.mxu0 %v6587_v52  ;;  %2207 = vmatprep.subr.bf16.mxu1 %v6590_v53  ;;  %v6671_v52 = vld [vmem:[#allocation7 + $0x4e4] ss:$16 sps:$4 sm:$0xff]   ;;  %v6674_v53 = vld [vmem:[#allocation7 + $0x4ec] ss:$16 sps:$4 sm:$0xff]  }
 0x15b   :  { %2044 = vmatpush1.bf16.msra.mxu0 %v6585_v54  ;;  %2208 = vmatpush1.bf16.msra.mxu1 %v6588_v55  ;;  %v6669_v54 = vld [vmem:[#allocation7 + $0x4e0] ss:$16 sps:$4 sm:$0xff]   ;;  %v6672_v55 = vld [vmem:[#allocation7 + $0x4e8] ss:$16 sps:$4 sm:$0xff]  }
 0x15c   :  { %2045 = vmatprep.subr.bf16.mxu0 %v6593_v56  ;;  %2209 = vmatprep.subr.bf16.mxu1 %v6596_v57  ;;  %v6677_v56 = vld [vmem:[#allocation7 + $0x504] ss:$16 sps:$4 sm:$0xff]   ;;  %v6680_v57 = vld [vmem:[#allocation7 + $0x50c] ss:$16 sps:$4 sm:$0xff]  }
 0x15f   :  { %2046 = vmatpush1.bf16.msra.mxu0 %v6591_v58  ;;  %2210 = vmatpush1.bf16.msra.mxu1 %v6594_v59  ;;  %v6675_v58 = vld [vmem:[#allocation7 + $0x500] ss:$16 sps:$4 sm:$0xff]   ;;  %v6678_v59 = vld [vmem:[#allocation7 + $0x508] ss:$16 sps:$4 sm:$0xff]  }
 0x160   :  { %2047 = vmatprep.subr.bf16.mxu0 %v6599_v60  ;;  %2211 = vmatprep.subr.bf16.mxu1 %v6602_v61  ;;  %v6683_v60 = vld [vmem:[#allocation7 + $0x524] ss:$16 sps:$4 sm:$0xff]   ;;  %v6686_v61 = vld [vmem:[#allocation7 + $0x52c] ss:$16 sps:$4 sm:$0xff]  }
 0x163   :  { %2048 = vmatpush1.bf16.msra.mxu0 %v6597_v62  ;;  %2212 = vmatpush1.bf16.msra.mxu1 %v6600_v63  ;;  %v6681_v62 = vld [vmem:[#allocation7 + $0x520] ss:$16 sps:$4 sm:$0xff]   ;;  %v6684_v63 = vld [vmem:[#allocation7 + $0x528] ss:$16 sps:$4 sm:$0xff]  }
 0x164   :  { %2049 = vmatprep.subr.bf16.mxu0 %v6605_v0  ;;  %2213 = vmatprep.subr.bf16.mxu1 %v6608_v2  ;;  %v6689_v0 = vld [vmem:[#allocation7 + $0x544] ss:$16 sps:$4 sm:$0xff]   ;;  %v6692_v2 = vld [vmem:[#allocation7 + $0x54c] ss:$16 sps:$4 sm:$0xff]  }
 0x167   :  { %2050 = vmatpush1.bf16.msra.mxu0 %v6603_v4  ;;  %2214 = vmatpush1.bf16.msra.mxu1 %v6606_v5  ;;  %v6687_v4 = vld [vmem:[#allocation7 + $0x540] ss:$16 sps:$4 sm:$0xff]   ;;  %v6690_v5 = vld [vmem:[#allocation7 + $0x548] ss:$16 sps:$4 sm:$0xff]  }
 0x168   :  { %2051 = vmatprep.subr.bf16.mxu0 %v6611_v6  ;;  %2215 = vmatprep.subr.bf16.mxu1 %v6614_v7  ;;  %v6695_v6 = vld [vmem:[#allocation7 + $0x564] ss:$16 sps:$4 sm:$0xff]   ;;  %v6698_v7 = vld [vmem:[#allocation7 + $0x56c] ss:$16 sps:$4 sm:$0xff]  }
 0x16b   :  { %2052 = vmatpush1.bf16.msra.mxu0 %v6609_v8  ;;  %2216 = vmatpush1.bf16.msra.mxu1 %v6612_v9  ;;  %v6693_v8 = vld [vmem:[#allocation7 + $0x560] ss:$16 sps:$4 sm:$0xff]   ;;  %v6696_v9 = vld [vmem:[#allocation7 + $0x568] ss:$16 sps:$4 sm:$0xff]  }
 0x16c   :  { %2053 = vmatprep.subr.bf16.mxu0 %v6617_v10  ;;  %2217 = vmatprep.subr.bf16.mxu1 %v6620_v11  ;;  %v6701_v10 = vld [vmem:[#allocation7 + $0x584] ss:$16 sps:$4 sm:$0xff]   ;;  %v6704_v11 = vld [vmem:[#allocation7 + $0x58c] ss:$16 sps:$4 sm:$0xff]  }
 0x16f   :  { %2054 = vmatpush1.bf16.msra.mxu0 %v6615_v12  ;;  %2218 = vmatpush1.bf16.msra.mxu1 %v6618_v13  ;;  %v6699_v12 = vld [vmem:[#allocation7 + $0x580] ss:$16 sps:$4 sm:$0xff]   ;;  %v6702_v13 = vld [vmem:[#allocation7 + $0x588] ss:$16 sps:$4 sm:$0xff]  }
 0x170   :  { %2055 = vmatprep.subr.bf16.mxu0 %v6623_v14  ;;  %2219 = vmatprep.subr.bf16.mxu1 %v6626_v15  ;;  %v6707_v14 = vld [vmem:[#allocation7 + $0x5a4] ss:$16 sps:$4 sm:$0xff]   ;;  %v6710_v15 = vld [vmem:[#allocation7 + $0x5ac] ss:$16 sps:$4 sm:$0xff]  }
 0x173   :  { %2056 = vmatpush1.bf16.msra.mxu0 %v6621_v17  ;;  %2220 = vmatpush1.bf16.msra.mxu1 %v6624_v18  ;;  %v6708_v17 = vld [vmem:[#allocation7 + $0x5a8] ss:$16 sps:$4 sm:$0xff]   ;;  %v6713_v18 = vld [vmem:[#allocation7 + $0x5c4] ss:$16 sps:$4 sm:$0xff]  }
 0x174   :  { %2066 = vmatprep.subr.bf16.mxu0 %v6629_v19  ;;  %2230 = vmatprep.subr.bf16.mxu1 %v6632_v21  ;;  %v6716_v19 = vld [vmem:[#allocation7 + $0x5cc] ss:$16 sps:$4 sm:$0xff]   ;;  %v6711_v21 = vld [vmem:[#allocation7 + $0x5c0] ss:$16 sps:$4 sm:$0xff]  }
 0x176   :  { %2058 = vmatmul.mubr.bf16.vlgmr.msra.gmra.mrb[8].mxu0 %v420_v24  ;;  %2222 = vmatmul.mubr.bf16.vlgmr.msra.gmra.mrb[8].mxu1 %v420_v24  ;;  %v6719_v24 = vld [vmem:[#allocation7 + $0x5e4] ss:$16 sps:$4 sm:$0xff]  }
 0x177   :  { %2067 = vmatpush1.bf16.msra.mxu0 %v6627_v25  ;;  %2231 = vmatpush1.bf16.msra.mxu1 %v6630_v26  ;;  %v6722_v25 = vld [vmem:[#allocation7 + $0x5ec] ss:$16 sps:$4 sm:$0xff]   ;;  %v414_v26 = vpack.c.bf16 %v7211_v20, %v7211_v20  ;;  %v6731_v20 = vld [vmem:[#allocation7 + $0x624] ss:$16 sps:$4 sm:$0xff]  }
 0x178   :  { %2068 = vmatprep.subr.bf16.mxu0 %v6635_v3  ;;  %2232 = vmatprep.subr.bf16.mxu1 %v6638_v27  ;;  %v6717_v3 = vld [vmem:[#allocation7 + $0x5e0] ss:$16 sps:$4 sm:$0xff]   ;;  %v6720_v27 = vld [vmem:[#allocation7 + $0x5e8] ss:$16 sps:$4 sm:$0xff]  }
 0x179   :  { %2098 = vmatprep.mubr.bf16.mxu0 %v423_v28  ;;  %2262 = vmatprep.mubr.bf16.mxu1 %v423_v28  ;;  %v6725_v28 = vld [vmem:[#allocation7 + $0x604] ss:$16 sps:$4 sm:$0xff]  }
 0x17b   :  { %2069 = vmatpush1.bf16.msra.mxu0 %v6633_v29  ;;  %2233 = vmatpush1.bf16.msra.mxu1 %v6636_v30  ;;  %v6728_v29 = vld [vmem:[#allocation7 + $0x60c] ss:$16 sps:$4 sm:$0xff]   ;;  %v417_v30 = vpack.c.bf16 %v7217_v39, %v7217_v39  ;;  %v6737_v39 = vld [vmem:[#allocation7 + $0x644] ss:$16 sps:$4 sm:$0xff]  }
 0x17c   :  { %2070 = vmatprep.subr.bf16.mxu0 %v6641_v23  ;;  %2234 = vmatprep.subr.bf16.mxu1 %v6644_v31  ;;  %v422_v23 = vmax.bf16 %v7069_v1, %v414_v26  ;;  %v6723_v31 = vld [vmem:[#allocation7 + $0x600] ss:$16 sps:$4 sm:$0xff]   ;;  %v6809_v26 = vld [vmem:[#allocation7 + $0x7c4] ss:$16 sps:$4 sm:$0xff]  }
 0x17f   :  { %2071 = vmatpush1.bf16.msra.mxu0 %v6639_v32  ;;  %2235 = vmatpush1.bf16.msra.mxu1 %v6642_v33  ;;  %v6726_v32 = vld [vmem:[#allocation7 + $0x608] ss:$16 sps:$4 sm:$0xff]   ;;  %v6734_v33 = vld [vmem:[#allocation7 + $0x62c] ss:$16 sps:$4 sm:$0xff]  }
 0x180   :  { %2072 = vmatprep.subr.bf16.mxu0 %v6647_v34  ;;  %2236 = vmatprep.subr.bf16.mxu1 %v6650_v35  ;;  %v425_v34 = vmax.bf16 %v7069_v1, %v417_v30  ;;  %v6729_v35 = vld [vmem:[#allocation7 + $0x620] ss:$16 sps:$4 sm:$0xff]   ;;  %v6818_v30 = vld [vmem:[#allocation7 + $0x7ec] ss:$16 sps:$4 sm:$0xff]  }
 0x183   :  { %2073 = vmatpush1.bf16.msra.mxu0 %v6645_v37  ;;  %2237 = vmatpush1.bf16.msra.mxu1 %v6648_v38  ;;  %v6732_v37 = vld [vmem:[#allocation7 + $0x628] ss:$16 sps:$4 sm:$0xff]   ;;  %v6740_v38 = vld [vmem:[#allocation7 + $0x64c] ss:$16 sps:$4 sm:$0xff]  }
 0x184   :  { %2074 = vmatprep.subr.bf16.mxu0 %v6653_v40  ;;  %2238 = vmatprep.subr.bf16.mxu1 %v6656_v41  ;;  %v6735_v40 = vld [vmem:[#allocation7 + $0x640] ss:$16 sps:$4 sm:$0xff]   ;;  %v6738_v41 = vld [vmem:[#allocation7 + $0x648] ss:$16 sps:$4 sm:$0xff]  }
 0x187   :  { %2075 = vmatpush1.bf16.msra.mxu0 %v6651_v42  ;;  %2239 = vmatpush1.bf16.msra.mxu1 %v6654_v43  ;;  %v6743_v42 = vld [vmem:[#allocation7 + $0x664] ss:$16 sps:$4 sm:$0xff]   ;;  %v6746_v43 = vld [vmem:[#allocation7 + $0x66c] ss:$16 sps:$4 sm:$0xff]  }
 0x188   :  { %2076 = vmatprep.subr.bf16.mxu0 %v6659_v44  ;;  %2240 = vmatprep.subr.bf16.mxu1 %v6662_v45  ;;  %v6741_v44 = vld [vmem:[#allocation7 + $0x660] ss:$16 sps:$4 sm:$0xff]   ;;  %v6744_v45 = vld [vmem:[#allocation7 + $0x668] ss:$16 sps:$4 sm:$0xff]  }
 0x18b   :  { %2077 = vmatpush1.bf16.msra.mxu0 %v6657_v46  ;;  %2241 = vmatpush1.bf16.msra.mxu1 %v6660_v47  ;;  %v6749_v46 = vld [vmem:[#allocation7 + $0x684] ss:$16 sps:$4 sm:$0xff]   ;;  %v6752_v47 = vld [vmem:[#allocation7 + $0x68c] ss:$16 sps:$4 sm:$0xff]  }
 0x18c   :  { %2078 = vmatprep.subr.bf16.mxu0 %v6665_v48  ;;  %2242 = vmatprep.subr.bf16.mxu1 %v6668_v49  ;;  %v6747_v48 = vld [vmem:[#allocation7 + $0x680] ss:$16 sps:$4 sm:$0xff]   ;;  %v6750_v49 = vld [vmem:[#allocation7 + $0x688] ss:$16 sps:$4 sm:$0xff]  }
 0x18f   :  { %2079 = vmatpush1.bf16.msra.mxu0 %v6663_v50  ;;  %2243 = vmatpush1.bf16.msra.mxu1 %v6666_v51  ;;  %v6755_v50 = vld [vmem:[#allocation7 + $0x6a4] ss:$16 sps:$4 sm:$0xff]   ;;  %v6758_v51 = vld [vmem:[#allocation7 + $0x6ac] ss:$16 sps:$4 sm:$0xff]  }
 0x190   :  { %2080 = vmatprep.subr.bf16.mxu0 %v6671_v52  ;;  %2244 = vmatprep.subr.bf16.mxu1 %v6674_v53  ;;  %v6753_v52 = vld [vmem:[#allocation7 + $0x6a0] ss:$16 sps:$4 sm:$0xff]   ;;  %v6756_v53 = vld [vmem:[#allocation7 + $0x6a8] ss:$16 sps:$4 sm:$0xff]  }
 0x193   :  { %2081 = vmatpush1.bf16.msra.mxu0 %v6669_v54  ;;  %2245 = vmatpush1.bf16.msra.mxu1 %v6672_v55  ;;  %v6761_v54 = vld [vmem:[#allocation7 + $0x6c4] ss:$16 sps:$4 sm:$0xff]   ;;  %v6764_v55 = vld [vmem:[#allocation7 + $0x6cc] ss:$16 sps:$4 sm:$0xff]  }
 0x194   :  { %2082 = vmatprep.subr.bf16.mxu0 %v6677_v56  ;;  %2246 = vmatprep.subr.bf16.mxu1 %v6680_v57  ;;  %v6759_v56 = vld [vmem:[#allocation7 + $0x6c0] ss:$16 sps:$4 sm:$0xff]   ;;  %v6762_v57 = vld [vmem:[#allocation7 + $0x6c8] ss:$16 sps:$4 sm:$0xff]  }
 0x197   :  { %2083 = vmatpush1.bf16.msra.mxu0 %v6675_v58  ;;  %2247 = vmatpush1.bf16.msra.mxu1 %v6678_v59  ;;  %v6767_v58 = vld [vmem:[#allocation7 + $0x6e4] ss:$16 sps:$4 sm:$0xff]   ;;  %v6770_v59 = vld [vmem:[#allocation7 + $0x6ec] ss:$16 sps:$4 sm:$0xff]  }
 0x198   :  { %2084 = vmatprep.subr.bf16.mxu0 %v6683_v60  ;;  %2248 = vmatprep.subr.bf16.mxu1 %v6686_v61  ;;  %v6765_v60 = vld [vmem:[#allocation7 + $0x6e0] ss:$16 sps:$4 sm:$0xff]   ;;  %v6768_v61 = vld [vmem:[#allocation7 + $0x6e8] ss:$16 sps:$4 sm:$0xff]  }
 0x19b   :  { %2085 = vmatpush1.bf16.msra.mxu0 %v6681_v62  ;;  %2249 = vmatpush1.bf16.msra.mxu1 %v6684_v63  ;;  %v6773_v62 = vld [vmem:[#allocation7 + $0x704] ss:$16 sps:$4 sm:$0xff]   ;;  %v6776_v63 = vld [vmem:[#allocation7 + $0x70c] ss:$16 sps:$4 sm:$0xff]  }
 0x19c   :  { %2086 = vmatprep.subr.bf16.mxu0 %v6689_v0  ;;  %2250 = vmatprep.subr.bf16.mxu1 %v6692_v2  ;;  %v6771_v0 = vld [vmem:[#allocation7 + $0x700] ss:$16 sps:$4 sm:$0xff]   ;;  %v6774_v2 = vld [vmem:[#allocation7 + $0x708] ss:$16 sps:$4 sm:$0xff]  }
 0x19f   :  { %2087 = vmatpush1.bf16.msra.mxu0 %v6687_v4  ;;  %2251 = vmatpush1.bf16.msra.mxu1 %v6690_v5  ;;  %v6779_v4 = vld [vmem:[#allocation7 + $0x724] ss:$16 sps:$4 sm:$0xff]   ;;  %v6782_v5 = vld [vmem:[#allocation7 + $0x72c] ss:$16 sps:$4 sm:$0xff]  }
 0x1a0   :  { %2088 = vmatprep.subr.bf16.mxu0 %v6695_v6  ;;  %2252 = vmatprep.subr.bf16.mxu1 %v6698_v7  ;;  %v6777_v6 = vld [vmem:[#allocation7 + $0x720] ss:$16 sps:$4 sm:$0xff]   ;;  %v6780_v7 = vld [vmem:[#allocation7 + $0x728] ss:$16 sps:$4 sm:$0xff]  }
 0x1a3   :  { %2089 = vmatpush1.bf16.msra.mxu0 %v6693_v8  ;;  %2253 = vmatpush1.bf16.msra.mxu1 %v6696_v9  ;;  %v6785_v8 = vld [vmem:[#allocation7 + $0x744] ss:$16 sps:$4 sm:$0xff]   ;;  %v6788_v9 = vld [vmem:[#allocation7 + $0x74c] ss:$16 sps:$4 sm:$0xff]  }
 0x1a4   :  { %2090 = vmatprep.subr.bf16.mxu0 %v6701_v10  ;;  %2254 = vmatprep.subr.bf16.mxu1 %v6704_v11  ;;  %v6783_v10 = vld [vmem:[#allocation7 + $0x740] ss:$16 sps:$4 sm:$0xff]   ;;  %v6786_v11 = vld [vmem:[#allocation7 + $0x748] ss:$16 sps:$4 sm:$0xff]  }
 0x1a7   :  { %2091 = vmatpush1.bf16.msra.mxu0 %v6699_v12  ;;  %2255 = vmatpush1.bf16.msra.mxu1 %v6702_v13  ;;  %v6791_v12 = vld [vmem:[#allocation7 + $0x764] ss:$16 sps:$4 sm:$0xff]   ;;  %v6794_v13 = vld [vmem:[#allocation7 + $0x76c] ss:$16 sps:$4 sm:$0xff]  }
 0x1a8   :  { %2092 = vmatprep.subr.bf16.mxu0 %v6707_v14  ;;  %2256 = vmatprep.subr.bf16.mxu1 %v6710_v15  ;;  %v6789_v14 = vld [vmem:[#allocation7 + $0x760] ss:$16 sps:$4 sm:$0xff]   ;;  %v6792_v15 = vld [vmem:[#allocation7 + $0x768] ss:$16 sps:$4 sm:$0xff]  }
 0x1ab   :  { %2093 = vmatpush1.bf16.msra.mxu0 %v6705_v16  ;;  %2257 = vmatpush1.bf16.msra.mxu1 %v6708_v17  ;;  %v6797_v16 = vld [vmem:[#allocation7 + $0x784] ss:$16 sps:$4 sm:$0xff]   ;;  %v6800_v17 = vld [vmem:[#allocation7 + $0x78c] ss:$16 sps:$4 sm:$0xff]  }
 0x1ac   :  { %2094 = vmatprep.subr.bf16.mxu0 %v6713_v18  ;;  %2258 = vmatprep.subr.bf16.mxu1 %v6716_v19  ;;  %v6795_v18 = vld [vmem:[#allocation7 + $0x780] ss:$16 sps:$4 sm:$0xff]   ;;  %v6798_v19 = vld [vmem:[#allocation7 + $0x788] ss:$16 sps:$4 sm:$0xff]  }
 0x1af   :  { %2095 = vmatpush1.bf16.msra.mxu0 %v6711_v21  ;;  %2259 = vmatpush1.bf16.msra.mxu1 %v6714_v22  ;;  %v6803_v21 = vld [vmem:[#allocation7 + $0x7a4] ss:$16 sps:$4 sm:$0xff]   ;;  %v6806_v22 = vld [vmem:[#allocation7 + $0x7ac] ss:$16 sps:$4 sm:$0xff]  }
 0x1b0   :  { %2096 = vmatprep.subr.bf16.mxu0 %v6719_v24  ;;  %2260 = vmatprep.subr.bf16.mxu1 %v6722_v25  ;;  %v6801_v24 = vld [vmem:[#allocation7 + $0x7a0] ss:$16 sps:$4 sm:$0xff]   ;;  %v6804_v25 = vld [vmem:[#allocation7 + $0x7a8] ss:$16 sps:$4 sm:$0xff]  }
 0x1b3   :  { %2097 = vmatpush1.bf16.msra.mxu0 %v6717_v3  ;;  %2261 = vmatpush1.bf16.msra.mxu1 %v6720_v27  ;;  %v6812_v3 = vld [vmem:[#allocation7 + $0x7cc] ss:$16 sps:$4 sm:$0xff]   ;;  %v6807_v27 = vld [vmem:[#allocation7 + $0x7c0] ss:$16 sps:$4 sm:$0xff]  }
 0x1b4   :  { %2107 = vmatprep.subr.bf16.mxu0 %v6725_v28  ;;  %2271 = vmatprep.subr.bf16.mxu1 %v6728_v29  ;;  %v6810_v28 = vld [vmem:[#allocation7 + $0x7c8] ss:$16 sps:$4 sm:$0xff]   ;;  %v6815_v29 = vld [vmem:[#allocation7 + $0x7e4] ss:$16 sps:$4 sm:$0xff]  }
 0x1b6   :  { %2099 = vmatmul.mubr.bf16.vlgmr.msra.gmra.mrb[8].mxu0 %v422_v23  ;;  %2263 = vmatmul.mubr.bf16.vlgmr.msra.gmra.mrb[8].mxu1 %v422_v23  ;;  %v6813_v23 = vld [vmem:[#allocation7 + $0x7e0] ss:$16 sps:$4 sm:$0xff]  }
 0x1b7   :  { %2108 = vmatpush1.bf16.msra.mxu0 %v6723_v31  ;;  %2272 = vmatpush1.bf16.msra.mxu1 %v6726_v32  ;;  %v6816_v31 = vld [vmem:[#allocation7 + $0x7e8] ss:$16 sps:$4 sm:$0xff]   ;;  %v416_v32 = vpack.c.bf16 %v7215_v36, %v7215_v36 }
 0x1b8   :  { %2109 = vmatprep.subr.bf16.mxu0 %v6731_v20  ;;  %2273 = vmatprep.subr.bf16.mxu1 %v6734_v33  ;;  %v6819_v20 = vld [vmem:[%s7717_s4 + $0x40] sm:$0xff]  }
 0x1b9   :  { %2139 = vmatprep.mubr.bf16.mxu0 %v425_v34  ;;  %2303 = vmatprep.mubr.bf16.mxu1 %v425_v34  ;;  %v6820_v33 = vld [vmem:[%s7717_s4 + $0xc0] sm:$0xff]  }
 0x1ba   :  { %v6821_v34 = vld [vmem:[%s7717_s4] sm:$0xff]  }
 0x1bb   :  { %2110 = vmatpush1.bf16.msra.mxu0 %v6729_v35  ;;  %2274 = vmatpush1.bf16.msra.mxu1 %v6732_v37  ;;  %v6822_v36 = vld [vmem:[%s7717_s4 + $0x80] sm:$0xff]   ;;  %v424_v35 = vmax.bf16 %v7069_v1, %v416_v32  ;;  %v6823_v37 = vld [vmem:[%s7717_s4 + $0x48] sm:$0xff]  }
 0x1bc   :  { %2111 = vmatprep.subr.bf16.mxu0 %v6737_v39  ;;  %2275 = vmatprep.subr.bf16.mxu1 %v6740_v38  ;;  %v6824_v39 = vld [vmem:[%s7717_s4 + $0xc8] sm:$0xff]  }
 0x1bd   :  { %v6825_v38 = vld [vmem:[%s7717_s4 + $0x8] sm:$0xff]  }
 0x1bf   :  { %2112 = vmatpush1.bf16.msra.mxu0 %v6735_v40  ;;  %2276 = vmatpush1.bf16.msra.mxu1 %v6738_v41  ;;  %v6826_v40 = vld [vmem:[%s7717_s4 + $0x88] sm:$0xff]   ;;  %v6827_v41 = vld [vmem:[%s7717_s4 + $0x50] sm:$0xff]  }
 0x1c0   :  { %2113 = vmatprep.subr.bf16.mxu0 %v6743_v42  ;;  %2277 = vmatprep.subr.bf16.mxu1 %v6746_v43  ;;  %v6828_v42 = vld [vmem:[%s7717_s4 + $0xd0] sm:$0xff]  }
 0x1c1   :  { %v6829_v43 = vld [vmem:[%s7717_s4 + $0x10] sm:$0xff]  }
 0x1c3   :  { %2114 = vmatpush1.bf16.msra.mxu0 %v6741_v44  ;;  %2278 = vmatpush1.bf16.msra.mxu1 %v6744_v45  ;;  %v6830_v44 = vld [vmem:[%s7717_s4 + $0x90] sm:$0xff]   ;;  %v6831_v45 = vld [vmem:[%s7717_s4 + $0x58] sm:$0xff]  }
 0x1c4   :  { %2115 = vmatprep.subr.bf16.mxu0 %v6749_v46  ;;  %2279 = vmatprep.subr.bf16.mxu1 %v6752_v47  ;;  %v6832_v46 = vld [vmem:[%s7717_s4 + $0xd8] sm:$0xff]  }
 0x1c5   :  { %v6833_v47 = vld [vmem:[%s7717_s4 + $0x18] sm:$0xff]  }
 0x1c7   :  { %2116 = vmatpush1.bf16.msra.mxu0 %v6747_v48  ;;  %2280 = vmatpush1.bf16.msra.mxu1 %v6750_v49  ;;  %v6834_v48 = vld [vmem:[%s7717_s4 + $0x98] sm:$0xff]   ;;  %v6835_v49 = vld [vmem:[%s7717_s4 + $0x60] sm:$0xff]  }
 0x1c8   :  { %2117 = vmatprep.subr.bf16.mxu0 %v6755_v50  ;;  %2281 = vmatprep.subr.bf16.mxu1 %v6758_v51  ;;  %v6836_v50 = vld [vmem:[%s7717_s4 + $0xe0] sm:$0xff]  }
 0x1c9   :  { %v6837_v51 = vld [vmem:[%s7717_s4 + $0x20] sm:$0xff]  }
 0x1cb   :  { %2118 = vmatpush1.bf16.msra.mxu0 %v6753_v52  ;;  %2282 = vmatpush1.bf16.msra.mxu1 %v6756_v53  ;;  %v6838_v52 = vld [vmem:[%s7717_s4 + $0xa0] sm:$0xff]   ;;  %v6839_v53 = vld [vmem:[%s7717_s4 + $0x68] sm:$0xff]  }
 0x1cc   :  { %2119 = vmatprep.subr.bf16.mxu0 %v6761_v54  ;;  %2283 = vmatprep.subr.bf16.mxu1 %v6764_v55  ;;  %v6840_v54 = vld [vmem:[%s7717_s4 + $0xe8] sm:$0xff]  }
 0x1cd   :  { %v6841_v55 = vld [vmem:[%s7717_s4 + $0x28] sm:$0xff]  }
 0x1cf   :  { %2120 = vmatpush1.bf16.msra.mxu0 %v6759_v56  ;;  %2284 = vmatpush1.bf16.msra.mxu1 %v6762_v57  ;;  %v6842_v56 = vld [vmem:[%s7717_s4 + $0xa8] sm:$0xff]   ;;  %v6843_v57 = vld [vmem:[%s7717_s4 + $0x70] sm:$0xff]  }
 0x1d0   :  { %2121 = vmatprep.subr.bf16.mxu0 %v6767_v58  ;;  %2285 = vmatprep.subr.bf16.mxu1 %v6770_v59  ;;  %v6844_v58 = vld [vmem:[%s7717_s4 + $0xf0] sm:$0xff]  }
 0x1d1   :  { %v6845_v59 = vld [vmem:[%s7717_s4 + $0x30] sm:$0xff]  }
 0x1d3   :  { %2122 = vmatpush1.bf16.msra.mxu0 %v6765_v60  ;;  %2286 = vmatpush1.bf16.msra.mxu1 %v6768_v61  ;;  %v6846_v60 = vld [vmem:[%s7717_s4 + $0xb0] sm:$0xff]   ;;  %v6847_v61 = vld [vmem:[%s7717_s4 + $0x78] sm:$0xff]  }
 0x1d4   :  { %2123 = vmatprep.subr.bf16.mxu0 %v6773_v62  ;;  %2287 = vmatprep.subr.bf16.mxu1 %v6776_v63  ;;  %v6848_v62 = vld [vmem:[%s7717_s4 + $0xf8] sm:$0xff]  }
 0x1d5   :  { %v6849_v63 = vld [vmem:[%s7717_s4 + $0x38] sm:$0xff]  }
 0x1d7   :  { %2124 = vmatpush1.bf16.msra.mxu0 %v6771_v0  ;;  %2288 = vmatpush1.bf16.msra.mxu1 %v6774_v2  ;;  %v6850_v0 = vld [vmem:[%s7717_s4 + $0xb8] sm:$0xff]   ;;  %v6853_v2 = vld [vmem:[%s7719_s6 + $0x4] ss:$16 sps:$4 sm:$0xff]  }
 0x1d8   :  { %2125 = vmatprep.subr.bf16.mxu0 %v6779_v4  ;;  %2289 = vmatprep.subr.bf16.mxu1 %v6782_v5  ;;  %v6856_v4 = vld [vmem:[%s7719_s6 + $0xc] ss:$16 sps:$4 sm:$0xff]   ;;  %v684_v5 = vlaneseq }
 0x1db   :  { %2126 = vmatpush1.bf16.msra.mxu0 %v6777_v6  ;;  %2290 = vmatpush1.bf16.msra.mxu1 %v6780_v7  ;;  %v7336_v6 = vshrl.u32 %v684_v5, 7  ;;  %v2948_v5 = vld [vmem:[#allocation8 + $0x8] sm:$0xff] }
 0x1dc   :  { %2127 = vmatprep.subr.bf16.mxu0 %v6785_v8  ;;  %2291 = vmatprep.subr.bf16.mxu1 %v6788_v9  ;;  %v682_v9 = vld [vmem:[%s7716_s3] sm:$0xf] }
 0x1dd   :  { %v686_v7 = vsub.s32 0, %v7336_v6  ;;  %v694_v8 = vsub.s32 2, %v7336_v6 }
 0x1df   :  { %2128 = vmatpush1.bf16.msra.mxu0 %v6783_v10  ;;  %2292 = vmatpush1.bf16.msra.mxu1 %v6786_v11  ;;  %v690_v10 = vsub.s32 1, %v7336_v6  ;;  %v698_v11 = vsub.s32 3, %v7336_v6 }
 0x1e0   :  { %2129 = vmatprep.subr.bf16.mxu0 %v6791_v12  ;;  %2293 = vmatprep.subr.bf16.mxu1 %v6794_v13  ;;  %v687_v12 = vrot.slane %v682_v9, %v686_v7  ;;  %v695_v13 = vrot.slane %v682_v9, %v694_v8 }
 0x1e3   :  { %2130 = vmatpush1.bf16.msra.mxu0 %v6789_v14  ;;  %2294 = vmatpush1.bf16.msra.mxu1 %v6792_v15  ;;  %v691_v14 = vrot.slane %v682_v9, %v690_v10  ;;  %v699_v15 = vrot.slane %v682_v9, %v698_v11 }
 0x1e4   :  { %2131 = vmatprep.subr.bf16.mxu0 %v6797_v16  ;;  %2295 = vmatprep.subr.bf16.mxu1 %v6800_v17 }
 0x1e7   :  { %2132 = vmatpush1.bf16.msra.mxu0 %v6795_v18  ;;  %2296 = vmatpush1.bf16.msra.mxu1 %v6798_v19 }
 0x1e8   :  { %2133 = vmatprep.subr.bf16.mxu0 %v6803_v21  ;;  %2297 = vmatprep.subr.bf16.mxu1 %v6806_v22 }
 0x1eb   :  { %2134 = vmatpush1.bf16.msra.mxu0 %v6801_v24  ;;  %2298 = vmatpush1.bf16.msra.mxu1 %v6804_v25 }
 0x1ec   :  { %2135 = vmatprep.subr.bf16.mxu0 %v6809_v26  ;;  %2299 = vmatprep.subr.bf16.mxu1 %v6812_v3 }
 0x1ef   :  { %2136 = vmatpush1.bf16.msra.mxu0 %v6807_v27  ;;  %2300 = vmatpush1.bf16.msra.mxu1 %v6810_v28 }
 0x1f0   :  { %2137 = vmatprep.subr.bf16.mxu0 %v6815_v29  ;;  %2301 = vmatprep.subr.bf16.mxu1 %v6818_v30 }
 0x1f3   :  { %2138 = vmatpush1.bf16.msra.mxu0 %v6813_v23  ;;  %2302 = vmatpush1.bf16.msra.mxu1 %v6816_v31 }
 0x1f4   :  { %6234 = vmatprep.subr.bf16.mxu0 %v6819_v20  ;;  %6256 = vmatprep.subr.bf16.mxu1 %v6820_v33  ;;  %v6851_v33 = vld [vmem:[%s7719_s6] ss:$16 sps:$4 sm:$0xff]  }
 0x1f6   :  { %2140 = vmatmul.mubr.bf16.vlgmr.msra.gmra.mrb[8].mxu0 %v424_v35  ;;  %2304 = vmatmul.mubr.bf16.vlgmr.msra.gmra.mrb[8].mxu1 %v424_v35 }
 0x1f7   :  { %6235 = vmatpush3.bf16.msra.mxu0 %v6821_v34  ;;  %6257 = vmatpush3.bf16.msra.mxu1 %v6822_v36  ;;  %v6854_v34 = vld [vmem:[%s7719_s6 + $0x8] ss:$16 sps:$4 sm:$0xff]  }
 0x1f8   :  { %6236 = vmatprep.subr.bf16.mxu0 %v6823_v37  ;;  %6258 = vmatprep.subr.bf16.mxu1 %v6824_v39  ;;  %v6859_v37 = vld [vmem:[%s7719_s6 + $0x24] ss:$16 sps:$4 sm:$0xff]   ;;  %v6862_v39 = vld [vmem:[%s7719_s6 + $0x2c] ss:$16 sps:$4 sm:$0xff]  }
 0x1fb   :  { %6237 = vmatpush3.bf16.msra.mxu0 %v6825_v38  ;;  %6259 = vmatpush3.bf16.msra.mxu1 %v6826_v40  ;;  %v6857_v38 = vld [vmem:[%s7719_s6 + $0x20] ss:$16 sps:$4 sm:$0xff]   ;;  %v6860_v40 = vld [vmem:[%s7719_s6 + $0x28] ss:$16 sps:$4 sm:$0xff]  }
 0x1fc   :  { %6238 = vmatprep.subr.bf16.mxu0 %v6827_v41  ;;  %6260 = vmatprep.subr.bf16.mxu1 %v6828_v42  ;;  %v6865_v41 = vld [vmem:[%s7719_s6 + $0x44] ss:$16 sps:$4 sm:$0xff]   ;;  %v6868_v42 = vld [vmem:[%s7719_s6 + $0x4c] ss:$16 sps:$4 sm:$0xff]  }
 0x1ff   :  { %6239 = vmatpush3.bf16.msra.mxu0 %v6829_v43  ;;  %6261 = vmatpush3.bf16.msra.mxu1 %v6830_v44  ;;  %v6863_v43 = vld [vmem:[%s7719_s6 + $0x40] ss:$16 sps:$4 sm:$0xff]   ;;  %v6866_v44 = vld [vmem:[%s7719_s6 + $0x48] ss:$16 sps:$4 sm:$0xff]  }
 0x200   :  { %6240 = vmatprep.subr.bf16.mxu0 %v6831_v45  ;;  %6262 = vmatprep.subr.bf16.mxu1 %v6832_v46  ;;  %v6871_v45 = vld [vmem:[%s7719_s6 + $0x64] ss:$16 sps:$4 sm:$0xff]   ;;  %v6874_v46 = vld [vmem:[%s7719_s6 + $0x6c] ss:$16 sps:$4 sm:$0xff]  }
 0x203   :  { %6241 = vmatpush3.bf16.msra.mxu0 %v6833_v47  ;;  %6263 = vmatpush3.bf16.msra.mxu1 %v6834_v48  ;;  %v6869_v47 = vld [vmem:[%s7719_s6 + $0x60] ss:$16 sps:$4 sm:$0xff]   ;;  %v6872_v48 = vld [vmem:[%s7719_s6 + $0x68] ss:$16 sps:$4 sm:$0xff]  }
 0x204   :  { %6242 = vmatprep.subr.bf16.mxu0 %v6835_v49  ;;  %6264 = vmatprep.subr.bf16.mxu1 %v6836_v50  ;;  %v6877_v49 = vld [vmem:[%s7719_s6 + $0x84] ss:$16 sps:$4 sm:$0xff]   ;;  %v6880_v50 = vld [vmem:[%s7719_s6 + $0x8c] ss:$16 sps:$4 sm:$0xff]  }
 0x207   :  { %6243 = vmatpush3.bf16.msra.mxu0 %v6837_v51  ;;  %6265 = vmatpush3.bf16.msra.mxu1 %v6838_v52  ;;  %v6875_v51 = vld [vmem:[%s7719_s6 + $0x80] ss:$16 sps:$4 sm:$0xff]   ;;  %v6878_v52 = vld [vmem:[%s7719_s6 + $0x88] ss:$16 sps:$4 sm:$0xff]  }
 0x208   :  { %6244 = vmatprep.subr.bf16.mxu0 %v6839_v53  ;;  %6266 = vmatprep.subr.bf16.mxu1 %v6840_v54  ;;  %v6883_v53 = vld [vmem:[%s7719_s6 + $0xa4] ss:$16 sps:$4 sm:$0xff]   ;;  %v6886_v54 = vld [vmem:[%s7719_s6 + $0xac] ss:$16 sps:$4 sm:$0xff]  }
 0x20b   :  { %6245 = vmatpush3.bf16.msra.mxu0 %v6841_v55  ;;  %6267 = vmatpush3.bf16.msra.mxu1 %v6842_v56  ;;  %v6881_v55 = vld [vmem:[%s7719_s6 + $0xa0] ss:$16 sps:$4 sm:$0xff]   ;;  %v6884_v56 = vld [vmem:[%s7719_s6 + $0xa8] ss:$16 sps:$4 sm:$0xff]  }
 0x20c   :  { %6246 = vmatprep.subr.bf16.mxu0 %v6843_v57  ;;  %6268 = vmatprep.subr.bf16.mxu1 %v6844_v58  ;;  %v6889_v57 = vld [vmem:[%s7719_s6 + $0xc4] ss:$16 sps:$4 sm:$0xff]   ;;  %v6892_v58 = vld [vmem:[%s7719_s6 + $0xcc] ss:$16 sps:$4 sm:$0xff]  }
 0x20f   :  { %6247 = vmatpush3.bf16.msra.mxu0 %v6845_v59  ;;  %6269 = vmatpush3.bf16.msra.mxu1 %v6846_v60  ;;  %v6887_v59 = vld [vmem:[%s7719_s6 + $0xc0] ss:$16 sps:$4 sm:$0xff]   ;;  %v6890_v60 = vld [vmem:[%s7719_s6 + $0xc8] ss:$16 sps:$4 sm:$0xff]  }
 0x210   :  { %6248 = vmatprep.subr.bf16.mxu0 %v6847_v61  ;;  %6270 = vmatprep.subr.bf16.mxu1 %v6848_v62  ;;  %v6895_v61 = vld [vmem:[%s7719_s6 + $0xe4] ss:$16 sps:$4 sm:$0xff]   ;;  %v6898_v62 = vld [vmem:[%s7719_s6 + $0xec] ss:$16 sps:$4 sm:$0xff]  }
 0x213   :  { %6249 = vmatpush3.bf16.msra.mxu0 %v6849_v63  ;;  %6271 = vmatpush3.bf16.msra.mxu1 %v6850_v0  ;;  %v6893_v63 = vld [vmem:[%s7719_s6 + $0xe0] ss:$16 sps:$4 sm:$0xff]   ;;  %v6896_v0 = vld [vmem:[%s7719_s6 + $0xe8] ss:$16 sps:$4 sm:$0xff]  }
 0x214   :  { %2857 = vmatprep.subr.bf16.mxu0 %v6853_v2  ;;  %2898 = vmatprep.subr.bf16.mxu1 %v6856_v4  ;;  %v2947_v2 = vld [vmem:[#allocation8] sm:$0xff] }
 0x215   :  { %v2951_v4 = vld [vmem:[#allocation8 + $0x20] sm:$0xff] }
 0x216   :  { %v5912_v9 = vcombine.low %v2947_v2, %v2951_v4 }
 0x2c9   :  { %v2141_v16 = vpop.f32.mrb[8].mxu0  ;;  %v2305_v17 = vpop.f32.mrb[8].mxu1 }
 0x2ca   :  { %v6366_v18 = vadd.f32 %v2141_v16, %v687_v12  ;;  %v6368_v19 = vadd.f32 %v2305_v17, %v695_v13  ;;  %v2143_v21 = vpop.f32.mrb[9].mxu0  ;;  %v2307_v22 = vpop.f32.mrb[9].mxu1  ;;  %v5913_v12 = vcombine.high %v2947_v2, %v2951_v4  ;;  %v2952_v13 = vld [vmem:[#allocation8 + $0x28] sm:$0xff] }
 0x2cb   :  { %v6367_v24 = vadd.f32 %v2143_v21, %v691_v14  ;;  %v6369_v25 = vadd.f32 %v2307_v22, %v699_v15  ;;  %v2145_v26 = vpop.f32.mrb[10].mxu0  ;;  %v2309_v3 = vpop.f32.mrb[10].mxu1  ;;  %v5914_v14 = vcombine.low %v2948_v5, %v2952_v13  ;;  %v5915_v15 = vcombine.high %v2948_v5, %v2952_v13  ;;  %v2996_v13 = vld [vmem:[#allocation8 + $0x188] sm:$0xff] }
 0x2cc   :  { %v2312_v27 = vpack.c.bf16 %v6366_v18, %v6366_v18  ;;  %v2314_v28 = vpack.c.bf16 %v6368_v19, %v6368_v19  ;;  %v2146_v29 = vpop.f32.mrb[11].mxu0  ;;  %v2310_v30 = vpop.f32.mrb[11].mxu1  ;;  %v5847_v18 = vld [vmem:[%s7718_s5] ss:$0 sm:$0xff] }
 0x2cd   :  { %v2313_v23 = vpack.c.bf16 %v6367_v24, %v6367_v24  ;;  %v2315_v31 = vpack.c.bf16 %v6369_v25, %v6369_v25  ;;  %v2955_v30 = vld [vmem:[#allocation8 + $0x40] sm:$0xff] }
 0x2ce   :  { %v2316_v36 = vmax.bf16 %v7069_v1, %v2312_v27  ;;  %v2318_v35 = vmax.bf16 %v7069_v1, %v2314_v28 }
 0x2cf   :  { %v2317_v32 = vmax.bf16 %v7069_v1, %v2313_v23  ;;  %v2319_v20 = vmax.bf16 %v7069_v1, %v2315_v31  ;;  %v2959_v23 = vld [vmem:[#allocation8 + $0x60] sm:$0xff]  ;;  %v2956_v31 = vld [vmem:[#allocation8 + $0x48] sm:$0xff] }
 0x2d1   :  { %2615 = vmatprep.mubr.bf16.mxu0 %v2317_v32  ;;  %2655 = vmatprep.mubr.bf16.mxu1 %v2319_v20  ;;  %v2960_v32 = vld [vmem:[#allocation8 + $0x68] sm:$0xff] }
 0x2d2   :  { %2616 = vmatmul.mubr.bf16.vlgmr.msra.gmra.mrb[12].mxu0 %v2316_v36  ;;  %2656 = vmatmul.mubr.bf16.vlgmr.msra.gmra.mrb[12].mxu1 %v2318_v35  ;;  %v5923_v36 = vcombine.high %v2956_v31, %v2960_v32  ;;  %v2963_v35 = vld [vmem:[#allocation8 + $0x80] sm:$0xff] }
 0x2d3   :  { %2858 = vmatpush1.bf16.msra.mxu0 %v6851_v33  ;;  %2899 = vmatpush1.bf16.msra.mxu1 %v6854_v34  ;;  %v5921_v34 = vcombine.high %v2955_v30, %v2959_v23 }
 0x2d4   :  { %2859 = vmatprep.subr.bf16.mxu0 %v6859_v37  ;;  %2900 = vmatprep.subr.bf16.mxu1 %v6862_v39  ;;  %v2967_v37 = vld [vmem:[#allocation8 + $0xa0] sm:$0xff]  ;;  %v2964_v39 = vld [vmem:[#allocation8 + $0x88] sm:$0xff] }
 0x2d5   :  { %2889 = vmatprep.mubr.bf16.mxu0 %v7069_v1  ;;  %2930 = vmatprep.mubr.bf16.mxu1 %v7069_v1 }
 0x2d7   :  { %2860 = vmatpush1.bf16.msra.mxu0 %v6857_v38  ;;  %2901 = vmatpush1.bf16.msra.mxu1 %v6860_v40  ;;  %v2968_v38 = vld [vmem:[#allocation8 + $0xa8] sm:$0xff]  ;;  %v5920_v40 = vcombine.low %v2955_v30, %v2959_v23 }
 0x2d8   :  { %2861 = vmatprep.subr.bf16.mxu0 %v6865_v41  ;;  %2902 = vmatprep.subr.bf16.mxu1 %v6868_v42  ;;  %v5922_v41 = vcombine.low %v2956_v31, %v2960_v32  ;;  %v5929_v42 = vcombine.high %v2963_v35, %v2967_v37  ;;  %v3012_v30 = vld [vmem:[#allocation8 + $0x208] sm:$0xff] }
 0x2d9   :  { %v3016_v23 = vld [vmem:[#allocation8 + $0x228] sm:$0xff] }
 0x2db   :  { %2862 = vmatpush1.bf16.msra.mxu0 %v6863_v43  ;;  %2903 = vmatpush1.bf16.msra.mxu1 %v6866_v44  ;;  %v5931_v43 = vcombine.high %v2964_v39, %v2968_v38  ;;  %v2971_v44 = vld [vmem:[#allocation8 + $0xc0] sm:$0xff] }
 0x2dc   :  { %2863 = vmatprep.subr.bf16.mxu0 %v6871_v45  ;;  %2904 = vmatprep.subr.bf16.mxu1 %v6874_v46  ;;  %v2975_v45 = vld [vmem:[#allocation8 + $0xe0] sm:$0xff]  ;;  %v2972_v46 = vld [vmem:[#allocation8 + $0xc8] sm:$0xff] }
 0x2df   :  { %2864 = vmatpush1.bf16.msra.mxu0 %v6869_v47  ;;  %2905 = vmatpush1.bf16.msra.mxu1 %v6872_v48  ;;  %v2976_v47 = vld [vmem:[#allocation8 + $0xe8] sm:$0xff]  ;;  %v5928_v48 = vcombine.low %v2963_v35, %v2967_v37 }
 0x2e0   :  { %2865 = vmatprep.subr.bf16.mxu0 %v6877_v49  ;;  %2906 = vmatprep.subr.bf16.mxu1 %v6880_v50  ;;  %v5930_v49 = vcombine.low %v2964_v39, %v2968_v38  ;;  %v5937_v50 = vcombine.high %v2971_v44, %v2975_v45  ;;  %v3020_v35 = vld [vmem:[#allocation8 + $0x248] sm:$0xff]  ;;  %v5978_v38 = vcombine.low %v3012_v30, %v3016_v23 }
 0x2e1   :  { %v3024_v37 = vld [vmem:[#allocation8 + $0x268] sm:$0xff] }
 0x2e3   :  { %2866 = vmatpush1.bf16.msra.mxu0 %v6875_v51  ;;  %2907 = vmatpush1.bf16.msra.mxu1 %v6878_v52  ;;  %v5939_v51 = vcombine.high %v2972_v46, %v2976_v47  ;;  %v2979_v52 = vld [vmem:[#allocation8 + $0x100] sm:$0xff] }
 0x2e4   :  { %2867 = vmatprep.subr.bf16.mxu0 %v6883_v53  ;;  %2908 = vmatprep.subr.bf16.mxu1 %v6886_v54  ;;  %v2983_v53 = vld [vmem:[#allocation8 + $0x120] sm:$0xff]  ;;  %v2980_v54 = vld [vmem:[#allocation8 + $0x108] sm:$0xff] }
 0x2e7   :  { %2868 = vmatpush1.bf16.msra.mxu0 %v6881_v55  ;;  %2909 = vmatpush1.bf16.msra.mxu1 %v6884_v56  ;;  %v2984_v55 = vld [vmem:[#allocation8 + $0x128] sm:$0xff]  ;;  %v5936_v56 = vcombine.low %v2971_v44, %v2975_v45 }
 0x2e8   :  { %2869 = vmatprep.subr.bf16.mxu0 %v6889_v57  ;;  %2910 = vmatprep.subr.bf16.mxu1 %v6892_v58  ;;  %v5938_v57 = vcombine.low %v2972_v46, %v2976_v47  ;;  %v5945_v58 = vcombine.high %v2979_v52, %v2983_v53  ;;  %v5946_v2 = vcombine.low %v2980_v54, %v2984_v55  ;;  %v3028_v44 = vld [vmem:[#allocation8 + $0x288] sm:$0xff] }
 0x2e9   :  { %v3032_v45 = vld [vmem:[#allocation8 + $0x2a8] sm:$0xff]  ;;  %v5986_v47 = vcombine.low %v3020_v35, %v3024_v37 }
 0x2eb   :  { %2870 = vmatpush1.bf16.msra.mxu0 %v6887_v59  ;;  %2911 = vmatpush1.bf16.msra.mxu1 %v6890_v60  ;;  %v5947_v59 = vcombine.high %v2980_v54, %v2984_v55  ;;  %v2987_v60 = vld [vmem:[#allocation8 + $0x140] sm:$0xff]  ;;  %v5994_v55 = vcombine.low %v3028_v44, %v3032_v45 }
 0x2ec   :  { %2871 = vmatprep.subr.bf16.mxu0 %v6895_v61  ;;  %2912 = vmatprep.subr.bf16.mxu1 %v6898_v62  ;;  %v2991_v61 = vld [vmem:[#allocation8 + $0x160] sm:$0xff]  ;;  %v2988_v62 = vld [vmem:[#allocation8 + $0x148] sm:$0xff] }
 0x2ed   :  { %v5953_v4 = vcombine.high %v2987_v60, %v2991_v61 }
 0x2ef   :  { %2872 = vmatpush1.bf16.msra.mxu0 %v6893_v63  ;;  %2913 = vmatpush1.bf16.msra.mxu1 %v6896_v0  ;;  %v2992_v63 = vld [vmem:[#allocation8 + $0x168] sm:$0xff]  ;;  %v5944_v0 = vcombine.low %v2979_v52, %v2983_v53 }
 0x2f0   :  { %4525 = vmatprep.subr.bf16.mxu0 %v5913_v12  ;;  %4607 = vmatprep.subr.bf16.mxu1 %v5915_v15  ;;  %v5955_v5 = vcombine.high %v2988_v62, %v2992_v63  ;;  %v2999_v12 = vld [vmem:[#allocation8 + $0x1a0] sm:$0xff]  ;;  %v5952_v15 = vcombine.low %v2987_v60, %v2991_v61  ;;  %v3036_v52 = vld [vmem:[#allocation8 + $0x2c8] sm:$0xff] }
 0x2f1   :  { %v3040_v53 = vld [vmem:[#allocation8 + $0x2e8] sm:$0xff] }
 0x2f2   :  { %v3044_v60 = vld [vmem:[#allocation8 + $0x308] sm:$0xff] }
 0x2f3   :  { %v3048_v61 = vld [vmem:[#allocation8 + $0x328] sm:$0xff] }
 0x3a5   :  { %v6250_v16 = vpop.f32.mrb[12].mxu0  ;;  %v6272_v17 = vpop.f32.mrb[12].mxu1 }
 0x3a6   :  { %v6251_v19 = vpop.f32.mrb[13].mxu0  ;;  %v6273_v21 = vpop.f32.mrb[13].mxu1 }
 0x3a7   :  { %v6252_v22 = vadd.f32 %v6251_v19, %v6250_v16  ;;  %v6274_v24 = vadd.f32 %v6273_v21, %v6272_v17  ;;  %v6253_v25 = vpop.f32.mrb[14].mxu0  ;;  %v6275_v26 = vpop.f32.mrb[14].mxu1  ;;  %v5954_v16 = vcombine.low %v2988_v62, %v2992_v63  ;;  %v3003_v19 = vld [vmem:[#allocation8 + $0x1c0] sm:$0xff]  ;;  %v6002_v63 = vcombine.low %v3036_v52, %v3040_v53 }
 0x3a8   :  { %v6254_v3 = vpop.f32.mrb[15].mxu0  ;;  %v6276_v27 = vpop.f32.mrb[15].mxu1  ;;  %v3007_v21 = vld [vmem:[#allocation8 + $0x1e0] sm:$0xff] }
 0x3a9   :  { %v2618_v28 = vadd.f32 %v6252_v22, %v5847_v18  ;;  %v3004_v22 = vld [vmem:[#allocation8 + $0x1c8] sm:$0xff]  ;;  %v5969_v3 = vcombine.high %v3003_v19, %v3007_v21  ;;  %v5968_v31 = vcombine.low %v3003_v19, %v3007_v21 }
 0x3aa   :  { %v3060_v19 = vld [vmem:[#allocation8 + $0x388] sm:$0xff] }
 0x3ab   :  { %v2658_v29 = vadd.f32 %v6274_v24, %v2618_v28  ;;  %v3008_v24 = vld [vmem:[#allocation8 + $0x1e8] sm:$0xff]  ;;  %v3011_v28 = vld [vmem:[#allocation8 + $0x200] sm:$0xff] }
 0x3ac   :  { %v5971_v27 = vcombine.high %v3004_v22, %v3008_v24  ;;  %v5970_v32 = vcombine.low %v3004_v22, %v3008_v24  ;;  %v3064_v21 = vld [vmem:[#allocation8 + $0x3a8] sm:$0xff] }
 0x3ad   :  { %v2663_v20 = vpack.c.bf16 %v2658_v29, %v2658_v29  ;;  %v3015_v29 = vld [vmem:[#allocation8 + $0x220] sm:$0xff] }
 0x3ae   :  { %v5976_v39 = vcombine.low %v3011_v28, %v3015_v29 }
 0x3af   :  { %v2664_v33 = vmax.bf16 %v7069_v1, %v2663_v20  ;;  %v5977_v20 = vcombine.high %v3011_v28, %v3015_v29  ;;  %v3067_v28 = vld [vmem:[#allocation8 + $0x3c0] sm:$0xff] }
 0x3b0   :  { %v3071_v29 = vld [vmem:[#allocation8 + $0x3e0] sm:$0xff] }
 0x3b1   :  { %2890 = vmatmul.mubr.bf16.vlgmr.msra.gmra.mrb[16].mxu0 %v2664_v33  ;;  %2931 = vmatmul.mubr.bf16.vlgmr.msra.gmra.mrb[16].mxu1 %v2664_v33  ;;  %v5979_v33 = vcombine.high %v3012_v30, %v3016_v23  ;;  %v3068_v30 = vld [vmem:[#allocation8 + $0x3c8] sm:$0xff]  ;;  %v6033_v23 = vcombine.high %v3067_v28, %v3071_v29 }
 0x3b2   :  { %4526 = vmatpush1.bf16.msra.mxu0 %v5912_v9  ;;  %4608 = vmatpush1.bf16.msra.mxu1 %v5914_v14  ;;  %v2995_v9 = vld [vmem:[#allocation8 + $0x180] sm:$0xff]  ;;  %v3000_v14 = vld [vmem:[#allocation8 + $0x1a8] sm:$0xff] }
 0x3b3   :  { %4527 = vmatprep.subr.bf16.mxu0 %v5921_v34  ;;  %4609 = vmatprep.subr.bf16.mxu1 %v5923_v36  ;;  %v5961_v17 = vcombine.high %v2995_v9, %v2999_v12  ;;  %v5963_v18 = vcombine.high %v2996_v13, %v3000_v14  ;;  %v5960_v25 = vcombine.low %v2995_v9, %v2999_v12  ;;  %v3019_v34 = vld [vmem:[#allocation8 + $0x240] sm:$0xff]  ;;  %v3052_v9 = vld [vmem:[#allocation8 + $0x348] sm:$0xff] }
 0x3b4   :  { %v5962_v26 = vcombine.low %v2996_v13, %v3000_v14  ;;  %v3023_v36 = vld [vmem:[#allocation8 + $0x260] sm:$0xff]  ;;  %v3056_v12 = vld [vmem:[#allocation8 + $0x368] sm:$0xff]  ;;  %v6010_v14 = vcombine.low %v3044_v60, %v3048_v61 }
 0x3b5   :  { %v5984_v46 = vcombine.low %v3019_v34, %v3023_v36  ;;  %v6018_v24 = vcombine.low %v3052_v9, %v3056_v12 }
 0x3b6   :  { %4528 = vmatpush1.bf16.msra.mxu0 %v5920_v40  ;;  %4610 = vmatpush1.bf16.msra.mxu1 %v5922_v41  ;;  %v5985_v40 = vcombine.high %v3019_v34, %v3023_v36  ;;  %v5987_v41 = vcombine.high %v3020_v35, %v3024_v37  ;;  %v3075_v34 = vld [vmem:[#allocation8 + $0x400] sm:$0xff]  ;;  %v3076_v35 = vld [vmem:[#allocation8 + $0x408] sm:$0xff] }
 0x3b7   :  { %4529 = vmatprep.subr.bf16.mxu0 %v5929_v42  ;;  %4611 = vmatprep.subr.bf16.mxu1 %v5931_v43  ;;  %v3027_v42 = vld [vmem:[#allocation8 + $0x280] sm:$0xff] }
 0x3b8   :  { %v3031_v43 = vld [vmem:[#allocation8 + $0x2a0] sm:$0xff] }
 0x3b9   :  { %v5992_v54 = vcombine.low %v3027_v42, %v3031_v43  ;;  %v3079_v36 = vld [vmem:[#allocation8 + $0x420] sm:$0xff] }
 0x3ba   :  { %4530 = vmatpush1.bf16.msra.mxu0 %v5928_v48  ;;  %4612 = vmatpush1.bf16.msra.mxu1 %v5930_v49  ;;  %v5993_v48 = vcombine.high %v3027_v42, %v3031_v43  ;;  %v5995_v49 = vcombine.high %v3028_v44, %v3032_v45  ;;  %v6041_v37 = vcombine.high %v3075_v34, %v3079_v36 }
 0x3bb   :  { %4531 = vmatprep.subr.bf16.mxu0 %v5937_v50  ;;  %4613 = vmatprep.subr.bf16.mxu1 %v5939_v51  ;;  %v3035_v50 = vld [vmem:[#allocation8 + $0x2c0] sm:$0xff] }
 0x3bc   :  { %v3039_v51 = vld [vmem:[#allocation8 + $0x2e0] sm:$0xff] }
 0x3bd   :  { %v6000_v62 = vcombine.low %v3035_v50, %v3039_v51 }
 0x3be   :  { %4532 = vmatpush1.bf16.msra.mxu0 %v5936_v56  ;;  %4614 = vmatpush1.bf16.msra.mxu1 %v5938_v57  ;;  %v6001_v56 = vcombine.high %v3035_v50, %v3039_v51  ;;  %v6003_v57 = vcombine.high %v3036_v52, %v3040_v53  ;;  %v3083_v50 = vld [vmem:[#allocation8 + $0x440] sm:$0xff] }
 0x3bf   :  { %4533 = vmatprep.subr.bf16.mxu0 %v5945_v58  ;;  %4615 = vmatprep.subr.bf16.mxu1 %v5947_v59  ;;  %v3043_v58 = vld [vmem:[#allocation8 + $0x300] sm:$0xff] }
 0x3c0   :  { %v3047_v59 = vld [vmem:[#allocation8 + $0x320] sm:$0xff] }
 0x3c1   :  { %v6008_v13 = vcombine.low %v3043_v58, %v3047_v59 }
 0x3c2   :  { %4534 = vmatpush1.bf16.msra.mxu0 %v5944_v0  ;;  %4616 = vmatpush1.bf16.msra.mxu1 %v5946_v2  ;;  %v6009_v0 = vcombine.high %v3043_v58, %v3047_v59  ;;  %v6011_v2 = vcombine.high %v3044_v60, %v3048_v61  ;;  %v3091_v59 = vld [vmem:[#allocation8 + $0x480] sm:$0xff] }
 0x3c3   :  { %4535 = vmatprep.subr.bf16.mxu0 %v5953_v4  ;;  %4617 = vmatprep.subr.bf16.mxu1 %v5955_v5  ;;  %v3051_v4 = vld [vmem:[#allocation8 + $0x340] sm:$0xff] }
 0x3c4   :  { %v3055_v5 = vld [vmem:[#allocation8 + $0x360] sm:$0xff] }
 0x3c5   :  { %v6016_v22 = vcombine.low %v3051_v4, %v3055_v5 }
 0x3c6   :  { %4536 = vmatpush1.bf16.msra.mxu0 %v5952_v15  ;;  %4618 = vmatpush1.bf16.msra.mxu1 %v5954_v16  ;;  %v6017_v15 = vcombine.high %v3051_v4, %v3055_v5  ;;  %v6019_v16 = vcombine.high %v3052_v9, %v3056_v12 }
 0x3c7   :  { %4537 = vmatprep.subr.bf16.mxu0 %v5961_v17  ;;  %4619 = vmatprep.subr.bf16.mxu1 %v5963_v18  ;;  %v3059_v17 = vld [vmem:[#allocation8 + $0x380] sm:$0xff] }
 0x3c8   :  { %v3063_v18 = vld [vmem:[#allocation8 + $0x3a0] sm:$0xff] }
 0x3ca   :  { %4538 = vmatpush1.bf16.msra.mxu0 %v5960_v25  ;;  %4620 = vmatpush1.bf16.msra.mxu1 %v5962_v26  ;;  %v6025_v25 = vcombine.high %v3059_v17, %v3063_v18  ;;  %v6027_v26 = vcombine.high %v3060_v19, %v3064_v21 }
 0x3cb   :  { %4539 = vmatprep.subr.bf16.mxu0 %v5969_v3  ;;  %4621 = vmatprep.subr.bf16.mxu1 %v5971_v27  ;;  %v6024_v3 = vcombine.low %v3059_v17, %v3063_v18  ;;  %v6026_v27 = vcombine.low %v3060_v19, %v3064_v21 }
 0x3ce   :  { %4540 = vmatpush1.bf16.msra.mxu0 %v5968_v31  ;;  %4622 = vmatpush1.bf16.msra.mxu1 %v5970_v32  ;;  %v3072_v31 = vld [vmem:[#allocation8 + $0x3e8] sm:$0xff]  ;;  %v6032_v32 = vcombine.low %v3067_v28, %v3071_v29 }
 0x3cf   :  { %4541 = vmatprep.subr.bf16.mxu0 %v5977_v20  ;;  %4623 = vmatprep.subr.bf16.mxu1 %v5979_v33  ;;  %v6034_v20 = vcombine.low %v3068_v30, %v3072_v31  ;;  %v6035_v33 = vcombine.high %v3068_v30, %v3072_v31  ;;  %v3115_v30 = vld [vmem:[#allocation8 + $0x540] sm:$0xff]  ;;  %v3116_v31 = vld [vmem:[#allocation8 + $0x548] sm:$0xff] }
 0x3d2   :  { %4542 = vmatpush1.bf16.msra.mxu0 %v5976_v39  ;;  %4624 = vmatpush1.bf16.msra.mxu1 %v5978_v38  ;;  %v3080_v39 = vld [vmem:[#allocation8 + $0x428] sm:$0xff]  ;;  %v6040_v38 = vcombine.low %v3075_v34, %v3079_v36 }
 0x3d3   :  { %4543 = vmatprep.subr.bf16.mxu0 %v5985_v40  ;;  %4625 = vmatprep.subr.bf16.mxu1 %v5987_v41  ;;  %v6042_v40 = vcombine.low %v3076_v35, %v3080_v39  ;;  %v6043_v41 = vcombine.high %v3076_v35, %v3080_v39  ;;  %v3123_v35 = vld [vmem:[#allocation8 + $0x580] sm:$0xff]  ;;  %v3124_v39 = vld [vmem:[#allocation8 + $0x588] sm:$0xff] }
 0x3d6   :  { %4544 = vmatpush1.bf16.msra.mxu0 %v5984_v46  ;;  %4626 = vmatpush1.bf16.msra.mxu1 %v5986_v47 }
 0x3d7   :  { %4545 = vmatprep.subr.bf16.mxu0 %v5993_v48  ;;  %4627 = vmatprep.subr.bf16.mxu1 %v5995_v49 }
 0x3da   :  { %4546 = vmatpush1.bf16.msra.mxu0 %v5992_v54  ;;  %4628 = vmatpush1.bf16.msra.mxu1 %v5994_v55  ;;  %v3087_v54 = vld [vmem:[#allocation8 + $0x460] sm:$0xff]  ;;  %v3084_v55 = vld [vmem:[#allocation8 + $0x448] sm:$0xff] }
 0x3db   :  { %4547 = vmatprep.subr.bf16.mxu0 %v6001_v56  ;;  %4629 = vmatprep.subr.bf16.mxu1 %v6003_v57  ;;  %v3088_v56 = vld [vmem:[#allocation8 + $0x468] sm:$0xff]  ;;  %v6049_v60 = vcombine.high %v3083_v50, %v3087_v54  ;;  %v6048_v4 = vcombine.low %v3083_v50, %v3087_v54  ;;  %v3143_v54 = vld [vmem:[#allocation8 + $0x620] sm:$0xff] }
 0x3dc   :  { %v6051_v61 = vcombine.high %v3084_v55, %v3088_v56  ;;  %v6050_v5 = vcombine.low %v3084_v55, %v3088_v56  ;;  %v3140_v55 = vld [vmem:[#allocation8 + $0x608] sm:$0xff] }
 0x3dd   :  { %v3144_v56 = vld [vmem:[#allocation8 + $0x628] sm:$0xff] }
 0x3de   :  { %4548 = vmatpush1.bf16.msra.mxu0 %v6000_v62  ;;  %4630 = vmatpush1.bf16.msra.mxu1 %v6002_v63  ;;  %v3095_v62 = vld [vmem:[#allocation8 + $0x4a0] sm:$0xff]  ;;  %v3092_v63 = vld [vmem:[#allocation8 + $0x488] sm:$0xff] }
 0x3df   :  { %4549 = vmatprep.subr.bf16.mxu0 %v6009_v0  ;;  %4631 = vmatprep.subr.bf16.mxu1 %v6011_v2  ;;  %v3096_v0 = vld [vmem:[#allocation8 + $0x4a8] sm:$0xff]  ;;  %v6057_v9 = vcombine.high %v3091_v59, %v3095_v62  ;;  %v6056_v17 = vcombine.low %v3091_v59, %v3095_v62  ;;  %v6107_v62 = vcombine.high %v3140_v55, %v3144_v56 }
 0x3e0   :  { %v6059_v12 = vcombine.high %v3092_v63, %v3096_v0  ;;  %v6058_v18 = vcombine.low %v3092_v63, %v3096_v0  ;;  %v3147_v63 = vld [vmem:[#allocation8 + $0x640] sm:$0xff] }
 0x3e1   :  { %v3151_v0 = vld [vmem:[#allocation8 + $0x660] sm:$0xff] }
 0x3e2   :  { %4550 = vmatpush1.bf16.msra.mxu0 %v6008_v13  ;;  %4632 = vmatpush1.bf16.msra.mxu1 %v6010_v14  ;;  %v3099_v13 = vld [vmem:[#allocation8 + $0x4c0] sm:$0xff] }
 0x3e3   :  { %4551 = vmatprep.subr.bf16.mxu0 %v6017_v15  ;;  %4633 = vmatprep.subr.bf16.mxu1 %v6019_v16  ;;  %v3103_v14 = vld [vmem:[#allocation8 + $0x4e0] sm:$0xff]  ;;  %v3100_v15 = vld [vmem:[#allocation8 + $0x4c8] sm:$0xff] }
 0x3e4   :  { %v3104_v16 = vld [vmem:[#allocation8 + $0x4e8] sm:$0xff]  ;;  %v6065_v19 = vcombine.high %v3099_v13, %v3103_v14 }
 0x3e5   :  { %v6067_v21 = vcombine.high %v3100_v15, %v3104_v16 }
 0x3e6   :  { %4552 = vmatpush1.bf16.msra.mxu0 %v6016_v22  ;;  %4634 = vmatpush1.bf16.msra.mxu1 %v6018_v24  ;;  %v3107_v22 = vld [vmem:[#allocation8 + $0x500] sm:$0xff] }
 0x3e7   :  { %4553 = vmatprep.subr.bf16.mxu0 %v6025_v25  ;;  %4635 = vmatprep.subr.bf16.mxu1 %v6027_v26  ;;  %v3111_v24 = vld [vmem:[#allocation8 + $0x520] sm:$0xff]  ;;  %v3108_v25 = vld [vmem:[#allocation8 + $0x508] sm:$0xff] }
 0x3e8   :  { %v3112_v26 = vld [vmem:[#allocation8 + $0x528] sm:$0xff]  ;;  %v6073_v28 = vcombine.high %v3107_v22, %v3111_v24 }
 0x3e9   :  { %v6075_v29 = vcombine.high %v3108_v25, %v3112_v26 }
 0x3ea   :  { %4554 = vmatpush1.bf16.msra.mxu0 %v6024_v3  ;;  %4636 = vmatpush1.bf16.msra.mxu1 %v6026_v27  ;;  %v6064_v3 = vcombine.low %v3099_v13, %v3103_v14  ;;  %v6066_v27 = vcombine.low %v3100_v15, %v3104_v16  ;;  %v6113_v13 = vcombine.high %v3147_v63, %v3151_v0  ;;  %v3155_v15 = vld [vmem:[#allocation8 + $0x680] sm:$0xff] }
 0x3eb   :  { %4555 = vmatprep.subr.bf16.mxu0 %v6033_v23  ;;  %4637 = vmatprep.subr.bf16.mxu1 %v6035_v33  ;;  %v3119_v23 = vld [vmem:[#allocation8 + $0x560] sm:$0xff]  ;;  %v6074_v33 = vcombine.low %v3108_v25, %v3112_v26 }
 0x3ec   :  { %v6081_v34 = vcombine.high %v3115_v30, %v3119_v23  ;;  %v3159_v16 = vld [vmem:[#allocation8 + $0x6a0] sm:$0xff] }
 0x3ed   :  { %v3163_v25 = vld [vmem:[#allocation8 + $0x6c0] sm:$0xff] }
 0x3ee   :  { %4556 = vmatpush1.bf16.msra.mxu0 %v6032_v32  ;;  %4638 = vmatpush1.bf16.msra.mxu1 %v6034_v20  ;;  %v3120_v32 = vld [vmem:[#allocation8 + $0x568] sm:$0xff]  ;;  %v6072_v20 = vcombine.low %v3107_v22, %v3111_v24  ;;  %v6121_v22 = vcombine.high %v3155_v15, %v3159_v16  ;;  %v3167_v26 = vld [vmem:[#allocation8 + $0x6e0] sm:$0xff] }
 0x3ef   :  { %4566 = vmatprep.subr.bf16.mxu0 %v6041_v37  ;;  %4648 = vmatprep.subr.bf16.mxu1 %v6043_v41  ;;  %v6083_v36 = vcombine.high %v3116_v31, %v3120_v32  ;;  %v3127_v37 = vld [vmem:[#allocation8 + $0x5a0] sm:$0xff]  ;;  %v6082_v41 = vcombine.low %v3116_v31, %v3120_v32 }
 0x3f0   :  { %v3171_v31 = vld [vmem:[#allocation8 + $0x700] sm:$0xff] }
 0x3f1   :  { %v3175_v32 = vld [vmem:[#allocation8 + $0x720] sm:$0xff] }
 0x484   :  { %v2891_v42 = vpop.f32.mrb[16].mxu0  ;;  %v7453_v43 = vpop.f32.mrb[16].mxu1 }
 0x485   :  { %v2939_v44 = vpack.c.bf16 %v2891_v42, %v2891_v42  ;;  %v2893_v45 = vpop.f32.mrb[17].mxu0  ;;  %v2934_v46 = vpop.f32.mrb[17].mxu1  ;;  %v6089_v42 = vcombine.high %v3123_v35, %v3127_v37 }
 0x486   :  { %v2940_v47 = vpack.c.bf16 %v2893_v45, %v2893_v45  ;;  %v2895_v48 = vpop.f32.mrb[18].mxu0  ;;  %v2936_v49 = vpop.f32.mrb[18].mxu1  ;;  %v2942_v51 = vpack.c.bf16 %v2934_v46, %v2934_v46  ;;  %v3131_v45 = vld [vmem:[#allocation8 + $0x5c0] sm:$0xff] }
 0x487   :  { %v2896_v52 = vpop.f32.mrb[19].mxu0  ;;  %v2937_v53 = vpop.f32.mrb[19].mxu1  ;;  %v7459_v58 = vmax.bf16 %v7069_v1, %v2939_v44  ;;  %v3135_v46 = vld [vmem:[#allocation8 + $0x5e0] sm:$0xff]  ;;  %v3136_v48 = vld [vmem:[#allocation8 + $0x5e8] sm:$0xff]  ;;  %v6088_v49 = vcombine.low %v3123_v35, %v3127_v37  ;;  %v6137_v35 = vcombine.high %v3171_v31, %v3175_v32 }
 0x488   :  { %v7456_v57 = vmax.bf16 %v7069_v1, %v2940_v47  ;;  %v7464_v2 = vmax.bf16 %v7069_v1, %v2942_v51  ;;  %v3132_v47 = vld [vmem:[#allocation8 + $0x5c8] sm:$0xff]  ;;  %v6097_v51 = vcombine.high %v3131_v45, %v3135_v46  ;;  %v3139_v53 = vld [vmem:[#allocation8 + $0x600] sm:$0xff]  ;;  %v6096_v59 = vcombine.low %v3131_v45, %v3135_v46 }
 0x489   :  { %v6099_v52 = vcombine.high %v3132_v47, %v3136_v48 }
 0x48a   :  { %4557 = vmatprep.mubr.bf16.mxu0 %v7456_v57  ;;  %4639 = vmatprep.mubr.bf16.mxu1 %v7456_v57 }
 0x48b   :  { %4558 = vmatmul.mubr.bf16.vlgmr.msra.gmra.mrb[20].mxu0 %v7459_v58  ;;  %4640 = vmatmul.mubr.bf16.vlgmr.msra.gmra.mrb[20].mxu1 %v7459_v58 }
 0x48c   :  { %4567 = vmatpush1.bf16.msra.mxu0 %v6040_v38  ;;  %4649 = vmatpush1.bf16.msra.mxu1 %v6042_v40  ;;  %v3128_v38 = vld [vmem:[#allocation8 + $0x5a8] sm:$0xff]  ;;  %v6080_v40 = vcombine.low %v3115_v30, %v3119_v23  ;;  %v6129_v30 = vcombine.high %v3163_v25, %v3167_v26 }
 0x48d   :  { %4598 = vmatprep.mubr.bf16.mxu0 %v7464_v2  ;;  %4680 = vmatprep.mubr.bf16.mxu1 %v7464_v2  ;;  %v6091_v44 = vcombine.high %v3124_v39, %v3128_v38  ;;  %v6090_v50 = vcombine.low %v3124_v39, %v3128_v38  ;;  %v3179_v39 = vld [vmem:[#allocation8 + $0x740] sm:$0xff] }
 0x48e   :  { %4568 = vmatprep.subr.bf16.mxu0 %v6049_v60  ;;  %4650 = vmatprep.subr.bf16.mxu1 %v6051_v61  ;;  %v6098_v60 = vcombine.low %v3132_v47, %v3136_v48  ;;  %v6105_v61 = vcombine.high %v3139_v53, %v3143_v54  ;;  %v3183_v38 = vld [vmem:[#allocation8 + $0x760] sm:$0xff] }
 0x48f   :  { %v6145_v45 = vcombine.high %v3179_v39, %v3183_v38  ;;  %v3187_v47 = vld [vmem:[#allocation8 + $0x780] sm:$0xff] }
 0x490   :  { %4569 = vmatpush1.bf16.msra.mxu0 %v6048_v4  ;;  %4651 = vmatpush1.bf16.msra.mxu1 %v6050_v5  ;;  %v3148_v4 = vld [vmem:[#allocation8 + $0x648] sm:$0xff]  ;;  %v3191_v48 = vld [vmem:[#allocation8 + $0x7a0] sm:$0xff] }
 0x491   :  { %4570 = vmatprep.subr.bf16.mxu0 %v6057_v9  ;;  %4652 = vmatprep.subr.bf16.mxu1 %v6059_v12  ;;  %v3152_v5 = vld [vmem:[#allocation8 + $0x668] sm:$0xff]  ;;  %v6104_v9 = vcombine.low %v3139_v53, %v3143_v54  ;;  %v6106_v12 = vcombine.low %v3140_v55, %v3144_v56  ;;  %v6153_v53 = vcombine.high %v3187_v47, %v3191_v48  ;;  %v3195_v55 = vld [vmem:[#allocation8 + $0x7c0] sm:$0xff] }
 0x492   :  { %v6115_v14 = vcombine.high %v3148_v4, %v3152_v5  ;;  %v3199_v56 = vld [vmem:[#allocation8 + $0x7e0] sm:$0xff] }
 0x494   :  { %4571 = vmatpush1.bf16.msra.mxu0 %v6056_v17  ;;  %4653 = vmatpush1.bf16.msra.mxu1 %v6058_v18  ;;  %v3156_v17 = vld [vmem:[#allocation8 + $0x688] sm:$0xff] }
 0x495   :  { %4572 = vmatprep.subr.bf16.mxu0 %v6065_v19  ;;  %4654 = vmatprep.subr.bf16.mxu1 %v6067_v21  ;;  %v3160_v18 = vld [vmem:[#allocation8 + $0x6a8] sm:$0xff]  ;;  %v6112_v19 = vcombine.low %v3147_v63, %v3151_v0  ;;  %v6114_v21 = vcombine.low %v3148_v4, %v3152_v5  ;;  %v6161_v63 = vcombine.high %v3195_v55, %v3199_v56  ;;  %v2949_v4 = vld [vmem:[#allocation8 + $0x10] sm:$0xff] }
 0x496   :  { %v6123_v24 = vcombine.high %v3156_v17, %v3160_v18  ;;  %v2953_v5 = vld [vmem:[#allocation8 + $0x30] sm:$0xff] }
 0x498   :  { %4573 = vmatpush1.bf16.msra.mxu0 %v6064_v3  ;;  %4655 = vmatpush1.bf16.msra.mxu1 %v6066_v27  ;;  %v3164_v3 = vld [vmem:[#allocation8 + $0x6c8] sm:$0xff] }
 0x499   :  { %4574 = vmatprep.subr.bf16.mxu0 %v6073_v28  ;;  %4656 = vmatprep.subr.bf16.mxu1 %v6075_v29  ;;  %v3168_v27 = vld [vmem:[#allocation8 + $0x6e8] sm:$0xff]  ;;  %v6120_v28 = vcombine.low %v3155_v15, %v3159_v16  ;;  %v6122_v29 = vcombine.low %v3156_v17, %v3160_v18  ;;  %v2941_v15 = vpack.c.bf16 %v7453_v43, %v7453_v43  ;;  %v2957_v18 = vld [vmem:[#allocation8 + $0x50] sm:$0xff] }
 0x49a   :  { %v6131_v23 = vcombine.high %v3164_v3, %v3168_v27  ;;  %v5917_v16 = vcombine.high %v2949_v4, %v2953_v5  ;;  %v2965_v43 = vld [vmem:[#allocation8 + $0x90] sm:$0xff] }
 0x49c   :  { %4575 = vmatpush1.bf16.msra.mxu0 %v6072_v20  ;;  %4657 = vmatpush1.bf16.msra.mxu1 %v6074_v33  ;;  %v3172_v20 = vld [vmem:[#allocation8 + $0x708] sm:$0xff] }
 0x49d   :  { %4576 = vmatprep.subr.bf16.mxu0 %v6081_v34  ;;  %4658 = vmatprep.subr.bf16.mxu1 %v6083_v36  ;;  %v3176_v33 = vld [vmem:[#allocation8 + $0x728] sm:$0xff]  ;;  %v6128_v34 = vcombine.low %v3163_v25, %v3167_v26  ;;  %v6130_v36 = vcombine.low %v3164_v3, %v3168_v27  ;;  %v7473_v25 = vmax.bf16 %v7069_v1, %v2941_v15 }
 0x49e   :  { %v6139_v37 = vcombine.high %v3172_v20, %v3176_v33 }
 0x4a0   :  { %4577 = vmatpush1.bf16.msra.mxu0 %v6080_v40  ;;  %4659 = vmatpush1.bf16.msra.mxu1 %v6082_v41  ;;  %v3180_v40 = vld [vmem:[#allocation8 + $0x748] sm:$0xff] }
 0x4a1   :  { %4578 = vmatprep.subr.bf16.mxu0 %v6089_v42  ;;  %4660 = vmatprep.subr.bf16.mxu1 %v6091_v44  ;;  %v3184_v41 = vld [vmem:[#allocation8 + $0x768] sm:$0xff]  ;;  %v6136_v42 = vcombine.low %v3171_v31, %v3175_v32  ;;  %v6138_v44 = vcombine.low %v3172_v20, %v3176_v33  ;;  %v2973_v33 = vld [vmem:[#allocation8 + $0xd0] sm:$0xff] }
 0x4a2   :  { %v6147_v46 = vcombine.high %v3180_v40, %v3184_v41 }
 0x4a4   :  { %4579 = vmatpush1.bf16.msra.mxu0 %v6088_v49  ;;  %4661 = vmatpush1.bf16.msra.mxu1 %v6090_v50  ;;  %v3188_v49 = vld [vmem:[#allocation8 + $0x788] sm:$0xff] }
 0x4a5   :  { %4580 = vmatprep.subr.bf16.mxu0 %v6097_v51  ;;  %4662 = vmatprep.subr.bf16.mxu1 %v6099_v52  ;;  %v3192_v50 = vld [vmem:[#allocation8 + $0x7a8] sm:$0xff]  ;;  %v6144_v51 = vcombine.low %v3179_v39, %v3183_v38  ;;  %v6146_v52 = vcombine.low %v3180_v40, %v3184_v41  ;;  %v2981_v41 = vld [vmem:[#allocation8 + $0x110] sm:$0xff] }
 0x4a6   :  { %v6155_v54 = vcombine.high %v3188_v49, %v3192_v50 }
 0x4a8   :  { %4581 = vmatpush1.bf16.msra.mxu0 %v6096_v59  ;;  %4663 = vmatpush1.bf16.msra.mxu1 %v6098_v60  ;;  %v3196_v59 = vld [vmem:[#allocation8 + $0x7c8] sm:$0xff] }
 0x4a9   :  { %4582 = vmatprep.subr.bf16.mxu0 %v6105_v61  ;;  %4664 = vmatprep.subr.bf16.mxu1 %v6107_v62  ;;  %v3200_v60 = vld [vmem:[#allocation8 + $0x7e8] sm:$0xff]  ;;  %v6152_v61 = vcombine.low %v3187_v47, %v3191_v48  ;;  %v6154_v62 = vcombine.low %v3188_v49, %v3192_v50  ;;  %v2989_v49 = vld [vmem:[#allocation8 + $0x150] sm:$0xff] }
 0x4aa   :  { %v6163_v0 = vcombine.high %v3196_v59, %v3200_v60  ;;  %v2993_v50 = vld [vmem:[#allocation8 + $0x170] sm:$0xff] }
 0x4ac   :  { %4583 = vmatpush1.bf16.msra.mxu0 %v6104_v9  ;;  %4665 = vmatpush1.bf16.msra.mxu1 %v6106_v12  ;;  %v2950_v9 = vld [vmem:[#allocation8 + $0x18] sm:$0xff] }
 0x4ad   :  { %4584 = vmatprep.subr.bf16.mxu0 %v6113_v13  ;;  %4666 = vmatprep.subr.bf16.mxu1 %v6115_v14  ;;  %v2954_v12 = vld [vmem:[#allocation8 + $0x38] sm:$0xff]  ;;  %v6160_v13 = vcombine.low %v3195_v55, %v3199_v56  ;;  %v6162_v14 = vcombine.low %v3196_v59, %v3200_v60  ;;  %v5957_v55 = vcombine.high %v2989_v49, %v2993_v50  ;;  %v2997_v59 = vld [vmem:[#allocation8 + $0x190] sm:$0xff] }
 0x4ae   :  { %v5919_v17 = vcombine.high %v2950_v9, %v2954_v12  ;;  %v5918_v26 = vcombine.low %v2950_v9, %v2954_v12  ;;  %v3001_v60 = vld [vmem:[#allocation8 + $0x1b0] sm:$0xff] }
 0x4af   :  { %v3005_v9 = vld [vmem:[#allocation8 + $0x1d0] sm:$0xff]  ;;  %v5964_v15 = vcombine.low %v2997_v59, %v3001_v60 }
 0x4b0   :  { %4585 = vmatpush1.bf16.msra.mxu0 %v6112_v19  ;;  %4667 = vmatpush1.bf16.msra.mxu1 %v6114_v21  ;;  %v2961_v19 = vld [vmem:[#allocation8 + $0x70] sm:$0xff]  ;;  %v2958_v21 = vld [vmem:[#allocation8 + $0x58] sm:$0xff] }
 0x4b1   :  { %4586 = vmatprep.subr.bf16.mxu0 %v6121_v22  ;;  %4668 = vmatprep.subr.bf16.mxu1 %v6123_v24  ;;  %v2962_v22 = vld [vmem:[#allocation8 + $0x78] sm:$0xff]  ;;  %v5916_v24 = vcombine.low %v2949_v4, %v2953_v5  ;;  %v5925_v3 = vcombine.high %v2957_v18, %v2961_v19  ;;  %v5965_v4 = vcombine.high %v2997_v59, %v3001_v60  ;;  %v3009_v12 = vld [vmem:[#allocation8 + $0x1f0] sm:$0xff] }
 0x4b2   :  { %v5927_v27 = vcombine.high %v2958_v21, %v2962_v22  ;;  %v5926_v31 = vcombine.low %v2958_v21, %v2962_v22  ;;  %v3017_v21 = vld [vmem:[#allocation8 + $0x230] sm:$0xff]  ;;  %v3014_v22 = vld [vmem:[#allocation8 + $0x218] sm:$0xff] }
 0x4b3   :  { %v3053_v60 = vld [vmem:[#allocation8 + $0x350] sm:$0xff] }
 0x4b4   :  { %4587 = vmatpush1.bf16.msra.mxu0 %v6120_v28  ;;  %4669 = vmatpush1.bf16.msra.mxu1 %v6122_v29  ;;  %v2969_v28 = vld [vmem:[#allocation8 + $0xb0] sm:$0xff]  ;;  %v2966_v29 = vld [vmem:[#allocation8 + $0x98] sm:$0xff] }
 0x4b5   :  { %4588 = vmatprep.subr.bf16.mxu0 %v6129_v30  ;;  %4670 = vmatprep.subr.bf16.mxu1 %v6131_v23  ;;  %v2970_v30 = vld [vmem:[#allocation8 + $0xb8] sm:$0xff]  ;;  %v5924_v23 = vcombine.low %v2957_v18, %v2961_v19  ;;  %v5933_v32 = vcombine.high %v2965_v43, %v2969_v28  ;;  %v3013_v19 = vld [vmem:[#allocation8 + $0x210] sm:$0xff] }
 0x4b6   :  { %v5935_v20 = vcombine.high %v2966_v29, %v2970_v30  ;;  %v5934_v39 = vcombine.low %v2966_v29, %v2970_v30  ;;  %v3025_v29 = vld [vmem:[#allocation8 + $0x270] sm:$0xff]  ;;  %v3022_v30 = vld [vmem:[#allocation8 + $0x258] sm:$0xff] }
 0x4b8   :  { %4589 = vmatpush1.bf16.msra.mxu0 %v6128_v34  ;;  %4671 = vmatpush1.bf16.msra.mxu1 %v6130_v36  ;;  %v2977_v34 = vld [vmem:[#allocation8 + $0xf0] sm:$0xff]  ;;  %v2974_v36 = vld [vmem:[#allocation8 + $0xd8] sm:$0xff] }
 0x4b9   :  { %4590 = vmatprep.subr.bf16.mxu0 %v6137_v35  ;;  %4672 = vmatprep.subr.bf16.mxu1 %v6139_v37  ;;  %v2978_v35 = vld [vmem:[#allocation8 + $0xf8] sm:$0xff]  ;;  %v5932_v37 = vcombine.low %v2965_v43, %v2969_v28  ;;  %v5941_v38 = vcombine.high %v2973_v33, %v2977_v34  ;;  %v3021_v28 = vld [vmem:[#allocation8 + $0x250] sm:$0xff] }
 0x4ba   :  { %v5943_v40 = vcombine.high %v2974_v36, %v2978_v35 }
 0x4bc   :  { %4591 = vmatpush1.bf16.msra.mxu0 %v6136_v42  ;;  %4673 = vmatpush1.bf16.msra.mxu1 %v6138_v44  ;;  %v2985_v42 = vld [vmem:[#allocation8 + $0x130] sm:$0xff]  ;;  %v2986_v44 = vld [vmem:[#allocation8 + $0x138] sm:$0xff] }
 0x4bd   :  { %4592 = vmatprep.subr.bf16.mxu0 %v6145_v45  ;;  %4674 = vmatprep.subr.bf16.mxu1 %v6147_v46  ;;  %v5940_v45 = vcombine.low %v2973_v33, %v2977_v34  ;;  %v5942_v46 = vcombine.low %v2974_v36, %v2978_v35  ;;  %v5949_v47 = vcombine.high %v2981_v41, %v2985_v42  ;;  %v3029_v34 = vld [vmem:[#allocation8 + $0x290] sm:$0xff]  ;;  %v3030_v35 = vld [vmem:[#allocation8 + $0x298] sm:$0xff] }
 0x4be   :  { %v3033_v36 = vld [vmem:[#allocation8 + $0x2b0] sm:$0xff] }
 0x4c0   :  { %4593 = vmatpush1.bf16.msra.mxu0 %v6144_v51  ;;  %4675 = vmatpush1.bf16.msra.mxu1 %v6146_v52  ;;  %v2990_v51 = vld [vmem:[#allocation8 + $0x158] sm:$0xff] }
 0x4c1   :  { %4594 = vmatprep.subr.bf16.mxu0 %v6153_v53  ;;  %4676 = vmatprep.subr.bf16.mxu1 %v6155_v54  ;;  %v2994_v52 = vld [vmem:[#allocation8 + $0x178] sm:$0xff]  ;;  %v5948_v53 = vcombine.low %v2981_v41, %v2985_v42  ;;  %v3037_v42 = vld [vmem:[#allocation8 + $0x2d0] sm:$0xff] }
 0x4c2   :  { %v5959_v56 = vcombine.high %v2990_v51, %v2994_v52 }
 0x4c4   :  { %4595 = vmatpush1.bf16.msra.mxu0 %v6152_v61  ;;  %4677 = vmatpush1.bf16.msra.mxu1 %v6154_v62  ;;  %v2998_v61 = vld [vmem:[#allocation8 + $0x198] sm:$0xff] }
 0x4c5   :  { %4596 = vmatprep.subr.bf16.mxu0 %v6161_v63  ;;  %4678 = vmatprep.subr.bf16.mxu1 %v6163_v0  ;;  %v3002_v62 = vld [vmem:[#allocation8 + $0x1b8] sm:$0xff]  ;;  %v5956_v63 = vcombine.low %v2989_v49, %v2993_v50  ;;  %v5958_v0 = vcombine.low %v2990_v51, %v2994_v52  ;;  %v3045_v50 = vld [vmem:[#allocation8 + $0x310] sm:$0xff] }
 0x4c6   :  { %v5967_v5 = vcombine.high %v2998_v61, %v3002_v62  ;;  %v3049_v51 = vld [vmem:[#allocation8 + $0x330] sm:$0xff]  ;;  %v3046_v52 = vld [vmem:[#allocation8 + $0x318] sm:$0xff] }
 0x4c8   :  { %4597 = vmatpush1.bf16.msra.mxu0 %v6160_v13  ;;  %4679 = vmatpush1.bf16.msra.mxu1 %v6162_v14  ;;  %v3006_v13 = vld [vmem:[#allocation8 + $0x1d8] sm:$0xff] }
 0x4c9   :  { %4689 = vmatprep.subr.bf16.mxu0 %v5917_v16  ;;  %4771 = vmatprep.subr.bf16.mxu1 %v5919_v17  ;;  %v3010_v14 = vld [vmem:[#allocation8 + $0x1f8] sm:$0xff]  ;;  %v5966_v16 = vcombine.low %v2998_v61, %v3002_v62  ;;  %v5973_v17 = vcombine.high %v3005_v9, %v3009_v12  ;;  %v3057_v61 = vld [vmem:[#allocation8 + $0x370] sm:$0xff] }
 0x4ca   :  { %v5975_v18 = vcombine.high %v3006_v13, %v3010_v14  ;;  %v3054_v62 = vld [vmem:[#allocation8 + $0x358] sm:$0xff] }
 0x4cb   :  { %4599 = vmatmul.mubr.bf16.vlgmr.msra.gmra.mrb[20].mxu0 %v7473_v25  ;;  %4681 = vmatmul.mubr.bf16.vlgmr.msra.gmra.mrb[20].mxu1 %v7473_v25 }
 0x4cc   :  { %4690 = vmatpush1.bf16.msra.mxu0 %v5916_v24  ;;  %4721 = vmatprep.mubr.bf16.mxu0 %v7456_v57  ;;  %v3018_v24 = vld [vmem:[#allocation8 + $0x238] sm:$0xff] }
 0x4cd   :  { %4772 = vmatpush1.bf16.msra.mxu1 %v5918_v26  ;;  %4803 = vmatprep.mubr.bf16.mxu1 %v7456_v57  ;;  %v2982_v57 = vld [vmem:[#allocation8 + $0x118] sm:$0xff]  ;;  %v5972_v26 = vcombine.low %v3005_v9, %v3009_v12  ;;  %v5983_v43 = vcombine.high %v3014_v22, %v3018_v24  ;;  %v3061_v12 = vld [vmem:[#allocation8 + $0x390] sm:$0xff] }
 0x4ce   :  { %4691 = vmatprep.subr.bf16.mxu0 %v5925_v3  ;;  %4773 = vmatprep.subr.bf16.mxu1 %v5927_v27  ;;  %v5951_v48 = vcombine.high %v2982_v57, %v2986_v44  ;;  %v5950_v54 = vcombine.low %v2982_v57, %v2986_v44  ;;  %v5974_v3 = vcombine.low %v3006_v13, %v3010_v14  ;;  %v3041_v57 = vld [vmem:[#allocation8 + $0x2f0] sm:$0xff]  ;;  %v3038_v44 = vld [vmem:[#allocation8 + $0x2d8] sm:$0xff] }
 0x4cf   :  { %v5981_v27 = vcombine.high %v3013_v19, %v3017_v21  ;;  %v3065_v13 = vld [vmem:[#allocation8 + $0x3b0] sm:$0xff]  ;;  %v3062_v14 = vld [vmem:[#allocation8 + $0x398] sm:$0xff] }
 0x4d0   :  { %4692 = vmatpush1.bf16.msra.mxu0 %v5924_v23  ;;  %v3026_v23 = vld [vmem:[#allocation8 + $0x278] sm:$0xff] }
 0x4d1   :  { %4774 = vmatpush1.bf16.msra.mxu1 %v5926_v31  ;;  %4693 = vmatprep.subr.bf16.mxu0 %v5933_v32  ;;  %v5980_v31 = vcombine.low %v3013_v19, %v3017_v21  ;;  %v5982_v32 = vcombine.low %v3014_v22, %v3018_v24  ;;  %v5991_v33 = vcombine.high %v3022_v30, %v3026_v23  ;;  %v3069_v21 = vld [vmem:[#allocation8 + $0x3d0] sm:$0xff]  ;;  %v3070_v24 = vld [vmem:[#allocation8 + $0x3d8] sm:$0xff] }
 0x4d2   :  { %4775 = vmatprep.subr.bf16.mxu1 %v5935_v20  ;;  %v5989_v20 = vcombine.high %v3021_v28, %v3025_v29  ;;  %v3073_v22 = vld [vmem:[#allocation8 + $0x3f0] sm:$0xff] }
 0x4d4   :  { %4694 = vmatpush1.bf16.msra.mxu0 %v5932_v37  ;;  %v3034_v37 = vld [vmem:[#allocation8 + $0x2b8] sm:$0xff] }
 0x4d5   :  { %4776 = vmatpush1.bf16.msra.mxu1 %v5934_v39  ;;  %4695 = vmatprep.subr.bf16.mxu0 %v5941_v38  ;;  %v5988_v39 = vcombine.low %v3021_v28, %v3025_v29  ;;  %v5990_v38 = vcombine.low %v3022_v30, %v3026_v23  ;;  %v5999_v41 = vcombine.high %v3030_v35, %v3034_v37  ;;  %v3077_v29 = vld [vmem:[#allocation8 + $0x410] sm:$0xff]  ;;  %v3078_v23 = vld [vmem:[#allocation8 + $0x418] sm:$0xff] }
 0x4d6   :  { %4777 = vmatprep.subr.bf16.mxu1 %v5943_v40  ;;  %v5997_v40 = vcombine.high %v3029_v34, %v3033_v36  ;;  %v3081_v30 = vld [vmem:[#allocation8 + $0x430] sm:$0xff] }
 0x4d8   :  { %4696 = vmatpush1.bf16.msra.mxu0 %v5940_v45  ;;  %v3042_v45 = vld [vmem:[#allocation8 + $0x2f8] sm:$0xff] }
 0x4d9   :  { %4778 = vmatpush1.bf16.msra.mxu1 %v5942_v46  ;;  %4697 = vmatprep.subr.bf16.mxu0 %v5949_v47  ;;  %v5996_v46 = vcombine.low %v3029_v34, %v3033_v36  ;;  %v5998_v47 = vcombine.low %v3030_v35, %v3034_v37  ;;  %v6007_v49 = vcombine.high %v3038_v44, %v3042_v45  ;;  %v3085_v36 = vld [vmem:[#allocation8 + $0x450] sm:$0xff] }
 0x4da   :  { %4779 = vmatprep.subr.bf16.mxu1 %v5951_v48  ;;  %v6005_v48 = vcombine.high %v3037_v42, %v3041_v57  ;;  %v3089_v35 = vld [vmem:[#allocation8 + $0x470] sm:$0xff]  ;;  %v6044_v37 = vcombine.low %v3077_v29, %v3081_v30 }
 0x4dc   :  { %4698 = vmatpush1.bf16.msra.mxu0 %v5948_v53  ;;  %v3050_v53 = vld [vmem:[#allocation8 + $0x338] sm:$0xff] }
 0x4dd   :  { %4780 = vmatpush1.bf16.msra.mxu1 %v5950_v54  ;;  %4699 = vmatprep.subr.bf16.mxu0 %v5957_v55  ;;  %v6004_v54 = vcombine.low %v3037_v42, %v3041_v57  ;;  %v6006_v55 = vcombine.low %v3038_v44, %v3042_v45  ;;  %v6015_v59 = vcombine.high %v3046_v52, %v3050_v53  ;;  %v3093_v42 = vld [vmem:[#allocation8 + $0x490] sm:$0xff]  ;;  %v3094_v45 = vld [vmem:[#allocation8 + $0x498] sm:$0xff] }
 0x4de   :  { %4781 = vmatprep.subr.bf16.mxu1 %v5959_v56  ;;  %v6013_v56 = vcombine.high %v3045_v50, %v3049_v51  ;;  %v3097_v57 = vld [vmem:[#allocation8 + $0x4b0] sm:$0xff] }
 0x4e0   :  { %4700 = vmatpush1.bf16.msra.mxu0 %v5956_v63  ;;  %v3058_v63 = vld [vmem:[#allocation8 + $0x378] sm:$0xff] }
 0x4e1   :  { %4782 = vmatpush1.bf16.msra.mxu1 %v5958_v0  ;;  %4701 = vmatprep.subr.bf16.mxu0 %v5965_v4  ;;  %v6012_v0 = vcombine.low %v3045_v50, %v3049_v51  ;;  %v6014_v4 = vcombine.low %v3046_v52, %v3050_v53  ;;  %v6023_v9 = vcombine.high %v3054_v62, %v3058_v63  ;;  %v3101_v51 = vld [vmem:[#allocation8 + $0x4d0] sm:$0xff]  ;;  %v3102_v53 = vld [vmem:[#allocation8 + $0x4d8] sm:$0xff] }
 0x4e2   :  { %4783 = vmatprep.subr.bf16.mxu1 %v5967_v5  ;;  %v6021_v5 = vcombine.high %v3053_v60, %v3057_v61  ;;  %v3105_v52 = vld [vmem:[#allocation8 + $0x4f0] sm:$0xff] }
 0x4e4   :  { %4702 = vmatpush1.bf16.msra.mxu0 %v5964_v15  ;;  %v3066_v15 = vld [vmem:[#allocation8 + $0x3b8] sm:$0xff] }
 0x4e5   :  { %4784 = vmatpush1.bf16.msra.mxu1 %v5966_v16  ;;  %4703 = vmatprep.subr.bf16.mxu0 %v5973_v17  ;;  %v6020_v16 = vcombine.low %v3053_v60, %v3057_v61  ;;  %v6022_v17 = vcombine.low %v3054_v62, %v3058_v63  ;;  %v6031_v19 = vcombine.high %v3062_v14, %v3066_v15  ;;  %v3109_v60 = vld [vmem:[#allocation8 + $0x510] sm:$0xff]  ;;  %v3110_v62 = vld [vmem:[#allocation8 + $0x518] sm:$0xff] }
 0x4e6   :  { %4785 = vmatprep.subr.bf16.mxu1 %v5975_v18  ;;  %v6029_v18 = vcombine.high %v3061_v12, %v3065_v13  ;;  %v3113_v61 = vld [vmem:[#allocation8 + $0x530] sm:$0xff]  ;;  %v3114_v63 = vld [vmem:[#allocation8 + $0x538] sm:$0xff] }
 0x4e8   :  { %4704 = vmatpush1.bf16.msra.mxu0 %v5972_v26  ;;  %v3074_v26 = vld [vmem:[#allocation8 + $0x3f8] sm:$0xff] }
 0x4e9   :  { %4786 = vmatpush1.bf16.msra.mxu1 %v5974_v3  ;;  %4705 = vmatprep.subr.bf16.mxu0 %v5981_v27  ;;  %v6028_v3 = vcombine.low %v3061_v12, %v3065_v13  ;;  %v6030_v27 = vcombine.low %v3062_v14, %v3066_v15  ;;  %v6039_v28 = vcombine.high %v3070_v24, %v3074_v26  ;;  %v3121_v12 = vld [vmem:[#allocation8 + $0x570] sm:$0xff]  ;;  %v3118_v13 = vld [vmem:[#allocation8 + $0x558] sm:$0xff] }
 0x4ea   :  { %4787 = vmatprep.subr.bf16.mxu1 %v5983_v43  ;;  %v6037_v43 = vcombine.high %v3069_v21, %v3073_v22  ;;  %v3122_v14 = vld [vmem:[#allocation8 + $0x578] sm:$0xff]  ;;  %v6076_v15 = vcombine.low %v3109_v60, %v3113_v61 }
 0x4ec   :  { %4706 = vmatpush1.bf16.msra.mxu0 %v5980_v31  ;;  %v3082_v31 = vld [vmem:[#allocation8 + $0x438] sm:$0xff] }
 0x4ed   :  { %4788 = vmatpush1.bf16.msra.mxu1 %v5982_v32  ;;  %4707 = vmatprep.subr.bf16.mxu0 %v5989_v20  ;;  %v6036_v32 = vcombine.low %v3069_v21, %v3073_v22  ;;  %v6038_v20 = vcombine.low %v3070_v24, %v3074_v26  ;;  %v6047_v34 = vcombine.high %v3078_v23, %v3082_v31  ;;  %v3129_v21 = vld [vmem:[#allocation8 + $0x5b0] sm:$0xff]  ;;  %v3126_v22 = vld [vmem:[#allocation8 + $0x598] sm:$0xff] }
 0x4ee   :  { %4789 = vmatprep.subr.bf16.mxu1 %v5991_v33  ;;  %v6045_v33 = vcombine.high %v3077_v29, %v3081_v30  ;;  %v3130_v24 = vld [vmem:[#allocation8 + $0x5b8] sm:$0xff]  ;;  %v3137_v29 = vld [vmem:[#allocation8 + $0x5f0] sm:$0xff] }
 0x4ef   :  { %v3134_v30 = vld [vmem:[#allocation8 + $0x5d8] sm:$0xff] }
 0x4f0   :  { %4708 = vmatpush1.bf16.msra.mxu0 %v5988_v39  ;;  %v3086_v39 = vld [vmem:[#allocation8 + $0x458] sm:$0xff] }
 0x4f1   :  { %4790 = vmatpush1.bf16.msra.mxu1 %v5990_v38  ;;  %4709 = vmatprep.subr.bf16.mxu0 %v5997_v40  ;;  %v3090_v38 = vld [vmem:[#allocation8 + $0x478] sm:$0xff]  ;;  %v6046_v40 = vcombine.low %v3078_v23, %v3082_v31 }
 0x4f2   :  { %4791 = vmatprep.subr.bf16.mxu1 %v5999_v41  ;;  %v6053_v41 = vcombine.high %v3085_v36, %v3089_v35  ;;  %v6055_v44 = vcombine.high %v3086_v39, %v3090_v38  ;;  %v3138_v23 = vld [vmem:[#allocation8 + $0x5f8] sm:$0xff] }
 0x4f4   :  { %4710 = vmatpush1.bf16.msra.mxu0 %v5996_v46  ;;  %v3098_v46 = vld [vmem:[#allocation8 + $0x4b8] sm:$0xff] }
 0x4f5   :  { %4792 = vmatpush1.bf16.msra.mxu1 %v5998_v47  ;;  %4711 = vmatprep.subr.bf16.mxu0 %v6005_v48  ;;  %v6052_v47 = vcombine.low %v3085_v36, %v3089_v35  ;;  %v6054_v48 = vcombine.low %v3086_v39, %v3090_v38  ;;  %v6063_v50 = vcombine.high %v3094_v45, %v3098_v46  ;;  %v3145_v36 = vld [vmem:[#allocation8 + $0x630] sm:$0xff]  ;;  %v3142_v35 = vld [vmem:[#allocation8 + $0x618] sm:$0xff] }
 0x4f6   :  { %4793 = vmatprep.subr.bf16.mxu1 %v6007_v49  ;;  %v6061_v49 = vcombine.high %v3093_v42, %v3097_v57  ;;  %v6102_v38 = vcombine.low %v3134_v30, %v3138_v23 }
 0x4f8   :  { %4712 = vmatpush1.bf16.msra.mxu0 %v6004_v54  ;;  %v3106_v54 = vld [vmem:[#allocation8 + $0x4f8] sm:$0xff] }
 0x4f9   :  { %4794 = vmatpush1.bf16.msra.mxu1 %v6006_v55  ;;  %4713 = vmatprep.subr.bf16.mxu0 %v6013_v56  ;;  %v6060_v55 = vcombine.low %v3093_v42, %v3097_v57  ;;  %v6069_v56 = vcombine.high %v3101_v51, %v3105_v52  ;;  %v3149_v42 = vld [vmem:[#allocation8 + $0x650] sm:$0xff] }
 0x4fa   :  { %4795 = vmatprep.subr.bf16.mxu1 %v6015_v59  ;;  %v6071_v59 = vcombine.high %v3102_v53, %v3106_v54  ;;  %v3153_v57 = vld [vmem:[#allocation8 + $0x670] sm:$0xff] }
 0x4fc   :  { %4714 = vmatpush1.bf16.msra.mxu0 %v6012_v0  ;;  %v6070_v0 = vcombine.low %v3102_v53, %v3106_v54  ;;  %v3162_v53 = vld [vmem:[#allocation8 + $0x6b8] sm:$0xff]  ;;  %v6116_v54 = vcombine.low %v3149_v42, %v3153_v57 }
 0x4fd   :  { %4796 = vmatpush1.bf16.msra.mxu1 %v6014_v4  ;;  %4715 = vmatprep.subr.bf16.mxu0 %v6021_v5  ;;  %v6077_v4 = vcombine.high %v3109_v60, %v3113_v61  ;;  %v6079_v5 = vcombine.high %v3110_v62, %v3114_v63  ;;  %v3169_v60 = vld [vmem:[#allocation8 + $0x6f0] sm:$0xff]  ;;  %v3166_v61 = vld [vmem:[#allocation8 + $0x6d8] sm:$0xff] }
 0x4fe   :  { %4797 = vmatprep.subr.bf16.mxu1 %v6023_v9  ;;  %v3117_v9 = vld [vmem:[#allocation8 + $0x550] sm:$0xff] }
 0x4ff   :  { %v6084_v26 = vcombine.low %v3117_v9, %v3121_v12 }
 0x500   :  { %4716 = vmatpush1.bf16.msra.mxu0 %v6020_v16  ;;  %v6078_v16 = vcombine.low %v3110_v62, %v3114_v63  ;;  %v3170_v62 = vld [vmem:[#allocation8 + $0x6f8] sm:$0xff] }
 0x501   :  { %4798 = vmatpush1.bf16.msra.mxu1 %v6022_v17  ;;  %4717 = vmatprep.subr.bf16.mxu0 %v6029_v18  ;;  %v6085_v17 = vcombine.high %v3117_v9, %v3121_v12  ;;  %v6087_v18 = vcombine.high %v3118_v13, %v3122_v14  ;;  %v3177_v9 = vld [vmem:[#allocation8 + $0x730] sm:$0xff]  ;;  %v3174_v12 = vld [vmem:[#allocation8 + $0x718] sm:$0xff] }
 0x502   :  { %4799 = vmatprep.subr.bf16.mxu1 %v6031_v19  ;;  %v3125_v19 = vld [vmem:[#allocation8 + $0x590] sm:$0xff] }
 0x503   :  { %v6092_v31 = vcombine.low %v3125_v19, %v3129_v21 }
 0x504   :  { %4718 = vmatpush1.bf16.msra.mxu0 %v6028_v3  ;;  %v6086_v3 = vcombine.low %v3118_v13, %v3122_v14  ;;  %v3178_v13 = vld [vmem:[#allocation8 + $0x738] sm:$0xff] }
 0x505   :  { %4800 = vmatpush1.bf16.msra.mxu1 %v6030_v27  ;;  %4719 = vmatprep.subr.bf16.mxu0 %v6037_v43  ;;  %v6093_v27 = vcombine.high %v3125_v19, %v3129_v21  ;;  %v6095_v43 = vcombine.high %v3126_v22, %v3130_v24  ;;  %v3185_v19 = vld [vmem:[#allocation8 + $0x770] sm:$0xff]  ;;  %v3182_v21 = vld [vmem:[#allocation8 + $0x758] sm:$0xff] }
 0x506   :  { %4801 = vmatprep.subr.bf16.mxu1 %v6039_v28  ;;  %v3133_v28 = vld [vmem:[#allocation8 + $0x5d0] sm:$0xff] }
 0x507   :  { %v6100_v39 = vcombine.low %v3133_v28, %v3137_v29 }
 0x508   :  { %4720 = vmatpush1.bf16.msra.mxu0 %v6036_v32  ;;  %v6094_v32 = vcombine.low %v3126_v22, %v3130_v24  ;;  %v3186_v22 = vld [vmem:[#allocation8 + $0x778] sm:$0xff] }
 0x509   :  { %4802 = vmatpush1.bf16.msra.mxu1 %v6038_v20  ;;  %4730 = vmatprep.subr.bf16.mxu0 %v6045_v33  ;;  %v6101_v20 = vcombine.high %v3133_v28, %v3137_v29  ;;  %v6103_v33 = vcombine.high %v3134_v30, %v3138_v23  ;;  %v3193_v28 = vld [vmem:[#allocation8 + $0x7b0] sm:$0xff]  ;;  %v3190_v29 = vld [vmem:[#allocation8 + $0x798] sm:$0xff] }
 0x50a   :  { %4812 = vmatprep.subr.bf16.mxu1 %v6047_v34  ;;  %v3141_v34 = vld [vmem:[#allocation8 + $0x610] sm:$0xff]  ;;  %v3194_v30 = vld [vmem:[#allocation8 + $0x7b8] sm:$0xff] }
 0x50b   :  { %4722 = vmatmul.mubr.bf16.vlgmr.msra.gmra.mrb[24].mxu0 %v7459_v58 }
 0x50c   :  { %4804 = vmatmul.mubr.bf16.vlgmr.msra.gmra.mrb[24].mxu1 %v7459_v58  ;;  %4731 = vmatpush1.bf16.msra.mxu0 %v6044_v37  ;;  %v6062_v58 = vcombine.low %v3094_v45, %v3098_v46  ;;  %v3146_v37 = vld [vmem:[#allocation8 + $0x638] sm:$0xff]  ;;  %v6108_v46 = vcombine.low %v3141_v34, %v3145_v36 }
 0x50d   :  { %4762 = vmatprep.mubr.bf16.mxu0 %v7464_v2  ;;  %4813 = vmatpush1.bf16.msra.mxu1 %v6046_v40  ;;  %v6109_v40 = vcombine.high %v3141_v34, %v3145_v36  ;;  %v3154_v45 = vld [vmem:[#allocation8 + $0x678] sm:$0xff]  ;;  %v3201_v34 = vld [vmem:[#allocation8 + $0x7f0] sm:$0xff] }
 0x50e   :  { %4844 = vmatprep.mubr.bf16.mxu1 %v7464_v2  ;;  %4732 = vmatprep.subr.bf16.mxu0 %v6053_v41  ;;  %v6068_v2 = vcombine.low %v3101_v51, %v3105_v52  ;;  %v6111_v41 = vcombine.high %v3142_v35, %v3146_v37  ;;  %v3161_v51 = vld [vmem:[#allocation8 + $0x6b0] sm:$0xff]  ;;  %v3158_v52 = vld [vmem:[#allocation8 + $0x698] sm:$0xff] }
 0x50f   :  { %4814 = vmatprep.subr.bf16.mxu1 %v6055_v44  ;;  %v3150_v44 = vld [vmem:[#allocation8 + $0x658] sm:$0xff] }
 0x510   :  { %4733 = vmatpush1.bf16.msra.mxu0 %v6052_v47  ;;  %v6110_v47 = vcombine.low %v3142_v35, %v3146_v37  ;;  %v3198_v36 = vld [vmem:[#allocation8 + $0x7d8] sm:$0xff] }
 0x511   :  { %4815 = vmatpush1.bf16.msra.mxu1 %v6054_v48  ;;  %4734 = vmatprep.subr.bf16.mxu0 %v6061_v49  ;;  %v6117_v48 = vcombine.high %v3149_v42, %v3153_v57  ;;  %v6119_v49 = vcombine.high %v3150_v44, %v3154_v45  ;;  %v3202_v35 = vld [vmem:[#allocation8 + $0x7f8] sm:$0xff] }
 0x512   :  { %4816 = vmatprep.subr.bf16.mxu1 %v6063_v50  ;;  %v3157_v50 = vld [vmem:[#allocation8 + $0x690] sm:$0xff]  ;;  %v6166_v42 = vcombine.low %v3198_v36, %v3202_v35  ;;  %v6899_v57 = vld [vmem:[%s7722_s9 + $0x40] sm:$0xff]  }
 0x513   :  { %v6124_v63 = vcombine.low %v3157_v50, %v3161_v51 }
 0x514   :  { %4735 = vmatpush1.bf16.msra.mxu0 %v6060_v55  ;;  %v6118_v55 = vcombine.low %v3150_v44, %v3154_v45  ;;  %v6900_v44 = vld [vmem:[%s7722_s9 + $0xc0] sm:$0xff]  }
 0x515   :  { %4817 = vmatpush1.bf16.msra.mxu1 %v6062_v58  ;;  %4736 = vmatprep.subr.bf16.mxu0 %v6069_v56  ;;  %v6125_v58 = vcombine.high %v3157_v50, %v3161_v51  ;;  %v6127_v56 = vcombine.high %v3158_v52, %v3162_v53  ;;  %v6901_v45 = vld [vmem:[%s7722_s9] sm:$0xff]   ;;  %v6906_v50 = vld [vmem:[%s7722_s9 + $0x88] sm:$0xff]   ;;  %v6907_v51 = vld [vmem:[%s7722_s9 + $0x50] sm:$0xff]  }
 0x516   :  { %4818 = vmatprep.subr.bf16.mxu1 %v6071_v59  ;;  %v3165_v59 = vld [vmem:[#allocation8 + $0x6d0] sm:$0xff] }
 0x517   :  { %v6132_v14 = vcombine.low %v3165_v59, %v3169_v60 }
 0x518   :  { %4737 = vmatpush1.bf16.msra.mxu0 %v6068_v2  ;;  %v6126_v2 = vcombine.low %v3158_v52, %v3162_v53  ;;  %v6909_v52 = vld [vmem:[%s7722_s9 + $0x10] sm:$0xff]  }
 0x519   :  { %4819 = vmatpush1.bf16.msra.mxu1 %v6070_v0  ;;  %4738 = vmatprep.subr.bf16.mxu0 %v6077_v4  ;;  %v6133_v0 = vcombine.high %v3165_v59, %v3169_v60  ;;  %v6135_v4 = vcombine.high %v3166_v61, %v3170_v62  ;;  %v6910_v53 = vld [vmem:[%s7722_s9 + $0x90] sm:$0xff]   ;;  %v6915_v59 = vld [vmem:[%s7722_s9 + $0x60] sm:$0xff]  }
 0x51a   :  { %4820 = vmatprep.subr.bf16.mxu1 %v6079_v5  ;;  %v3173_v5 = vld [vmem:[#allocation8 + $0x710] sm:$0xff]  ;;  %v6916_v60 = vld [vmem:[%s7722_s9 + $0xe0] sm:$0xff]  }
 0x51b   :  { %v6140_v24 = vcombine.low %v3173_v5, %v3177_v9 }
 0x51c   :  { %4739 = vmatpush1.bf16.msra.mxu0 %v6076_v15  ;;  %v6134_v15 = vcombine.low %v3166_v61, %v3170_v62  ;;  %v6917_v61 = vld [vmem:[%s7722_s9 + $0x20] sm:$0xff]  }
 0x51d   :  { %4821 = vmatpush1.bf16.msra.mxu1 %v6078_v16  ;;  %4740 = vmatprep.subr.bf16.mxu0 %v6085_v17  ;;  %v6141_v16 = vcombine.high %v3173_v5, %v3177_v9  ;;  %v6143_v17 = vcombine.high %v3174_v12, %v3178_v13  ;;  %v6918_v62 = vld [vmem:[%s7722_s9 + $0xa0] sm:$0xff]   ;;  %v6923_v5 = vld [vmem:[%s7722_s9 + $0x70] sm:$0xff]  }
 0x51e   :  { %4822 = vmatprep.subr.bf16.mxu1 %v6087_v18  ;;  %v3181_v18 = vld [vmem:[#allocation8 + $0x750] sm:$0xff] }
 0x51f   :  { %v6148_v23 = vcombine.low %v3181_v18, %v3185_v19  ;;  %v6924_v9 = vld [vmem:[%s7722_s9 + $0xf0] sm:$0xff]  }
 0x520   :  { %4741 = vmatpush1.bf16.msra.mxu0 %v6084_v26  ;;  %v6142_v26 = vcombine.low %v3174_v12, %v3178_v13  ;;  %v6925_v12 = vld [vmem:[%s7722_s9 + $0x30] sm:$0xff]  }
 0x521   :  { %4823 = vmatpush1.bf16.msra.mxu1 %v6086_v3  ;;  %4742 = vmatprep.subr.bf16.mxu0 %v6093_v27  ;;  %v6149_v3 = vcombine.high %v3181_v18, %v3185_v19  ;;  %v6151_v27 = vcombine.high %v3182_v21, %v3186_v22  ;;  %v6926_v13 = vld [vmem:[%s7722_s9 + $0xb0] sm:$0xff]   ;;  %v6931_v18 = vld [vmem:[%s7722_s9 + $0x140] sm:$0xff]  }
 0x522   :  { %4824 = vmatprep.subr.bf16.mxu1 %v6095_v43  ;;  %v3189_v43 = vld [vmem:[#allocation8 + $0x790] sm:$0xff]  ;;  %v6932_v19 = vld [vmem:[%s7722_s9 + $0x1c0] sm:$0xff]  }
 0x523   :  { %v6156_v37 = vcombine.low %v3189_v43, %v3193_v28 }
 0x524   :  { %4743 = vmatpush1.bf16.msra.mxu0 %v6092_v31  ;;  %v6150_v31 = vcombine.low %v3182_v21, %v3186_v22  ;;  %v7590_v21 = vld [vmem:[%s7721_s8] sm:$0xff] }
 0x525   :  { %4825 = vmatpush1.bf16.msra.mxu1 %v6094_v32  ;;  %4744 = vmatprep.subr.bf16.mxu0 %v6101_v20  ;;  %v6157_v32 = vcombine.high %v3189_v43, %v3193_v28  ;;  %v6159_v20 = vcombine.high %v3190_v29, %v3194_v30  ;;  %v3208_v22 = vrot.slane %v7590_v21, %v686_v7 }
 0x526   :  { %4826 = vmatprep.subr.bf16.mxu1 %v6103_v33  ;;  %v3197_v33 = vld [vmem:[#allocation8 + $0x7d0] sm:$0xff] }
 0x528   :  { %4745 = vmatpush1.bf16.msra.mxu0 %v6100_v39  ;;  %v6158_v39 = vcombine.low %v3190_v29, %v3194_v30 }
 0x529   :  { %4827 = vmatpush1.bf16.msra.mxu1 %v6102_v38  ;;  %4746 = vmatprep.subr.bf16.mxu0 %v6109_v40  ;;  %v6165_v38 = vcombine.high %v3197_v33, %v3201_v34  ;;  %v6167_v40 = vcombine.high %v3198_v36, %v3202_v35 }
 0x52a   :  { %4828 = vmatprep.subr.bf16.mxu1 %v6111_v41  ;;  %v6164_v41 = vcombine.low %v3197_v33, %v3201_v34 }
 0x52c   :  { %4747 = vmatpush1.bf16.msra.mxu0 %v6108_v46  ;;  %v6902_v46 = vld [vmem:[%s7722_s9 + $0x80] sm:$0xff]  }
 0x52d   :  { %4829 = vmatpush1.bf16.msra.mxu1 %v6110_v47  ;;  %4748 = vmatprep.subr.bf16.mxu0 %v6117_v48  ;;  %v6903_v47 = vld [vmem:[%s7722_s9 + $0x48] sm:$0xff]  }
 0x52e   :  { %4830 = vmatprep.subr.bf16.mxu1 %v6119_v49  ;;  %v6904_v48 = vld [vmem:[%s7722_s9 + $0xc8] sm:$0xff]  }
 0x52f   :  { %v6905_v49 = vld [vmem:[%s7722_s9 + $0x8] sm:$0xff]  }
 0x530   :  { %4749 = vmatpush1.bf16.msra.mxu0 %v6116_v54  ;;  %v6911_v54 = vld [vmem:[%s7722_s9 + $0x58] sm:$0xff]  }
 0x531   :  { %4831 = vmatpush1.bf16.msra.mxu1 %v6118_v55  ;;  %4750 = vmatprep.subr.bf16.mxu0 %v6125_v58  ;;  %v6912_v55 = vld [vmem:[%s7722_s9 + $0xd8] sm:$0xff]  }
 0x532   :  { %4832 = vmatprep.subr.bf16.mxu1 %v6127_v56  ;;  %v6913_v58 = vld [vmem:[%s7722_s9 + $0x18] sm:$0xff]  }
 0x533   :  { %v6914_v56 = vld [vmem:[%s7722_s9 + $0x98] sm:$0xff]  }
 0x534   :  { %4751 = vmatpush1.bf16.msra.mxu0 %v6124_v63  ;;  %v6919_v63 = vld [vmem:[%s7722_s9 + $0x68] sm:$0xff]  }
 0x535   :  { %4833 = vmatpush1.bf16.msra.mxu1 %v6126_v2  ;;  %4752 = vmatprep.subr.bf16.mxu0 %v6133_v0  ;;  %v6920_v2 = vld [vmem:[%s7722_s9 + $0xe8] sm:$0xff]  }
 0x536   :  { %4834 = vmatprep.subr.bf16.mxu1 %v6135_v4  ;;  %v6921_v0 = vld [vmem:[%s7722_s9 + $0x28] sm:$0xff]  }
 0x537   :  { %v6922_v4 = vld [vmem:[%s7722_s9 + $0xa8] sm:$0xff]  }
 0x538   :  { %4753 = vmatpush1.bf16.msra.mxu0 %v6132_v14  ;;  %v6927_v14 = vld [vmem:[%s7722_s9 + $0x78] sm:$0xff]  }
 0x539   :  { %4835 = vmatpush1.bf16.msra.mxu1 %v6134_v15  ;;  %4754 = vmatprep.subr.bf16.mxu0 %v6141_v16  ;;  %v6928_v15 = vld [vmem:[%s7722_s9 + $0xf8] sm:$0xff]  }
 0x53a   :  { %4836 = vmatprep.subr.bf16.mxu1 %v6143_v17  ;;  %v6929_v16 = vld [vmem:[%s7722_s9 + $0x38] sm:$0xff]  }
 0x53b   :  { %v6930_v17 = vld [vmem:[%s7722_s9 + $0xb8] sm:$0xff]  }
 0x53c   :  { %4755 = vmatpush1.bf16.msra.mxu0 %v6140_v24  ;;  %v3216_v24 = vrot.slane %v7590_v21, %v694_v8 }
 0x53d   :  { %4837 = vmatpush1.bf16.msra.mxu1 %v6142_v26  ;;  %4756 = vmatprep.subr.bf16.mxu0 %v6149_v3  ;;  %v3212_v26 = vrot.slane %v7590_v21, %v690_v10  ;;  %v3220_v3 = vrot.slane %v7590_v21, %v698_v11 }
 0x53e   :  { %4838 = vmatprep.subr.bf16.mxu1 %v6151_v27 }
 0x540   :  { %4757 = vmatpush1.bf16.msra.mxu0 %v6148_v23 }
 0x541   :  { %4839 = vmatpush1.bf16.msra.mxu1 %v6150_v31  ;;  %4758 = vmatprep.subr.bf16.mxu0 %v6157_v32 }
 0x542   :  { %4840 = vmatprep.subr.bf16.mxu1 %v6159_v20 }
 0x544   :  { %4759 = vmatpush1.bf16.msra.mxu0 %v6156_v37 }
 0x545   :  { %4841 = vmatpush1.bf16.msra.mxu1 %v6158_v39  ;;  %4760 = vmatprep.subr.bf16.mxu0 %v6165_v38  ;;  %v6933_v39 = vld [vmem:[%s7722_s9 + $0x100] sm:$0xff]  }
 0x546   :  { %4842 = vmatprep.subr.bf16.mxu1 %v6167_v40  ;;  %v6934_v38 = vld [vmem:[%s7722_s9 + $0x180] sm:$0xff]  }
 0x548   :  { %4761 = vmatpush1.bf16.msra.mxu0 %v6164_v41 }
 0x549   :  { %4843 = vmatpush1.bf16.msra.mxu1 %v6166_v42  ;;  %6278 = vmatprep.subr.bf16.mxu0 %v6899_v57  ;;  %v6935_v42 = vld [vmem:[%s7722_s9 + $0x148] sm:$0xff]  }
 0x54a   :  { %6300 = vmatprep.subr.bf16.mxu1 %v6900_v44  ;;  %v6936_v57 = vld [vmem:[%s7722_s9 + $0x1c8] sm:$0xff]  }
 0x54b   :  { %4763 = vmatmul.mubr.bf16.vlgmr.msra.gmra.mrb[24].mxu0 %v7473_v25  ;;  %v6937_v44 = vld [vmem:[%s7722_s9 + $0x108] sm:$0xff]  }
 0x54c   :  { %4845 = vmatmul.mubr.bf16.vlgmr.msra.gmra.mrb[24].mxu1 %v7473_v25  ;;  %6279 = vmatpush3.bf16.msra.mxu0 %v6901_v45  ;;  %v6908_v25 = vld [vmem:[%s7722_s9 + $0xd0] sm:$0xff]   ;;  %v6938_v45 = vld [vmem:[%s7722_s9 + $0x188] sm:$0xff]  }
 0x54d   :  { %6301 = vmatpush3.bf16.msra.mxu1 %v6902_v46  ;;  %6280 = vmatprep.subr.bf16.mxu0 %v6903_v47  ;;  %v6939_v46 = vld [vmem:[%s7722_s9 + $0x150] sm:$0xff]  }
 0x54e   :  { %6302 = vmatprep.subr.bf16.mxu1 %v6904_v48  ;;  %v6940_v47 = vld [vmem:[%s7722_s9 + $0x1d0] sm:$0xff]  }
 0x54f   :  { %v6941_v48 = vld [vmem:[%s7722_s9 + $0x110] sm:$0xff]  }
 0x550   :  { %6281 = vmatpush3.bf16.msra.mxu0 %v6905_v49  ;;  %v6942_v49 = vld [vmem:[%s7722_s9 + $0x190] sm:$0xff]  }
 0x551   :  { %6303 = vmatpush3.bf16.msra.mxu1 %v6906_v50  ;;  %6282 = vmatprep.subr.bf16.mxu0 %v6907_v51  ;;  %v6943_v50 = vld [vmem:[%s7722_s9 + $0x158] sm:$0xff]  }
 0x552   :  { %6304 = vmatprep.subr.bf16.mxu1 %v6908_v25  ;;  %v6944_v51 = vld [vmem:[%s7722_s9 + $0x1d8] sm:$0xff]  }
 0x553   :  { %v6945_v25 = vld [vmem:[%s7722_s9 + $0x118] sm:$0xff]  }
 0x554   :  { %6283 = vmatpush3.bf16.msra.mxu0 %v6909_v52  ;;  %v6946_v52 = vld [vmem:[%s7722_s9 + $0x198] sm:$0xff]  }
 0x555   :  { %6305 = vmatpush3.bf16.msra.mxu1 %v6910_v53  ;;  %6284 = vmatprep.subr.bf16.mxu0 %v6911_v54  ;;  %v6947_v53 = vld [vmem:[%s7722_s9 + $0x160] sm:$0xff]  }
 0x556   :  { %6306 = vmatprep.subr.bf16.mxu1 %v6912_v55  ;;  %v6948_v54 = vld [vmem:[%s7722_s9 + $0x1e0] sm:$0xff]  }
 0x557   :  { %v6949_v55 = vld [vmem:[%s7722_s9 + $0x120] sm:$0xff]  }
 0x558   :  { %6285 = vmatpush3.bf16.msra.mxu0 %v6913_v58  ;;  %v6950_v58 = vld [vmem:[%s7722_s9 + $0x1a0] sm:$0xff]  }
 0x559   :  { %6307 = vmatpush3.bf16.msra.mxu1 %v6914_v56  ;;  %6286 = vmatprep.subr.bf16.mxu0 %v6915_v59  ;;  %v6951_v56 = vld [vmem:[%s7722_s9 + $0x168] sm:$0xff]  }
 0x55a   :  { %6308 = vmatprep.subr.bf16.mxu1 %v6916_v60  ;;  %v6952_v59 = vld [vmem:[%s7722_s9 + $0x1e8] sm:$0xff]  }
 0x55b   :  { %v6953_v60 = vld [vmem:[%s7722_s9 + $0x128] sm:$0xff]  }
 0x55c   :  { %6287 = vmatpush3.bf16.msra.mxu0 %v6917_v61  ;;  %v6954_v61 = vld [vmem:[%s7722_s9 + $0x1a8] sm:$0xff]  }
 0x55d   :  { %6309 = vmatpush3.bf16.msra.mxu1 %v6918_v62  ;;  %6288 = vmatprep.subr.bf16.mxu0 %v6919_v63  ;;  %v6955_v62 = vld [vmem:[%s7722_s9 + $0x170] sm:$0xff]  }
 0x55e   :  { %6310 = vmatprep.subr.bf16.mxu1 %v6920_v2  ;;  %v6956_v63 = vld [vmem:[%s7722_s9 + $0x1f0] sm:$0xff]  }
 0x55f   :  { %v6957_v2 = vld [vmem:[%s7722_s9 + $0x130] sm:$0xff]  }
 0x560   :  { %6289 = vmatpush3.bf16.msra.mxu0 %v6921_v0  ;;  %v6958_v0 = vld [vmem:[%s7722_s9 + $0x1b0] sm:$0xff]  }
 0x561   :  { %6311 = vmatpush3.bf16.msra.mxu1 %v6922_v4  ;;  %6290 = vmatprep.subr.bf16.mxu0 %v6923_v5  ;;  %v6959_v4 = vld [vmem:[%s7722_s9 + $0x178] sm:$0xff]  }
 0x562   :  { %6312 = vmatprep.subr.bf16.mxu1 %v6924_v9  ;;  %v6960_v5 = vld [vmem:[%s7722_s9 + $0x1f8] sm:$0xff]  }
 0x563   :  { %v6961_v9 = vld [vmem:[%s7722_s9 + $0x138] sm:$0xff]  }
 0x564   :  { %6291 = vmatpush3.bf16.msra.mxu0 %v6925_v12  ;;  %v6962_v12 = vld [vmem:[%s7722_s9 + $0x1b8] sm:$0xff]  }
 0x565   :  { %6313 = vmatpush3.bf16.msra.mxu1 %v6926_v13  ;;  %6292 = vmatprep.subr.bf16.mxu0 %v6927_v14  ;;  %v3223_v13 = vsub.s32 4, %v7336_v6  ;;  %v3231_v14 = vsub.s32 6, %v7336_v6 }
 0x566   :  { %6314 = vmatprep.subr.bf16.mxu1 %v6928_v15  ;;  %v3227_v15 = vsub.s32 5, %v7336_v6 }
 0x568   :  { %6293 = vmatpush3.bf16.msra.mxu0 %v6929_v16  ;;  %v3235_v16 = vsub.s32 7, %v7336_v6 }
 0x569   :  { %6315 = vmatpush3.bf16.msra.mxu1 %v6930_v17  ;;  %6322 = vmatprep.subr.bf16.mxu0 %v6931_v18  ;;  %v3224_v17 = vrot.slane %v7590_v21, %v3223_v13  ;;  %v3232_v18 = vrot.slane %v7590_v21, %v3231_v14 }
 0x56a   :  { %6344 = vmatprep.subr.bf16.mxu1 %v6932_v19  ;;  %v3228_v19 = vrot.slane %v7590_v21, %v3227_v15 }
 0x59e   :  { %v4600_v27 = vpop.f32.mrb[20].mxu0  ;;  %v4682_v43 = vpop.f32.mrb[20].mxu1 }
 0x59f   :  { %v6370_v28 = vadd.f32 %v4600_v27, %v3208_v22  ;;  %v6372_v29 = vadd.f32 %v4682_v43, %v3216_v24  ;;  %v4602_v30 = vpop.f32.mrb[21].mxu0  ;;  %v4684_v23 = vpop.f32.mrb[21].mxu1  ;;  %v3236_v22 = vrot.slane %v7590_v21, %v3235_v16 }
 0x5a0   :  { %v6371_v31 = vadd.f32 %v4602_v30, %v3212_v26  ;;  %v6373_v7 = vadd.f32 %v4684_v23, %v3220_v3  ;;  %v4604_v32 = vpop.f32.mrb[22].mxu0  ;;  %v4686_v20 = vpop.f32.mrb[22].mxu1 }
 0x5a1   :  { %v4853_v33 = vpack.c.bf16 %v6370_v28, %v6370_v28  ;;  %v4855_v8 = vpack.c.bf16 %v6372_v29, %v6372_v29  ;;  %v4605_v34 = vpop.f32.mrb[23].mxu0  ;;  %v4687_v36 = vpop.f32.mrb[23].mxu1 }
 0x5a2   :  { %v4854_v35 = vpack.c.bf16 %v6371_v31, %v6371_v31  ;;  %v4856_v10 = vpack.c.bf16 %v6373_v7, %v6373_v7 }
 0x5a3   :  { %v4861_v40 = vmax.bf16 %v7069_v1, %v4853_v33  ;;  %v4863_v41 = vmax.bf16 %v7069_v1, %v4855_v8 }
 0x5a4   :  { %v4862_v37 = vmax.bf16 %v7069_v1, %v4854_v35  ;;  %v4864_v11 = vmax.bf16 %v7069_v1, %v4856_v10 }
 0x5a6   :  { %5420 = vmatprep.mubr.bf16.mxu0 %v4862_v37  ;;  %5460 = vmatprep.mubr.bf16.mxu1 %v4864_v11  ;;  %v6168_v11 = vld [vmem:[#allocation2] ss:$0 sm:$0xff] }
 0x5a7   :  { %5421 = vmatmul.mubr.bf16.vlgmr.msra.gmra.mrb[28].mxu0 %v4861_v40  ;;  %5461 = vmatmul.mubr.bf16.vlgmr.msra.gmra.mrb[28].mxu1 %v4863_v41 }
 0x5a8   :  { %6323 = vmatpush3.bf16.msra.mxu0 %v6933_v39  ;;  %6345 = vmatpush3.bf16.msra.mxu1 %v6934_v38 }
 0x5a9   :  { %6324 = vmatprep.subr.bf16.mxu0 %v6935_v42  ;;  %6346 = vmatprep.subr.bf16.mxu1 %v6936_v57 }
 0x5ac   :  { %6325 = vmatpush3.bf16.msra.mxu0 %v6937_v44  ;;  %6347 = vmatpush3.bf16.msra.mxu1 %v6938_v45 }
 0x5ad   :  { %6326 = vmatprep.subr.bf16.mxu0 %v6939_v46  ;;  %6348 = vmatprep.subr.bf16.mxu1 %v6940_v47 }
 0x5b0   :  { %6327 = vmatpush3.bf16.msra.mxu0 %v6941_v48  ;;  %6349 = vmatpush3.bf16.msra.mxu1 %v6942_v49 }
 0x5b1   :  { %6328 = vmatprep.subr.bf16.mxu0 %v6943_v50  ;;  %6350 = vmatprep.subr.bf16.mxu1 %v6944_v51 }
 0x5b4   :  { %6329 = vmatpush3.bf16.msra.mxu0 %v6945_v25  ;;  %6351 = vmatpush3.bf16.msra.mxu1 %v6946_v52 }
 0x5b5   :  { %6330 = vmatprep.subr.bf16.mxu0 %v6947_v53  ;;  %6352 = vmatprep.subr.bf16.mxu1 %v6948_v54 }
 0x5b8   :  { %6331 = vmatpush3.bf16.msra.mxu0 %v6949_v55  ;;  %6353 = vmatpush3.bf16.msra.mxu1 %v6950_v58 }
 0x5b9   :  { %6332 = vmatprep.subr.bf16.mxu0 %v6951_v56  ;;  %6354 = vmatprep.subr.bf16.mxu1 %v6952_v59 }
 0x5bc   :  { %6333 = vmatpush3.bf16.msra.mxu0 %v6953_v60  ;;  %6355 = vmatpush3.bf16.msra.mxu1 %v6954_v61 }
 0x5bd   :  { %6334 = vmatprep.subr.bf16.mxu0 %v6955_v62  ;;  %6356 = vmatprep.subr.bf16.mxu1 %v6956_v63 }
 0x5c0   :  { %6335 = vmatpush3.bf16.msra.mxu0 %v6957_v2  ;;  %6357 = vmatpush3.bf16.msra.mxu1 %v6958_v0 }
 0x5c1   :  { %6336 = vmatprep.subr.bf16.mxu0 %v6959_v4  ;;  %6358 = vmatprep.subr.bf16.mxu1 %v6960_v5 }
 0x5c4   :  { %6337 = vmatpush3.bf16.msra.mxu0 %v6961_v9  ;;  %6359 = vmatpush3.bf16.msra.mxu1 %v6962_v12 }
 0x61e   :  { %v4764_v24 = vpop.f32.mrb[24].mxu0 }
 0x61f   :  { %v6374_v26 = vadd.f32 %v4764_v24, %v3224_v17  ;;  %v4846_v3 = vpop.f32.mrb[24].mxu1  ;;  %v4766_v27 = vpop.f32.mrb[25].mxu0 }
 0x620   :  { %v6376_v43 = vadd.f32 %v4846_v3, %v3232_v18  ;;  %v6375_v28 = vadd.f32 %v4766_v27, %v3228_v19  ;;  %v4848_v29 = vpop.f32.mrb[25].mxu1  ;;  %v4768_v30 = vpop.f32.mrb[26].mxu0 }
 0x621   :  { %v4857_v23 = vpack.c.bf16 %v6374_v26, %v6374_v26  ;;  %v6377_v31 = vadd.f32 %v4848_v29, %v3236_v22  ;;  %v4850_v7 = vpop.f32.mrb[26].mxu1  ;;  %v4769_v6 = vpop.f32.mrb[27].mxu0 }
 0x622   :  { %v4859_v32 = vpack.c.bf16 %v6376_v43, %v6376_v43  ;;  %v4858_v20 = vpack.c.bf16 %v6375_v28, %v6375_v28  ;;  %v4851_v33 = vpop.f32.mrb[27].mxu1 }
 0x623   :  { %v4860_v8 = vpack.c.bf16 %v6377_v31, %v6377_v31  ;;  %v4865_v21 = vmax.bf16 %v7069_v1, %v4857_v23 }
 0x624   :  { %v4866_v34 = vmax.bf16 %v7069_v1, %v4858_v20  ;;  %v4867_v35 = vmax.bf16 %v7069_v1, %v4859_v32 }
 0x625   :  { %v4868_v36 = vmax.bf16 %v7069_v1, %v4860_v8 }
 0x626   :  { %5500 = vmatprep.mubr.bf16.mxu0 %v4866_v34 }
 0x627   :  { %5540 = vmatprep.mubr.bf16.mxu1 %v4868_v36  ;;  %5501 = vmatmul.mubr.bf16.vlgmr.msra.gmra.mrb[32].mxu0 %v4865_v21 }
 0x628   :  { %5541 = vmatmul.mubr.bf16.vlgmr.msra.gmra.mrb[32].mxu1 %v4867_v35 }
 0x67a   :  { %v6294_v10 = vpop.f32.mrb[28].mxu0  ;;  %v6316_v37 = vpop.f32.mrb[28].mxu1 }
 0x67b   :  { %v6295_v39 = vpop.f32.mrb[29].mxu0  ;;  %v6317_v38 = vpop.f32.mrb[29].mxu1 }
 0x67c   :  { %v6296_v40 = vadd.f32 %v6295_v39, %v6294_v10  ;;  %v6318_v41 = vadd.f32 %v6317_v38, %v6316_v37  ;;  %v6297_v42 = vpop.f32.mrb[30].mxu0  ;;  %v6319_v57 = vpop.f32.mrb[30].mxu1 }
 0x67d   :  { %v6298_v44 = vpop.f32.mrb[31].mxu0  ;;  %v6320_v45 = vpop.f32.mrb[31].mxu1 }
 0x67e   :  { %v5423_v46 = vadd.f32 %v6296_v40, %v6168_v11 }
 0x680   :  { %v5463_v47 = vadd.f32 %v6318_v41, %v5423_v46 }
 0x6fa   :  { %v6338_v48 = vpop.f32.mrb[32].mxu0 }
 0x6fb   :  { %v6360_v49 = vpop.f32.mrb[32].mxu1  ;;  %v6339_v1 = vpop.f32.mrb[33].mxu0 }
 0x6fc   :  { %v6340_v50 = vadd.f32 %v6339_v1, %v6338_v48  ;;  %v6361_v51 = vpop.f32.mrb[33].mxu1  ;;  %v6341_v25 = vpop.f32.mrb[34].mxu0 }
 0x6fd   :  { %v6362_v52 = vadd.f32 %v6361_v51, %v6360_v49  ;;  %v6363_v53 = vpop.f32.mrb[34].mxu1  ;;  %v6342_v54 = vpop.f32.mrb[35].mxu0 }
 0x6fe   :  { %v5503_v55 = vadd.f32 %v6340_v50, %v5463_v47  ;;  %v6364_v58 = vpop.f32.mrb[35].mxu1 }
 0x700   :  { %v5543_v56 = vadd.f32 %v6362_v52, %v5503_v55 }
 0x702   :  { %v6233_v59 = vmul.f32 -1.442695, %v5543_v56 }
 0x704   :  { %6963 = vpow2.f32 %v6233_v59 }
 0x70e   :  { %v6964_v60 = vpop.eup %6963 }
 0x70f   :  { %v5551_v61 = vadd.f32 1.0, %v6964_v60 }
 0x711   :  { %6965 = vrcp.f32 %v5551_v61 }
 0x71b   :  { %v6966_v62 = vpop.eup %6965 }
 0x71c   :  { %5555 = vst.msk [vmem:[%s7724_s11] sm:$0xff] %vm5554_vm2, %v6966_v62 }
 0x71d   :  { %5560 = vsyncpa [#allocation4], 1 }
 0x71e   :  { %5561 = vsyncpa [#allocation6], 1 }
 0x71f   :  { %5562 = vsyncpa [#allocation9], 1 }

</bundles_post_ra>
